<compile_context>
chip_gen: v5e
topology: v5e:2x2
jax: 0.10.0
libtpu: 0.0.40
codegen_flags: <defaults>
</compile_context>

<pallas_src>
import functools
import math

import jax
import jax.numpy as jnp
from jax.experimental import pallas as pl
from jax.experimental.pallas import tpu as pltpu


LATENT_DIM = 2
FEATS = [512, 256, 128, 64, 32]
PAD_TAIL = 128         # tail-layer weights zero-padded to a full lane width
OUT_PAD = 8            # output slab width (>= LATENT_DIM, == full array last dim)
MAX_BLOCK_ROWS = 1024  # cap on rows per grid step

_INV_SQRT2 = 0.7071067811865476


def _round_up(n, m):
    return (n + m - 1) // m * m


def _gelu_exact(v):
    # nn.GELU() default (approximate='none'): 0.5 * x * (1 + erf(x / sqrt(2))).
    # Python-float constants are weakly typed, so this stays in v.dtype (f32 or bf16).
    return 0.5 * v * (1.0 + jax.lax.erf(v * _INV_SQRT2))


def ae_encoder_kernel(x_ref, w0_ref, w1_ref, w2_ref, wt_ref, b_ref, out_ref, *,
                      compute_dtype):
    """One batch tile: 6 fused Linear(+GELU) layers.

    bf16 MXU inputs, f32 accumulation; bias add + GELU in `compute_dtype`
    (bf16 on v6e/v7x, f32 on v5e); final layer kept in f32.
    """
    cdt = compute_dtype

    def layer(h, w_bf16, bias_f32, act=True):
        y = jnp.dot(h.astype(jnp.bfloat16), w_bf16,
                    preferred_element_type=jnp.float32)
        if act:
            y = y.astype(cdt) + bias_f32.astype(cdt)
            return _gelu_exact(y)
        return y + bias_f32          # final layer: no activation, stay f32

    b = b_ref[...]                   # (8, 512) packed f32 biases
    h = x_ref[...]                   # (TB, input_dim) f32

    h = layer(h, w0_ref[...], b[0:1, 0:512])              # (TB, 512)
    h = layer(h, w1_ref[...], b[1:2, 0:256])              # (TB, 256)
    h = layer(h, w2_ref[...], b[2:3, 0:128])              # (TB, 128)
    h = layer(h, wt_ref[0],   b[3:4, 0:128])              # (TB, 128)  cols >= 64 are 0
    h = layer(h, wt_ref[1],   b[4:5, 0:128])              # (TB, 128)  cols >= 32 are 0
    z = layer(h, wt_ref[2],   b[5:6, 0:128], act=False)   # (TB, 128)  cols >= 2  are 0

    out_ref[...] = z[:, :OUT_PAD].astype(out_ref.dtype)   # narrow (TB, 8) store


def init_params(key, input_dim, latent_dim=LATENT_DIM, feats=FEATS):
    """PyTorch-Linear-style init: U(-1/sqrt(fan_in), 1/sqrt(fan_in)); W stored as (in, out)."""
    dims = [input_dim] + list(feats) + [latent_dim]
    params = []
    for i in range(len(dims) - 1):
        fan_in, fan_out = dims[i], dims[i + 1]
        key, kw, kb = jax.random.split(key, 3)
        bound = 1.0 / math.sqrt(fan_in)
        w = jax.random.uniform(kw, (fan_in, fan_out), jnp.float32, -bound, bound)
        b = jax.random.uniform(kb, (1, fan_out), jnp.float32, -bound, bound)
        params.append((w, b))
    return params


def prepare_params(params):
    """Pack/pad the 6 (W, b) pairs into 5 lane-aligned kernel operands (bf16 weights)."""
    ws = [jnp.asarray(w) for (w, _) in params]
    bs = [jnp.asarray(b).reshape(-1) for (_, b) in params]

    def pad2(w, rows, cols):
        return jnp.pad(w, ((0, rows - w.shape[0]), (0, cols - w.shape[1])))

    w0 = ws[0].astype(jnp.bfloat16)                      # (input_dim, 512)
    w1 = ws[1].astype(jnp.bfloat16)                      # (512, 256)
    w2 = ws[2].astype(jnp.bfloat16)                      # (256, 128)
    # Tail layers padded with zero rows/cols to (128,128); zero padding is exact, so the
    # extra lanes carry exact zeros through GELU and do not perturb the true outputs.
    w_tail = jnp.stack([
        pad2(ws[3], PAD_TAIL, PAD_TAIL),                 # (128, 64) -> (128, 128)
        pad2(ws[4], PAD_TAIL, PAD_TAIL),                 # (64, 32)  -> (128, 128)
        pad2(ws[5], PAD_TAIL, PAD_TAIL),                 # (32, 2)   -> (128, 128)
    ]).astype(jnp.bfloat16)                              # (3, 128, 128)

    bias_pack = jnp.zeros((8, FEATS[0]), jnp.float32)    # one DMA instead of six tiny ones
    for i, b in enumerate(bs):
        bias_pack = bias_pack.at[i, : b.shape[0]].set(b.astype(jnp.float32))

    return (w0, w1, w2, w_tail, bias_pack)


@functools.partial(jax.jit, static_argnames=("block_rows", "compute_dtype"))
def ae_encoder_forward(x, packed, *, block_rows=None, compute_dtype=jnp.float32):
    """x: (batch, input_dim) f32.  packed: output of prepare_params.  Returns (batch, 2) f32."""
    w0, w1, w2, w_tail, bias_pack = packed
    batch, input_dim = x.shape

    if block_rows is None:
        # >= 2 grid steps whenever batch allows (v7x megacore), tile capped at 1024 rows.
        block_rows = min(MAX_BLOCK_ROWS, max(8, _round_up(pl.cdiv(batch, 2), 8)))
    block_rows = max(8, _round_up(block_rows, 8))

    grid = (pl.cdiv(batch, block_rows),)   # no wrapper-side padding; edge block is masked

    def const2(i):   # weight/bias blocks: same block every step -> stays VMEM-resident
        return (0, 0)

    in_specs = [
        pl.BlockSpec((block_rows, input_dim), lambda i: (i, 0)),      # x tile
        pl.BlockSpec(w0.shape, const2),
        pl.BlockSpec(w1.shape, const2),
        pl.BlockSpec(w2.shape, const2),
        pl.BlockSpec(w_tail.shape, lambda i: (0, 0, 0)),
        pl.BlockSpec(bias_pack.shape, const2),
    ]
    out_specs = pl.BlockSpec((block_rows, OUT_PAD), lambda i: (i, 0))
    out_shape = jax.ShapeDtypeStruct((batch, OUT_PAD), jnp.float32)

    dims = [input_dim] + FEATS + [LATENT_DIM]
    flops = 2 * batch * sum(a * b for a, b in zip(dims[:-1], dims[1:]))
    transcendentals = batch * sum(FEATS)   # one erf per hidden activation
    bytes_accessed = int(
        x.size * x.dtype.itemsize
        + sum(int(p.size) * p.dtype.itemsize for p in (w0, w1, w2, w_tail, bias_pack))
        + batch * OUT_PAD * 4
    )

    kernel = functools.partial(ae_encoder_kernel, compute_dtype=compute_dtype)

    out = pl.pallas_call(
        kernel,
        out_shape=out_shape,
        grid=grid,
        in_specs=in_specs,
        out_specs=out_specs,
        compiler_params=pltpu.CompilerParams(
            dimension_semantics=("parallel",),
            vmem_limit_bytes=(32 << 20) if block_rows > 1024 else (16 << 20),
        ),
        cost_estimate=pl.CostEstimate(
            flops=flops,
            transcendentals=transcendentals,
            bytes_accessed=bytes_accessed,
        ),
    )(x, w0, w1, w2, w_tail, bias_pack)

    return out[:, :LATENT_DIM]


def select_compute_dtype(packed, input_dim):
    """bf16 elementwise path on chips with a bf16 VPU/EUP (v6e/v7x); f32 otherwise.

    Uses a tiny compile-probe so an unexpected lowering failure (e.g. bf16 erf on some
    backend) falls back to the proven f32 path instead of crashing.
    """
    try:
        kind = jax.devices()[0].device_kind.lower()
    except Exception:
        kind = ""
    if any(tag in kind for tag in ("v2", "v3", "v4", "v5")):
        return jnp.float32          # no bf16 VPU/EUP on these generations
    try:
        xp = jnp.zeros((8, input_dim), jnp.float32)
        jax.block_until_ready(ae_encoder_forward(xp, packed, compute_dtype=jnp.bfloat16))
        return jnp.bfloat16
    except Exception:
        return jnp.float32


def _reference(x, params, compute_dtype):
    """Pure-JAX mirror of the kernel math (bf16 matmul inputs, f32 accumulation,
    bias+GELU in compute_dtype, final layer f32, exact erf GELU)."""
    cdt = compute_dtype
    h = x.astype(jnp.float32)
    n = len(params)
    for i, (w, b) in enumerate(params):
        y = jnp.dot(h.astype(jnp.bfloat16), w.astype(jnp.bfloat16),
                    preferred_element_type=jnp.float32)
        bias = b.reshape(1, -1).astype(jnp.float32)
        if i < n - 1:
            y = y.astype(cdt) + bias.astype(cdt)
            h = _gelu_exact(y)
        else:
            h = y + bias
    return h


if __name__ == "__main__":
    key = jax.random.PRNGKey(0)
    k_params, k_x = jax.random.split(key)

    input_dim = 128   # matches x = np.linspace(0, 1, 128) in the source file
    params = init_params(k_params, input_dim)
    packed = prepare_params(params)

    cdt = select_compute_dtype(packed, input_dim)
    tol = 1e-3 if cdt == jnp.float32 else 2e-2   # bf16 elementwise path needs bf16-scale tol

    # Case 1: tiny batch -> single grid step
    batch = 8
    x = jax.random.normal(k_x, (batch, input_dim), dtype=jnp.float32)
    z = ae_encoder_forward(x, packed, compute_dtype=cdt)
    jax.block_until_ready(z)
    z_ref = _reference(x, params, cdt)
    assert z.shape == (batch, LATENT_DIM)
    assert jnp.allclose(z, z_ref, atol=tol, rtol=tol), float(jnp.max(jnp.abs(z - z_ref)))

    # Case 2: batch not a multiple of the row tile -> multi-step grid with a masked edge
    # block (no wrapper-side padding); weights stay VMEM-resident across the 3 steps.
    batch2 = 40
    x2 = jax.random.normal(jax.random.PRNGKey(1), (batch2, input_dim), dtype=jnp.float32)
    z2 = ae_encoder_forward(x2, packed, block_rows=16, compute_dtype=cdt)
    jax.block_until_ready(z2)
    z2_ref = _reference(x2, params, cdt)
    assert z2.shape == (batch2, LATENT_DIM)
    assert jnp.allclose(z2, z2_ref, atol=tol, rtol=tol), float(jnp.max(jnp.abs(z2 - z2_ref)))

    print("KERNEL_OK")
</pallas_src>

<mosaic_0001>
module attributes {stable_mosaic.version = 11 : i64} {
  func.func @ae_encoder_kernel(%arg0: i32, %arg1: memref<8x128xf32, #tpu.memory_space<vmem>>, %arg2: memref<128x512xbf16, #tpu.memory_space<vmem>>, %arg3: memref<512x256xbf16, #tpu.memory_space<vmem>>, %arg4: memref<256x128xbf16, #tpu.memory_space<vmem>>, %arg5: memref<3x128x128xbf16, #tpu.memory_space<vmem>>, %arg6: memref<8x512xf32, #tpu.memory_space<vmem>>, %arg7: memref<8x8xf32, #tpu.memory_space<vmem>>) attributes {dimension_semantics = [#tpu.dimension_semantics<parallel>], iteration_bounds = array<i64: 1>, scalar_prefetch = 0 : i64, scratch_operands = 0 : i64, tpu.core_type = #tpu.core_type<tc>, window_params = [{transform_indices = @transform_0, window_bounds = array<i64: 8, 128>}, {pipeline_mode = #tpu.pipeline_mode<synchronous>, transform_indices = @transform_1, window_bounds = array<i64: 128, 512>}, {pipeline_mode = #tpu.pipeline_mode<synchronous>, transform_indices = @transform_2, window_bounds = array<i64: 512, 256>}, {pipeline_mode = #tpu.pipeline_mode<synchronous>, transform_indices = @transform_3, window_bounds = array<i64: 256, 128>}, {pipeline_mode = #tpu.pipeline_mode<synchronous>, transform_indices = @transform_4, window_bounds = array<i64: 3, 128, 128>}, {pipeline_mode = #tpu.pipeline_mode<synchronous>, transform_indices = @transform_5, window_bounds = array<i64: 8, 512>}, {transform_indices = @transform_6, window_bounds = array<i64: 8, 8>}]} {
    %c0 = arith.constant 0 : index
    %c0_0 = arith.constant 0 : index
    %0 = vector.load %arg6[%c0, %c0_0] : memref<8x512xf32, #tpu.memory_space<vmem>>, vector<8x512xf32>
    %c0_1 = arith.constant 0 : index
    %c0_2 = arith.constant 0 : index
    %1 = vector.load %arg1[%c0_1, %c0_2] : memref<8x128xf32, #tpu.memory_space<vmem>>, vector<8x128xf32>
    %c0_3 = arith.constant 0 : index
    %c0_4 = arith.constant 0 : index
    %2 = vector.load %arg2[%c0_3, %c0_4] : memref<128x512xbf16, #tpu.memory_space<vmem>>, vector<128x512xbf16>
    %3 = vector.extract_strided_slice %0 {offsets = [0, 0], sizes = [1, 512], strides = [1, 1]} : vector<8x512xf32> to vector<1x512xf32>
    %4 = arith.truncf %1 : vector<8x128xf32> to vector<8x128xbf16>
    %cst = arith.constant dense<0.000000e+00> : vector<8x512xf32>
    %5 = tpu.matmul %4, %2, %cst {dimension_numbers = #tpu.dot_dimension_numbers<[1], [0], [0], [1], [0, 0, 1, 1], [], []>} : vector<8x128xbf16>, vector<128x512xbf16>, vector<8x512xf32> -> vector<8x512xf32>
    %6 = arith.truncf %5 : vector<8x512xf32> to vector<8x512xbf16>
    %7 = arith.truncf %3 : vector<1x512xf32> to vector<1x512xbf16>
    %8 = vector.broadcast %7 : vector<1x512xbf16> to vector<8x512xbf16>
    %9 = arith.addf %6, %8 : vector<8x512xbf16>
    %cst_5 = arith.constant 5.000000e-01 : bf16
    %10 = vector.broadcast %cst_5 : bf16 to vector<8x512xbf16>
    %11 = arith.mulf %10, %9 : vector<8x512xbf16>
    %cst_6 = arith.constant 7.070310e-01 : bf16
    %12 = vector.broadcast %cst_6 : bf16 to vector<8x512xbf16>
    %13 = arith.mulf %9, %12 : vector<8x512xbf16>
    %14 = math.erf %13 : vector<8x512xbf16>
    %cst_7 = arith.constant 1.000000e+00 : bf16
    %15 = vector.broadcast %cst_7 : bf16 to vector<8x512xbf16>
    %16 = arith.addf %15, %14 : vector<8x512xbf16>
    %17 = arith.mulf %11, %16 : vector<8x512xbf16>
    %c0_8 = arith.constant 0 : index
    %c0_9 = arith.constant 0 : index
    %18 = vector.load %arg3[%c0_8, %c0_9] : memref<512x256xbf16, #tpu.memory_space<vmem>>, vector<512x256xbf16>
    %19 = vector.extract_strided_slice %0 {offsets = [1, 0], sizes = [1, 256], strides = [1, 1]} : vector<8x512xf32> to vector<1x256xf32>
    %cst_10 = arith.constant dense<0.000000e+00> : vector<8x256xf32>
    %20 = tpu.matmul %17, %18, %cst_10 {dimension_numbers = #tpu.dot_dimension_numbers<[1], [0], [0], [1], [0, 0, 1, 1], [], []>} : vector<8x512xbf16>, vector<512x256xbf16>, vector<8x256xf32> -> vector<8x256xf32>
    %21 = arith.truncf %20 : vector<8x256xf32> to vector<8x256xbf16>
    %22 = arith.truncf %19 : vector<1x256xf32> to vector<1x256xbf16>
    %23 = vector.broadcast %22 : vector<1x256xbf16> to vector<8x256xbf16>
    %24 = arith.addf %21, %23 : vector<8x256xbf16>
    %cst_11 = arith.constant 5.000000e-01 : bf16
    %25 = vector.broadcast %cst_11 : bf16 to vector<8x256xbf16>
    %26 = arith.mulf %25, %24 : vector<8x256xbf16>
    %cst_12 = arith.constant 7.070310e-01 : bf16
    %27 = vector.broadcast %cst_12 : bf16 to vector<8x256xbf16>
    %28 = arith.mulf %24, %27 : vector<8x256xbf16>
    %29 = math.erf %28 : vector<8x256xbf16>
    %cst_13 = arith.constant 1.000000e+00 : bf16
    %30 = vector.broadcast %cst_13 : bf16 to vector<8x256xbf16>
    %31 = arith.addf %30, %29 : vector<8x256xbf16>
    %32 = arith.mulf %26, %31 : vector<8x256xbf16>
    %c0_14 = arith.constant 0 : index
    %c0_15 = arith.constant 0 : index
    %33 = vector.load %arg4[%c0_14, %c0_15] : memref<256x128xbf16, #tpu.memory_space<vmem>>, vector<256x128xbf16>
    %34 = vector.extract_strided_slice %0 {offsets = [2, 0], sizes = [1, 128], strides = [1, 1]} : vector<8x512xf32> to vector<1x128xf32>
    %cst_16 = arith.constant dense<0.000000e+00> : vector<8x128xf32>
    %35 = tpu.matmul %32, %33, %cst_16 {dimension_numbers = #tpu.dot_dimension_numbers<[1], [0], [0], [1], [0, 0, 1, 1], [], []>} : vector<8x256xbf16>, vector<256x128xbf16>, vector<8x128xf32> -> vector<8x128xf32>
    %36 = arith.truncf %35 : vector<8x128xf32> to vector<8x128xbf16>
    %37 = arith.truncf %34 : vector<1x128xf32> to vector<1x128xbf16>
    %38 = vector.broadcast %37 : vector<1x128xbf16> to vector<8x128xbf16>
    %39 = arith.addf %36, %38 : vector<8x128xbf16>
    %cst_17 = arith.constant 5.000000e-01 : bf16
    %40 = vector.broadcast %cst_17 : bf16 to vector<8x128xbf16>
    %41 = arith.mulf %40, %39 : vector<8x128xbf16>
    %cst_18 = arith.constant 7.070310e-01 : bf16
    %42 = vector.broadcast %cst_18 : bf16 to vector<8x128xbf16>
    %43 = arith.mulf %39, %42 : vector<8x128xbf16>
    %44 = math.erf %43 : vector<8x128xbf16>
    %cst_19 = arith.constant 1.000000e+00 : bf16
    %45 = vector.broadcast %cst_19 : bf16 to vector<8x128xbf16>
    %46 = arith.addf %45, %44 : vector<8x128xbf16>
    %47 = arith.mulf %41, %46 : vector<8x128xbf16>
    %c0_20 = arith.constant 0 : index
    %c0_21 = arith.constant 0 : index
    %c0_22 = arith.constant 0 : index
    %48 = vector.load %arg5[%c0_20, %c0_21, %c0_22] : memref<3x128x128xbf16, #tpu.memory_space<vmem>>, vector<1x128x128xbf16>
    %49 = vector.shape_cast %48 : vector<1x128x128xbf16> to vector<128x128xbf16>
    %50 = vector.extract_strided_slice %0 {offsets = [3, 0], sizes = [1, 128], strides = [1, 1]} : vector<8x512xf32> to vector<1x128xf32>
    %cst_23 = arith.constant dense<0.000000e+00> : vector<8x128xf32>
    %51 = tpu.matmul %47, %49, %cst_23 {dimension_numbers = #tpu.dot_dimension_numbers<[1], [0], [0], [1], [0, 0, 1, 1], [], []>} : vector<8x128xbf16>, vector<128x128xbf16>, vector<8x128xf32> -> vector<8x128xf32>
    %52 = arith.truncf %51 : vector<8x128xf32> to vector<8x128xbf16>
    %53 = arith.truncf %50 : vector<1x128xf32> to vector<1x128xbf16>
    %54 = vector.broadcast %53 : vector<1x128xbf16> to vector<8x128xbf16>
    %55 = arith.addf %52, %54 : vector<8x128xbf16>
    %cst_24 = arith.constant 5.000000e-01 : bf16
    %56 = vector.broadcast %cst_24 : bf16 to vector<8x128xbf16>
    %57 = arith.mulf %56, %55 : vector<8x128xbf16>
    %cst_25 = arith.constant 7.070310e-01 : bf16
    %58 = vector.broadcast %cst_25 : bf16 to vector<8x128xbf16>
    %59 = arith.mulf %55, %58 : vector<8x128xbf16>
    %60 = math.erf %59 : vector<8x128xbf16>
    %cst_26 = arith.constant 1.000000e+00 : bf16
    %61 = vector.broadcast %cst_26 : bf16 to vector<8x128xbf16>
    %62 = arith.addf %61, %60 : vector<8x128xbf16>
    %63 = arith.mulf %57, %62 : vector<8x128xbf16>
    %c1 = arith.constant 1 : index
    %c0_27 = arith.constant 0 : index
    %c0_28 = arith.constant 0 : index
    %64 = vector.load %arg5[%c1, %c0_27, %c0_28] : memref<3x128x128xbf16, #tpu.memory_space<vmem>>, vector<1x128x128xbf16>
    %65 = vector.shape_cast %64 : vector<1x128x128xbf16> to vector<128x128xbf16>
    %66 = vector.extract_strided_slice %0 {offsets = [4, 0], sizes = [1, 128], strides = [1, 1]} : vector<8x512xf32> to vector<1x128xf32>
    %cst_29 = arith.constant dense<0.000000e+00> : vector<8x128xf32>
    %67 = tpu.matmul %63, %65, %cst_29 {dimension_numbers = #tpu.dot_dimension_numbers<[1], [0], [0], [1], [0, 0, 1, 1], [], []>} : vector<8x128xbf16>, vector<128x128xbf16>, vector<8x128xf32> -> vector<8x128xf32>
    %68 = arith.truncf %67 : vector<8x128xf32> to vector<8x128xbf16>
    %69 = arith.truncf %66 : vector<1x128xf32> to vector<1x128xbf16>
    %70 = vector.broadcast %69 : vector<1x128xbf16> to vector<8x128xbf16>
    %71 = arith.addf %68, %70 : vector<8x128xbf16>
    %cst_30 = arith.constant 5.000000e-01 : bf16
    %72 = vector.broadcast %cst_30 : bf16 to vector<8x128xbf16>
    %73 = arith.mulf %72, %71 : vector<8x128xbf16>
    %cst_31 = arith.constant 7.070310e-01 : bf16
    %74 = vector.broadcast %cst_31 : bf16 to vector<8x128xbf16>
    %75 = arith.mulf %71, %74 : vector<8x128xbf16>
    %76 = math.erf %75 : vector<8x128xbf16>
    %cst_32 = arith.constant 1.000000e+00 : bf16
    %77 = vector.broadcast %cst_32 : bf16 to vector<8x128xbf16>
    %78 = arith.addf %77, %76 : vector<8x128xbf16>
    %79 = arith.mulf %73, %78 : vector<8x128xbf16>
    %c2 = arith.constant 2 : index
    %c0_33 = arith.constant 0 : index
    %c0_34 = arith.constant 0 : index
    %80 = vector.load %arg5[%c2, %c0_33, %c0_34] : memref<3x128x128xbf16, #tpu.memory_space<vmem>>, vector<1x128x128xbf16>
    %81 = vector.shape_cast %80 : vector<1x128x128xbf16> to vector<128x128xbf16>
    %82 = vector.extract_strided_slice %0 {offsets = [5, 0], sizes = [1, 128], strides = [1, 1]} : vector<8x512xf32> to vector<1x128xf32>
    %cst_35 = arith.constant dense<0.000000e+00> : vector<8x128xf32>
    %83 = tpu.matmul %79, %81, %cst_35 {dimension_numbers = #tpu.dot_dimension_numbers<[1], [0], [0], [1], [0, 0, 1, 1], [], []>} : vector<8x128xbf16>, vector<128x128xbf16>, vector<8x128xf32> -> vector<8x128xf32>
    %84 = vector.broadcast %82 : vector<1x128xf32> to vector<8x128xf32>
    %85 = arith.addf %83, %84 : vector<8x128xf32>
    %86 = vector.extract_strided_slice %85 {offsets = [0, 0], sizes = [8, 8], strides = [1, 1]} : vector<8x128xf32> to vector<8x8xf32>
    %c0_36 = arith.constant 0 : index
    %c0_37 = arith.constant 0 : index
    %87 = vector.load %arg7[%c0_36, %c0_37] : memref<8x8xf32, #tpu.memory_space<vmem>>, vector<8x8xf32>
    tpu.vector_store %arg7[%c0_36, %c0_37], %86 {strides = array<i32>} : memref<8x8xf32, #tpu.memory_space<vmem>>, vector<8x8xf32>,
    return
  }
  func.func @transform_0(%arg0: i32) -> (i32, i32) {
    %c0_i32 = arith.constant 0 : i32
    %c0_i32_0 = arith.constant 0 : i32
    return %arg0, %c0_i32 : i32, i32
  }
  func.func @transform_1(%arg0: i32) -> (i32, i32) {
    %c0_i32 = arith.constant 0 : i32
    %c0_i32_0 = arith.constant 0 : i32
    %c0_i32_1 = arith.constant 0 : i32
    return %c0_i32, %c0_i32_0 : i32, i32
  }
  func.func @transform_2(%arg0: i32) -> (i32, i32) {
    %c0_i32 = arith.constant 0 : i32
    %c0_i32_0 = arith.constant 0 : i32
    %c0_i32_1 = arith.constant 0 : i32
    return %c0_i32, %c0_i32_0 : i32, i32
  }
  func.func @transform_3(%arg0: i32) -> (i32, i32) {
    %c0_i32 = arith.constant 0 : i32
    %c0_i32_0 = arith.constant 0 : i32
    %c0_i32_1 = arith.constant 0 : i32
    return %c0_i32, %c0_i32_0 : i32, i32
  }
  func.func @transform_4(%arg0: i32) -> (i32, i32, i32) {
    %c0_i32 = arith.constant 0 : i32
    %c0_i32_0 = arith.constant 0 : i32
    %c0_i32_1 = arith.constant 0 : i32
    %c0_i32_2 = arith.constant 0 : i32
    return %c0_i32, %c0_i32_0, %c0_i32_1 : i32, i32, i32
  }
  func.func @transform_5(%arg0: i32) -> (i32, i32) {
    %c0_i32 = arith.constant 0 : i32
    %c0_i32_0 = arith.constant 0 : i32
    %c0_i32_1 = arith.constant 0 : i32
    return %c0_i32, %c0_i32_0 : i32, i32
  }
  func.func @transform_6(%arg0: i32) -> (i32, i32) {
    %c0_i32 = arith.constant 0 : i32
    %c0_i32_0 = arith.constant 0 : i32
    return %arg0, %c0_i32 : i32, i32
  }
}

module attributes {stable_mosaic.version = 11 : i64} {
  func.func @ae_encoder_kernel(%arg0: i32, %arg1: memref<8x128xf32, #tpu.memory_space<vmem>>, %arg2: memref<128x512xbf16, #tpu.memory_space<vmem>>, %arg3: memref<512x256xbf16, #tpu.memory_space<vmem>>, %arg4: memref<256x128xbf16, #tpu.memory_space<vmem>>, %arg5: memref<3x128x128xbf16, #tpu.memory_space<vmem>>, %arg6: memref<8x512xf32, #tpu.memory_space<vmem>>, %arg7: memref<8x8xf32, #tpu.memory_space<vmem>>) attributes {dimension_semantics = [#tpu.dimension_semantics<parallel>], iteration_bounds = array<i64: 1>, scalar_prefetch = 0 : i64, scratch_operands = 0 : i64, tpu.core_type = #tpu.core_type<tc>, window_params = [{transform_indices = @transform_0, window_bounds = array<i64: 8, 128>}, {pipeline_mode = #tpu.pipeline_mode<synchronous>, transform_indices = @transform_1, window_bounds = array<i64: 128, 512>}, {pipeline_mode = #tpu.pipeline_mode<synchronous>, transform_indices = @transform_2, window_bounds = array<i64: 512, 256>}, {pipeline_mode = #tpu.pipeline_mode<synchronous>, transform_indices = @transform_3, window_bounds = array<i64: 256, 128>}, {pipeline_mode = #tpu.pipeline_mode<synchronous>, transform_indices = @transform_4, window_bounds = array<i64: 3, 128, 128>}, {pipeline_mode = #tpu.pipeline_mode<synchronous>, transform_indices = @transform_5, window_bounds = array<i64: 8, 512>}, {transform_indices = @transform_6, window_bounds = array<i64: 8, 8>}]} {
    %c0 = arith.constant 0 : index
    %c0_0 = arith.constant 0 : index
    %0 = vector.load %arg6[%c0, %c0_0] : memref<8x512xf32, #tpu.memory_space<vmem>>, vector<8x512xf32>
    %c0_1 = arith.constant 0 : index
    %c0_2 = arith.constant 0 : index
    %1 = vector.load %arg1[%c0_1, %c0_2] : memref<8x128xf32, #tpu.memory_space<vmem>>, vector<8x128xf32>
    %c0_3 = arith.constant 0 : index
    %c0_4 = arith.constant 0 : index
    %2 = vector.load %arg2[%c0_3, %c0_4] : memref<128x512xbf16, #tpu.memory_space<vmem>>, vector<128x512xbf16>
    %3 = vector.extract_strided_slice %0 {offsets = [0, 0], sizes = [1, 512], strides = [1, 1]} : vector<8x512xf32> to vector<1x512xf32>
    %4 = arith.truncf %1 : vector<8x128xf32> to vector<8x128xbf16>
    %cst = arith.constant dense<0.000000e+00> : vector<8x512xf32>
    %5 = tpu.matmul %4, %2, %cst {dimension_numbers = #tpu.dot_dimension_numbers<[1], [0], [0], [1], [0, 0, 1, 1], [], []>} : vector<8x128xbf16>, vector<128x512xbf16>, vector<8x512xf32> -> vector<8x512xf32>
    %6 = vector.broadcast %3 : vector<1x512xf32> to vector<8x512xf32>
    %7 = arith.addf %5, %6 : vector<8x512xf32>
    %cst_5 = arith.constant 5.000000e-01 : f32
    %8 = vector.broadcast %cst_5 : f32 to vector<8x512xf32>
    %9 = arith.mulf %8, %7 : vector<8x512xf32>
    %cst_6 = arith.constant 0.707106769 : f32
    %10 = vector.broadcast %cst_6 : f32 to vector<8x512xf32>
    %11 = arith.mulf %7, %10 : vector<8x512xf32>
    %12 = math.erf %11 : vector<8x512xf32>
    %cst_7 = arith.constant 1.000000e+00 : f32
    %13 = vector.broadcast %cst_7 : f32 to vector<8x512xf32>
    %14 = arith.addf %13, %12 : vector<8x512xf32>
    %15 = arith.mulf %9, %14 : vector<8x512xf32>
    %c0_8 = arith.constant 0 : index
    %c0_9 = arith.constant 0 : index
    %16 = vector.load %arg3[%c0_8, %c0_9] : memref<512x256xbf16, #tpu.memory_space<vmem>>, vector<512x256xbf16>
    %17 = vector.extract_strided_slice %0 {offsets = [1, 0], sizes = [1, 256], strides = [1, 1]} : vector<8x512xf32> to vector<1x256xf32>
    %18 = arith.truncf %15 : vector<8x512xf32> to vector<8x512xbf16>
    %cst_10 = arith.constant dense<0.000000e+00> : vector<8x256xf32>
    %19 = tpu.matmul %18, %16, %cst_10 {dimension_numbers = #tpu.dot_dimension_numbers<[1], [0], [0], [1], [0, 0, 1, 1], [], []>} : vector<8x512xbf16>, vector<512x256xbf16>, vector<8x256xf32> -> vector<8x256xf32>
    %20 = vector.broadcast %17 : vector<1x256xf32> to vector<8x256xf32>
    %21 = arith.addf %19, %20 : vector<8x256xf32>
    %cst_11 = arith.constant 5.000000e-01 : f32
    %22 = vector.broadcast %cst_11 : f32 to vector<8x256xf32>
    %23 = arith.mulf %22, %21 : vector<8x256xf32>
    %cst_12 = arith.constant 0.707106769 : f32
    %24 = vector.broadcast %cst_12 : f32 to vector<8x256xf32>
    %25 = arith.mulf %21, %24 : vector<8x256xf32>
    %26 = math.erf %25 : vector<8x256xf32>
    %cst_13 = arith.constant 1.000000e+00 : f32
    %27 = vector.broadcast %cst_13 : f32 to vector<8x256xf32>
    %28 = arith.addf %27, %26 : vector<8x256xf32>
    %29 = arith.mulf %23, %28 : vector<8x256xf32>
    %c0_14 = arith.constant 0 : index
    %c0_15 = arith.constant 0 : index
    %30 = vector.load %arg4[%c0_14, %c0_15] : memref<256x128xbf16, #tpu.memory_space<vmem>>, vector<256x128xbf16>
    %31 = vector.extract_strided_slice %0 {offsets = [2, 0], sizes = [1, 128], strides = [1, 1]} : vector<8x512xf32> to vector<1x128xf32>
    %32 = arith.truncf %29 : vector<8x256xf32> to vector<8x256xbf16>
    %cst_16 = arith.constant dense<0.000000e+00> : vector<8x128xf32>
    %33 = tpu.matmul %32, %30, %cst_16 {dimension_numbers = #tpu.dot_dimension_numbers<[1], [0], [0], [1], [0, 0, 1, 1], [], []>} : vector<8x256xbf16>, vector<256x128xbf16>, vector<8x128xf32> -> vector<8x128xf32>
    %34 = vector.broadcast %31 : vector<1x128xf32> to vector<8x128xf32>
    %35 = arith.addf %33, %34 : vector<8x128xf32>
    %cst_17 = arith.constant 5.000000e-01 : f32
    %36 = vector.broadcast %cst_17 : f32 to vector<8x128xf32>
    %37 = arith.mulf %36, %35 : vector<8x128xf32>
    %cst_18 = arith.constant 0.707106769 : f32
    %38 = vector.broadcast %cst_18 : f32 to vector<8x128xf32>
    %39 = arith.mulf %35, %38 : vector<8x128xf32>
    %40 = math.erf %39 : vector<8x128xf32>
    %cst_19 = arith.constant 1.000000e+00 : f32
    %41 = vector.broadcast %cst_19 : f32 to vector<8x128xf32>
    %42 = arith.addf %41, %40 : vector<8x128xf32>
    %43 = arith.mulf %37, %42 : vector<8x128xf32>
    %c0_20 = arith.constant 0 : index
    %c0_21 = arith.constant 0 : index
    %c0_22 = arith.constant 0 : index
    %44 = vector.load %arg5[%c0_20, %c0_21, %c0_22] : memref<3x128x128xbf16, #tpu.memory_space<vmem>>, vector<1x128x128xbf16>
    %45 = vector.shape_cast %44 : vector<1x128x128xbf16> to vector<128x128xbf16>
    %46 = vector.extract_strided_slice %0 {offsets = [3, 0], sizes = [1, 128], strides = [1, 1]} : vector<8x512xf32> to vector<1x128xf32>
    %47 = arith.truncf %43 : vector<8x128xf32> to vector<8x128xbf16>
    %cst_23 = arith.constant dense<0.000000e+00> : vector<8x128xf32>
    %48 = tpu.matmul %47, %45, %cst_23 {dimension_numbers = #tpu.dot_dimension_numbers<[1], [0], [0], [1], [0, 0, 1, 1], [], []>} : vector<8x128xbf16>, vector<128x128xbf16>, vector<8x128xf32> -> vector<8x128xf32>
    %49 = vector.broadcast %46 : vector<1x128xf32> to vector<8x128xf32>
    %50 = arith.addf %48, %49 : vector<8x128xf32>
    %cst_24 = arith.constant 5.000000e-01 : f32
    %51 = vector.broadcast %cst_24 : f32 to vector<8x128xf32>
    %52 = arith.mulf %51, %50 : vector<8x128xf32>
    %cst_25 = arith.constant 0.707106769 : f32
    %53 = vector.broadcast %cst_25 : f32 to vector<8x128xf32>
    %54 = arith.mulf %50, %53 : vector<8x128xf32>
    %55 = math.erf %54 : vector<8x128xf32>
    %cst_26 = arith.constant 1.000000e+00 : f32
    %56 = vector.broadcast %cst_26 : f32 to vector<8x128xf32>
    %57 = arith.addf %56, %55 : vector<8x128xf32>
    %58 = arith.mulf %52, %57 : vector<8x128xf32>
    %c1 = arith.constant 1 : index
    %c0_27 = arith.constant 0 : index
    %c0_28 = arith.constant 0 : index
    %59 = vector.load %arg5[%c1, %c0_27, %c0_28] : memref<3x128x128xbf16, #tpu.memory_space<vmem>>, vector<1x128x128xbf16>
    %60 = vector.shape_cast %59 : vector<1x128x128xbf16> to vector<128x128xbf16>
    %61 = vector.extract_strided_slice %0 {offsets = [4, 0], sizes = [1, 128], strides = [1, 1]} : vector<8x512xf32> to vector<1x128xf32>
    %62 = arith.truncf %58 : vector<8x128xf32> to vector<8x128xbf16>
    %cst_29 = arith.constant dense<0.000000e+00> : vector<8x128xf32>
    %63 = tpu.matmul %62, %60, %cst_29 {dimension_numbers = #tpu.dot_dimension_numbers<[1], [0], [0], [1], [0, 0, 1, 1], [], []>} : vector<8x128xbf16>, vector<128x128xbf16>, vector<8x128xf32> -> vector<8x128xf32>
    %64 = vector.broadcast %61 : vector<1x128xf32> to vector<8x128xf32>
    %65 = arith.addf %63, %64 : vector<8x128xf32>
    %cst_30 = arith.constant 5.000000e-01 : f32
    %66 = vector.broadcast %cst_30 : f32 to vector<8x128xf32>
    %67 = arith.mulf %66, %65 : vector<8x128xf32>
    %cst_31 = arith.constant 0.707106769 : f32
    %68 = vector.broadcast %cst_31 : f32 to vector<8x128xf32>
    %69 = arith.mulf %65, %68 : vector<8x128xf32>
    %70 = math.erf %69 : vector<8x128xf32>
    %cst_32 = arith.constant 1.000000e+00 : f32
    %71 = vector.broadcast %cst_32 : f32 to vector<8x128xf32>
    %72 = arith.addf %71, %70 : vector<8x128xf32>
    %73 = arith.mulf %67, %72 : vector<8x128xf32>
    %c2 = arith.constant 2 : index
    %c0_33 = arith.constant 0 : index
    %c0_34 = arith.constant 0 : index
    %74 = vector.load %arg5[%c2, %c0_33, %c0_34] : memref<3x128x128xbf16, #tpu.memory_space<vmem>>, vector<1x128x128xbf16>
    %75 = vector.shape_cast %74 : vector<1x128x128xbf16> to vector<128x128xbf16>
    %76 = vector.extract_strided_slice %0 {offsets = [5, 0], sizes = [1, 128], strides = [1, 1]} : vector<8x512xf32> to vector<1x128xf32>
    %77 = arith.truncf %73 : vector<8x128xf32> to vector<8x128xbf16>
    %cst_35 = arith.constant dense<0.000000e+00> : vector<8x128xf32>
    %78 = tpu.matmul %77, %75, %cst_35 {dimension_numbers = #tpu.dot_dimension_numbers<[1], [0], [0], [1], [0, 0, 1, 1], [], []>} : vector<8x128xbf16>, vector<128x128xbf16>, vector<8x128xf32> -> vector<8x128xf32>
    %79 = vector.broadcast %76 : vector<1x128xf32> to vector<8x128xf32>
    %80 = arith.addf %78, %79 : vector<8x128xf32>
    %81 = vector.extract_strided_slice %80 {offsets = [0, 0], sizes = [8, 8], strides = [1, 1]} : vector<8x128xf32> to vector<8x8xf32>
    %c0_36 = arith.constant 0 : index
    %c0_37 = arith.constant 0 : index
    %82 = vector.load %arg7[%c0_36, %c0_37] : memref<8x8xf32, #tpu.memory_space<vmem>>, vector<8x8xf32>
    tpu.vector_store %arg7[%c0_36, %c0_37], %81 {strides = array<i32>} : memref<8x8xf32, #tpu.memory_space<vmem>>, vector<8x8xf32>,
    return
  }
  func.func @transform_0(%arg0: i32) -> (i32, i32) {
    %c0_i32 = arith.constant 0 : i32
    %c0_i32_0 = arith.constant 0 : i32
    return %arg0, %c0_i32 : i32, i32
  }
  func.func @transform_1(%arg0: i32) -> (i32, i32) {
    %c0_i32 = arith.constant 0 : i32
    %c0_i32_0 = arith.constant 0 : i32
    %c0_i32_1 = arith.constant 0 : i32
    return %c0_i32, %c0_i32_0 : i32, i32
  }
  func.func @transform_2(%arg0: i32) -> (i32, i32) {
    %c0_i32 = arith.constant 0 : i32
    %c0_i32_0 = arith.constant 0 : i32
    %c0_i32_1 = arith.constant 0 : i32
    return %c0_i32, %c0_i32_0 : i32, i32
  }
  func.func @transform_3(%arg0: i32) -> (i32, i32) {
    %c0_i32 = arith.constant 0 : i32
    %c0_i32_0 = arith.constant 0 : i32
    %c0_i32_1 = arith.constant 0 : i32
    return %c0_i32, %c0_i32_0 : i32, i32
  }
  func.func @transform_4(%arg0: i32) -> (i32, i32, i32) {
    %c0_i32 = arith.constant 0 : i32
    %c0_i32_0 = arith.constant 0 : i32
    %c0_i32_1 = arith.constant 0 : i32
    %c0_i32_2 = arith.constant 0 : i32
    return %c0_i32, %c0_i32_0, %c0_i32_1 : i32, i32, i32
  }
  func.func @transform_5(%arg0: i32) -> (i32, i32) {
    %c0_i32 = arith.constant 0 : i32
    %c0_i32_0 = arith.constant 0 : i32
    %c0_i32_1 = arith.constant 0 : i32
    return %c0_i32, %c0_i32_0 : i32, i32
  }
  func.func @transform_6(%arg0: i32) -> (i32, i32) {
    %c0_i32 = arith.constant 0 : i32
    %c0_i32_0 = arith.constant 0 : i32
    return %arg0, %c0_i32 : i32, i32
  }
}

</mosaic_0001>

<bundles_post_ra>
// kernel: ae_encoder_forward.1
= control target key start
LH: loop header
LB: loop body
LE: loop exit
PB: predicated region body
PF: predicated region fallthrough
CT: control target
= control target key end

     0   :  { %11 = vsyncpa [#allocation3], 0  ;;  %s3025_s0 = inlined_call_operand.hbm [shape: f32[8,128], index: 0, kind: input, shape index: {}]   ;;  %s3026_s1 = inlined_call_operand.hbm [shape: bf16[128,512], index: 1, kind: input, shape index: {}]   ;;  %s3027_s2 = inlined_call_operand.hbm [shape: bf16[512,256], index: 2, kind: input, shape index: {}]   ;;  %s3028_s3 = inlined_call_operand.hbm [shape: bf16[256,128], index: 3, kind: input, shape index: {}]   ;;  %s3029_s4 = inlined_call_operand.hbm [shape: bf16[3,128,128], index: 4, kind: input, shape index: {}]   ;;  %s3030_s5 = inlined_call_operand.hbm [shape: f32[8,512], index: 5, kind: input, shape index: {}]   ;;  %s3031_s6 = inlined_call_operand.vmem [shape: f32[8,8], index: 6, kind: output, shape index: {}]  }
   0x1   :  { %12 = vsyncpa [#allocation5], 0 }
   0x2   :  { %13 = vsyncpa [#allocation8], 0  ;;  %s30_s23 = sshll.u32 %s3026_s1, 4  ;;  %s31_s23 = int_to_ptr.hbm [resolvable:$true] %s30_s23 }
   0x3   :  { %14 = vsyncpa [#allocation11], 0  ;;  %s2680_s24 = smov [#allocation4]   ;;  %s56_s28 = sshll.u32 %s3028_s3, 4  ;;  %s57_s28 = int_to_ptr.hbm [resolvable:$true] %s56_s28 }
   0x4   :  { %s32_s25 = sshll.u32 %s2680_s24, 4  ;;  %s2681_s29 = smov 256   ;;  %s33_s25 = int_to_ptr.vmem [resolvable:$true] %s32_s25 }
   0x5   :  { %s2682_s30 = smov 16   ;;  %s2683_s7 = smov [#allocation7]  }
   0x6   :  { %38 = dma.hbm_to_vmem [thread:$0]  %s31_s23, 4096, %s33_s25, [#allocation5], %s2681_s29, %s2681_s29, %s2682_s30  }
   0x7   :  { %s58_s8 = sshll.u32 %s2683_s7, 4  ;;  %s2684_s9 = smov 64   ;;  %s59_s8 = int_to_ptr.vmem [resolvable:$true] %s58_s8 }
   0x8   :  { %s2685_s10 = smov 4   ;;  %s20_s12 = sshll.u32 %s3025_s0, 4  ;;  %s21_s12 = int_to_ptr.hbm [resolvable:$true] %s20_s12 }
   0x9   :  { %64 = dma.hbm_to_vmem [thread:$0]  %s57_s28, 2048, %s59_s8, [#allocation8], %s2684_s9, %s2684_s9, %s2685_s10  }
   0xa   :  { %s2686_s13 = smov [#allocation2]   ;;  %s43_s16 = sshll.u32 %s3027_s2, 4  ;;  %s44_s16 = int_to_ptr.hbm [resolvable:$true] %s43_s16 }
   0xb   :  { %s22_s14 = sshll.u32 %s2686_s13, 4  ;;  %s2687_s17 = smov [#allocation6]   ;;  %s23_s14 = int_to_ptr.vmem [resolvable:$true] %s22_s14 }
   0xc   :  { %25 = dma.hbm_to_vmem [thread:$0]  %s21_s12, 128, %s23_s14, [#allocation3]  }
   0xd   :  { %s45_s18 = sshll.u32 %s2687_s17, 4  ;;  %s2688_s19 = smov 128   ;;  %s46_s18 = int_to_ptr.vmem [resolvable:$true] %s45_s18 }
   0xe   :  { %s2689_s20 = smov 8   ;;  %s69_s0 = sshll.u32 %s3029_s4, 4  ;;  %s70_s0 = int_to_ptr.hbm [resolvable:$true] %s69_s0 }
   0xf   :  { %51 = dma.hbm_to_vmem [thread:$0]  %s44_s16, 8192, %s46_s18, [#allocation5], %s2688_s19, %s2688_s19, %s2689_s20  }
  0x10   :  { %s2690_s23 = smov [#allocation9]   ;;  %s83_s2 = sshll.u32 %s3030_s5, 4  ;;  %s84_s2 = int_to_ptr.hbm [resolvable:$true] %s83_s2 }
  0x11   :  { %s71_s24 = sshll.u32 %s2690_s23, 4  ;;  %s2691_s27 = smov [#allocation10]   ;;  %s72_s24 = int_to_ptr.vmem [resolvable:$true] %s71_s24 }
  0x12   :  { %77 = dma.hbm_to_vmem [thread:$0]  %s70_s0, 3072, %s72_s24, [#allocation8], %s2684_s9, %s2684_s9, %s2685_s10  }
  0x13   :  { %s85_s28 = sshll.u32 %s2691_s27, 4  ;;  %s86_s28 = int_to_ptr.vmem [resolvable:$true] %s85_s28 }
  0x14   :  { %88 = dma.hbm_to_vmem [thread:$0]  %s84_s2, 512, %s86_s28, [#allocation11]  }
  0x15   :  { %2672 = dma.done.wait [#allocation3], 128  }
  0x16   :  { %2673 = vsyncadd [#allocation3], 4294967168 }
  0x17   :  { %2674 = dma.done.wait [#allocation5], 12288  }
  0x18   :  { %2675 = vsyncadd [#allocation5], 4294955008 }
  0x19   :  { %2676 = dma.done.wait [#allocation8], 5120  }
  0x1a   :  { %2677 = vsyncadd [#allocation8], 4294962176 }
  0x1b   :  { %2678 = dma.done.wait [#allocation11], 512  }
  0x1c   :  { %2679 = vsyncadd [#allocation11], 4294966784  ;;  %v1922_v0 = vld [vmem:[#allocation4 + $0xe0] sm:$0xf]  ;;  %v2391_v1 = vld [vmem:[#allocation4 + $0xec] sm:$0xf0] }
  0x1d   :  { %v2389_v2 = vld [vmem:[#allocation4 + $0xe4] sm:$0xf]  ;;  %v1923_v3 = vor.u32 %v2391_v1, %v1922_v0  ;;  %v1924_v4 = vld [vmem:[#allocation4 + $0xf0] sm:$0xf0]  ;;  %v1930_v5 = vld [vmem:[#allocation4 + $0xe8] sm:$0xf] }
  0x1e   :  { %v2392_v6 = vld [vmem:[#allocation4 + $0xf4] sm:$0xf0]  ;;  %v1927_v7 = vor.u32 %v2389_v2, %v1924_v4  ;;  %v2390_v9 = vld [vmem:[#allocation4 + $0xec] sm:$0xf]  ;;  %v1932_v10 = vld [vmem:[#allocation4 + $0xf8] sm:$0xf0] }
  0x1f   :  { %v1931_v8 = vor.u32 %v2392_v6, %v1930_v5  ;;  %v1906_v11 = vld [vmem:[#allocation4 + $0xc0] sm:$0xf]  ;;  %311 = vmatpush.bf16.msra.mxu0 %v1923_v3  ;;  %v1935_v12 = vor.u32 %v2390_v9, %v1932_v10  ;;  %v2387_v13 = vld [vmem:[#allocation4 + $0xcc] sm:$0xf0]  ;;  %v2385_v14 = vld [vmem:[#allocation4 + $0xc4] sm:$0xf] }
  0x20   :  { %v1908_v15 = vld [vmem:[#allocation4 + $0xd0] sm:$0xf0]  ;;  %324 = vmatpush.bf16.msra.mxu1 %v1927_v7  ;;  %v1907_v16 = vor.u32 %v2387_v13, %v1906_v11  ;;  %v1914_v18 = vld [vmem:[#allocation4 + $0xc8] sm:$0xf]  ;;  %v2388_v19 = vld [vmem:[#allocation4 + $0xd4] sm:$0xf0] }
  0x21   :  { %337 = vmatpush.bf16.msra.mxu2 %v1931_v8  ;;  %v1911_v17 = vor.u32 %v2385_v14, %v1908_v15  ;;  %v2386_v20 = vld [vmem:[#allocation4 + $0xcc] sm:$0xf]  ;;  %350 = vmatpush.bf16.msra.mxu3 %v1935_v12  ;;  %v1915_v21 = vor.u32 %v2388_v19, %v1914_v18  ;;  %v1916_v22 = vld [vmem:[#allocation4 + $0xd8] sm:$0xf0]  ;;  %v1890_v23 = vld [vmem:[#allocation4 + $0xa0] sm:$0xf] }
  0x22   :  { %v2383_v24 = vld [vmem:[#allocation4 + $0xac] sm:$0xf0]  ;;  %v1919_v25 = vor.u32 %v2386_v20, %v1916_v22  ;;  %v2381_v26 = vld [vmem:[#allocation4 + $0xa4] sm:$0xf]  ;;  %v1892_v27 = vld [vmem:[#allocation4 + $0xb0] sm:$0xf0] }
  0x23   :  { %v1898_v28 = vld [vmem:[#allocation4 + $0xa8] sm:$0xf]  ;;  %312 = vmatpush.bf16.msra.mxu0 %v1907_v16  ;;  %v1891_v29 = vor.u32 %v2383_v24, %v1890_v23  ;;  %v2384_v30 = vld [vmem:[#allocation4 + $0xb4] sm:$0xf0]  ;;  %v2382_v31 = vld [vmem:[#allocation4 + $0xac] sm:$0xf]  ;;  %v1895_v33 = vor.u32 %v2381_v26, %v1892_v27 }
  0x24   :  { %v1900_v32 = vld [vmem:[#allocation4 + $0xb8] sm:$0xf0]  ;;  %325 = vmatpush.bf16.msra.mxu1 %v1911_v17  ;;  %v1899_v34 = vor.u32 %v2384_v30, %v1898_v28  ;;  %v1874_v35 = vld [vmem:[#allocation4 + $0x80] sm:$0xf]  ;;  %v2379_v36 = vld [vmem:[#allocation4 + $0x8c] sm:$0xf0] }
  0x25   :  { %338 = vmatpush.bf16.msra.mxu2 %v1915_v21  ;;  %v2377_v37 = vld [vmem:[#allocation4 + $0x84] sm:$0xf]  ;;  %351 = vmatpush.bf16.msra.mxu3 %v1919_v25  ;;  %v1903_v38 = vor.u32 %v2382_v31, %v1900_v32  ;;  %v1876_v39 = vld [vmem:[#allocation4 + $0x90] sm:$0xf0]  ;;  %v1882_v40 = vld [vmem:[#allocation4 + $0x88] sm:$0xf]  ;;  %v1875_v44 = vor.u32 %v2379_v36, %v1874_v35 }
  0x26   :  { %v2380_v41 = vld [vmem:[#allocation4 + $0x94] sm:$0xf0]  ;;  %v2378_v42 = vld [vmem:[#allocation4 + $0x8c] sm:$0xf]  ;;  %v1884_v43 = vld [vmem:[#allocation4 + $0x98] sm:$0xf0]  ;;  %v1879_v45 = vor.u32 %v2377_v37, %v1876_v39 }
  0x27   :  { %313 = vmatpush.bf16.msra.mxu0 %v1891_v29  ;;  %v1883_v46 = vor.u32 %v2380_v41, %v1882_v40  ;;  %v1858_v47 = vld [vmem:[#allocation4 + $0x60] sm:$0xf]  ;;  %v2375_v48 = vld [vmem:[#allocation4 + $0x6c] sm:$0xf0]  ;;  %v2373_v49 = vld [vmem:[#allocation4 + $0x64] sm:$0xf]  ;;  %v1887_v50 = vor.u32 %v2378_v42, %v1884_v43 }
  0x28   :  { %326 = vmatpush.bf16.msra.mxu1 %v1895_v33  ;;  %v1860_v51 = vld [vmem:[#allocation4 + $0x70] sm:$0xf0]  ;;  %v1866_v52 = vld [vmem:[#allocation4 + $0x68] sm:$0xf]  ;;  %v2376_v53 = vld [vmem:[#allocation4 + $0x74] sm:$0xf0]  ;;  %v1859_v56 = vor.u32 %v2375_v48, %v1858_v47 }
  0x29   :  { %339 = vmatpush.bf16.msra.mxu2 %v1899_v34  ;;  %352 = vmatpush.bf16.msra.mxu3 %v1903_v38  ;;  %v2374_v54 = vld [vmem:[#allocation4 + $0x6c] sm:$0xf]  ;;  %v1868_v55 = vld [vmem:[#allocation4 + $0x78] sm:$0xf0]  ;;  %v1863_v57 = vor.u32 %v2373_v49, %v1860_v51  ;;  %v1867_v58 = vor.u32 %v2376_v53, %v1866_v52  ;;  %v1842_v59 = vld [vmem:[#allocation4 + $0x40] sm:$0xf] }
  0x2a   :  { %v2371_v60 = vld [vmem:[#allocation4 + $0x4c] sm:$0xf0]  ;;  %v2369_v61 = vld [vmem:[#allocation4 + $0x44] sm:$0xf]  ;;  %v1871_v62 = vor.u32 %v2374_v54, %v1868_v55  ;;  %v1844_v63 = vld [vmem:[#allocation4 + $0x50] sm:$0xf0] }
  0x2b   :  { %314 = vmatpush.bf16.msra.mxu0 %v1875_v44  ;;  %v1850_v0 = vld [vmem:[#allocation4 + $0x48] sm:$0xf]  ;;  %v2372_v1 = vld [vmem:[#allocation4 + $0x54] sm:$0xf0]  ;;  %v2370_v2 = vld [vmem:[#allocation4 + $0x4c] sm:$0xf]  ;;  %v1843_v4 = vor.u32 %v2371_v60, %v1842_v59  ;;  %v1847_v5 = vor.u32 %v2369_v61, %v1844_v63 }
  0x2c   :  { %327 = vmatpush.bf16.msra.mxu1 %v1879_v45  ;;  %v1852_v3 = vld [vmem:[#allocation4 + $0x58] sm:$0xf0]  ;;  %v1851_v6 = vor.u32 %v2372_v1, %v1850_v0  ;;  %v1826_v7 = vld [vmem:[#allocation4 + $0x20] sm:$0xf]  ;;  %v2367_v8 = vld [vmem:[#allocation4 + $0x2c] sm:$0xf0] }
  0x2d   :  { %340 = vmatpush.bf16.msra.mxu2 %v1883_v46  ;;  %353 = vmatpush.bf16.msra.mxu3 %v1887_v50  ;;  %v2365_v9 = vld [vmem:[#allocation4 + $0x24] sm:$0xf]  ;;  %v1855_v10 = vor.u32 %v2370_v2, %v1852_v3  ;;  %v1828_v11 = vld [vmem:[#allocation4 + $0x30] sm:$0xf0]  ;;  %v1834_v12 = vld [vmem:[#allocation4 + $0x28] sm:$0xf]  ;;  %v1827_v16 = vor.u32 %v2367_v8, %v1826_v7 }
  0x2e   :  { %v2368_v13 = vld [vmem:[#allocation4 + $0x34] sm:$0xf0]  ;;  %v2366_v14 = vld [vmem:[#allocation4 + $0x2c] sm:$0xf]  ;;  %v1836_v15 = vld [vmem:[#allocation4 + $0x38] sm:$0xf0]  ;;  %v1831_v17 = vor.u32 %v2365_v9, %v1828_v11 }
  0x2f   :  { %315 = vmatpush.bf16.msra.mxu0 %v1859_v56  ;;  %v1835_v18 = vor.u32 %v2368_v13, %v1834_v12  ;;  %v1810_v19 = vld [vmem:[#allocation4] sm:$0xf]  ;;  %v2363_v20 = vld [vmem:[#allocation4 + $0xc] sm:$0xf0]  ;;  %v2361_v21 = vld [vmem:[#allocation4 + $0x4] sm:$0xf]  ;;  %v1839_v22 = vor.u32 %v2366_v14, %v1836_v15 }
  0x30   :  { %328 = vmatpush.bf16.msra.mxu1 %v1863_v57  ;;  %v1812_v23 = vld [vmem:[#allocation4 + $0x10] sm:$0xf0]  ;;  %v1818_v24 = vld [vmem:[#allocation4 + $0x8] sm:$0xf]  ;;  %v2364_v25 = vld [vmem:[#allocation4 + $0x14] sm:$0xf0]  ;;  %v1811_v28 = vor.u32 %v2363_v20, %v1810_v19 }
  0x31   :  { %341 = vmatpush.bf16.msra.mxu2 %v1867_v58  ;;  %354 = vmatpush.bf16.msra.mxu3 %v1871_v62  ;;  %v2362_v26 = vld [vmem:[#allocation4 + $0xc] sm:$0xf]  ;;  %v1820_v27 = vld [vmem:[#allocation4 + $0x18] sm:$0xf0]  ;;  %v1815_v30 = vor.u32 %v2361_v21, %v1812_v23  ;;  %v1819_v31 = vor.u32 %v2364_v25, %v1818_v24  ;;  %v113_v34 = vld [vmem:[#allocation10] sm:$0xff] }
  0x32   :  { %v117_v29 = vld [vmem:[#allocation2] sm:$0xff]  ;;  %v1823_v32 = vor.u32 %v2362_v26, %v1820_v27  ;;  %v114_v35 = vld [vmem:[#allocation10 + $0x8] sm:$0xff]  ;;  %v115_v37 = vld [vmem:[#allocation10 + $0x10] sm:$0xff] }
  0x33   :  { %316 = vmatpush.bf16.msra.mxu0 %v1843_v4  ;;  %v150_v33 = vpack.c.bf16 %v117_v29, %v117_v29  ;;  %v365_v36 = vpack.c.bf16 %v114_v35, %v113_v34  ;;  %v116_v38 = vld [vmem:[#allocation10 + $0x18] sm:$0xff]  ;;  %v1998_v53 = vld [vmem:[#allocation6 + $0x70] sm:$0xf]  ;;  %v1990_v2 = vld [vmem:[#allocation6 + $0x60] sm:$0xf] }
  0x34   :  { %329 = vmatpush.bf16.msra.mxu1 %v1847_v5  ;;  %v366_v41 = vpack.c.bf16 %v116_v38, %v115_v37  ;;  %v2408_v54 = vld [vmem:[#allocation6 + $0x74] sm:$0xf0]  ;;  %v2062_v55 = vld [vmem:[#allocation6 + $0xf0] sm:$0xf]  ;;  %v2406_v3 = vld [vmem:[#allocation6 + $0x64] sm:$0xf0] }
  0x35   :  { %342 = vmatpush.bf16.msra.mxu2 %v1851_v6  ;;  %355 = vmatpush.bf16.msra.mxu3 %v1855_v10  ;;  %v369_v39 = vunpack.c.l.b16 %v365_v36  ;;  %v370_v40 = vunpack.c.h.b16 %v365_v36  ;;  %v1999_v58 = vor.u32 %v2408_v54, %v1998_v53  ;;  %v2424_v59 = vld [vmem:[#allocation6 + $0xf4] sm:$0xf0]  ;;  %v2054_v4 = vld [vmem:[#allocation6 + $0xe0] sm:$0xf]  ;;  %v1991_v8 = vor.u32 %v2406_v3, %v1990_v2  ;;  %v2422_v9 = vld [vmem:[#allocation6 + $0xe4] sm:$0xf0] }
  0x36   :  { %v371_v44 = vunpack.c.l.b16 %v366_v41  ;;  %v372_v45 = vunpack.c.h.b16 %v366_v41  ;;  %v2063_v61 = vor.u32 %v2424_v59, %v2062_v55  ;;  %v2055_v10 = vor.u32 %v2422_v9, %v2054_v4  ;;  %v2126_v11 = vld [vmem:[#allocation6 + $0x170] sm:$0xf]  ;;  %v2440_v12 = vld [vmem:[#allocation6 + $0x174] sm:$0xf0]  ;;  %v2438_v34 = vld [vmem:[#allocation6 + $0x164] sm:$0xf0] }
  0x37   :  { %317 = vmatpush.bf16.msra.mxu0 %v1827_v16  ;;  %v2745_v42 = vpack.c.b16 %v369_v39, %v369_v39  ;;  %v2747_v43 = vpack.c.b16 %v370_v40, %v370_v40  ;;  %v2190_v13 = vld [vmem:[#allocation6 + $0x1f0] sm:$0xf]  ;;  %v2127_v16 = vor.u32 %v2440_v12, %v2126_v11  ;;  %v2404_v21 = vld [vmem:[#allocation6 + $0x54] sm:$0xf0]  ;;  %v2182_v35 = vld [vmem:[#allocation6 + $0x1e0] sm:$0xf] }
  0x38   :  { %330 = vmatpush.bf16.msra.mxu1 %v1831_v17  ;;  %v375_v48 = vpack.c.b16 %v371_v44, %v371_v44  ;;  %v376_v49 = vpack.c.b16 %v372_v45, %v372_v45  ;;  %v2456_v17 = vld [vmem:[#allocation6 + $0x1f4] sm:$0xf0]  ;;  %v1982_v20 = vld [vmem:[#allocation6 + $0x50] sm:$0xf]  ;;  %v2454_v39 = vld [vmem:[#allocation6 + $0x1e4] sm:$0xf0] }
  0x39   :  { %343 = vmatpush.bf16.msra.mxu2 %v1835_v18  ;;  %356 = vmatpush.bf16.msra.mxu3 %v1839_v22  ;;  %v378_v46 = vpack.i.b16 %v2745_v42, %v2745_v42  ;;  %v382_v47 = vpack.i.b16 %v2747_v43, %v2747_v43  ;;  %v2191_v19 = vor.u32 %v2456_v17, %v2190_v13  ;;  %v2046_v22 = vld [vmem:[#allocation6 + $0xd0] sm:$0xf]  ;;  %v2420_v27 = vld [vmem:[#allocation6 + $0xd4] sm:$0xf0]  ;;  %v1974_v45 = vld [vmem:[#allocation6 + $0x40] sm:$0xf] }
  0x3a   :  { %v386_v52 = vpack.i.b16 %v375_v48, %v375_v48  ;;  %v390_v57 = vpack.i.b16 %v376_v49, %v376_v49  ;;  %v1983_v26 = vor.u32 %v2404_v21, %v1982_v20  ;;  %v2183_v44 = vor.u32 %v2454_v39, %v2182_v35  ;;  %v2110_v55 = vld [vmem:[#allocation6 + $0x150] sm:$0xf]  ;;  %v2102_v11 = vld [vmem:[#allocation6 + $0x140] sm:$0xf]  ;;  %v2434_v12 = vld [vmem:[#allocation6 + $0x144] sm:$0xf0] }
  0x3b   :  { %318 = vmatpush.bf16.msra.mxu0 %v1811_v28  ;;  %v380_v50 = vperm.slane %v378_v46, 0  ;;  %v384_v51 = vperm.slane %v382_v47, 0  ;;  %v2402_v46 = vld [vmem:[#allocation6 + $0x44] sm:$0xf0]  ;;  %v2038_v47 = vld [vmem:[#allocation6 + $0xc0] sm:$0xf] }
  0x3c   :  { %331 = vmatpush.bf16.msra.mxu1 %v1815_v30  ;;  %v388_v1 = vperm.slane %v386_v52, 0  ;;  %v392_v7 = vperm.slane %v390_v57, 0  ;;  %v2174_v57 = vld [vmem:[#allocation6 + $0x1d0] sm:$0xf]  ;;  %v2166_v13 = vld [vmem:[#allocation6 + $0x1c0] sm:$0xf] }
  0x3d   :  { %344 = vmatpush.bf16.msra.mxu2 %v1819_v31  ;;  %357 = vmatpush.bf16.msra.mxu3 %v1823_v32  ;;  %v397_v63 = vunpack.c.l.bf16 %v380_v50  ;;  %v398_v0 = vunpack.c.l.bf16 %v384_v51  ;;  %v2047_v32 = vor.u32 %v2420_v27, %v2046_v22  ;;  %v1975_v50 = vor.u32 %v2402_v46, %v1974_v45  ;;  %v2418_v51 = vld [vmem:[#allocation6 + $0xc4] sm:$0xf0]  ;;  %v2030_v2 = vld [vmem:[#allocation6 + $0xb0] sm:$0xf]  ;;  %v1958_v17 = vld [vmem:[#allocation6 + $0x20] sm:$0xf] }
  0x3e   :  { %319 = vmatmul.bf16.vlgmr.msra.gmra.mxu0 %v150_v33  ;;  %v399_v29 = vunpack.c.l.bf16 %v388_v1  ;;  %v400_v30 = vunpack.c.l.bf16 %v392_v7  ;;  %v2039_v54 = vor.u32 %v2418_v51, %v2038_v47  ;;  %v2400_v1 = vld [vmem:[#allocation6 + $0x34] sm:$0xf0]  ;;  %v1950_v35 = vld [vmem:[#allocation6 + $0x10] sm:$0xf]  ;;  %v2086_v47 = vld [vmem:[#allocation6 + $0x120] sm:$0xf] }
  0x3f   :  { %332 = vmatmul.bf16.vlgmr.msra.gmra.mxu1 %v150_v33  ;;  %999 = vmatpush.bf16.msrb.mxu0 %v1999_v58  ;;  %v2416_v7 = vld [vmem:[#allocation6 + $0xb4] sm:$0xf0]  ;;  %v2014_v45 = vld [vmem:[#allocation6 + $0x90] sm:$0xf]  ;;  %v2430_v51 = vld [vmem:[#allocation6 + $0x124] sm:$0xf0] }
  0x40   :  { %345 = vmatmul.bf16.vlgmr.msra.gmra.mxu2 %v150_v33  ;;  %358 = vmatmul.bf16.vlgmr.msra.gmra.mxu3 %v150_v33  ;;  %v2118_v33 = vld [vmem:[#allocation6 + $0x160] sm:$0xf]  ;;  %v2396_v39 = vld [vmem:[#allocation6 + $0x14] sm:$0xf0] }
  0x41   :  { %1012 = vmatpush.bf16.msrb.mxu1 %v2063_v61  ;;  %1025 = vmatpush.bf16.msrb.mxu2 %v2127_v16  ;;  %v2119_v38 = vor.u32 %v2438_v34, %v2118_v33  ;;  %v2450_v16 = vld [vmem:[#allocation6 + $0x1c4] sm:$0xf0]  ;;  %v2158_v33 = vld [vmem:[#allocation6 + $0x1b0] sm:$0xf]  ;;  %v2448_v34 = vld [vmem:[#allocation6 + $0x1b4] sm:$0xf0] }
  0x42   :  { %1038 = vmatpush.bf16.msrb.mxu3 %v2191_v19  ;;  %v2167_v21 = vor.u32 %v2450_v16, %v2166_v13  ;;  %v2412_v46 = vld [vmem:[#allocation6 + $0x94] sm:$0xf0]  ;;  %v2142_v16 = vld [vmem:[#allocation6 + $0x190] sm:$0xf] }
  0x43   :  { %1000 = vmatpush.bf16.msrb.mxu0 %v1991_v8 }
  0x45   :  { %1013 = vmatpush.bf16.msrb.mxu1 %v2055_v10  ;;  %1026 = vmatpush.bf16.msrb.mxu2 %v2119_v38  ;;  %v2031_v10 = vor.u32 %v2416_v7, %v2030_v2  ;;  %v2159_v38 = vor.u32 %v2448_v34, %v2158_v33  ;;  %v2407_v2 = vld [vmem:[#allocation6 + $0x74] sm:$0xf]  ;;  %v2426_v33 = vld [vmem:[#allocation6 + $0x104] sm:$0xf0]  ;;  %v2134_v34 = vld [vmem:[#allocation6 + $0x180] sm:$0xf] }
  0x46   :  { %1039 = vmatpush.bf16.msrb.mxu3 %v2183_v44  ;;  %v1951_v44 = vor.u32 %v2396_v39, %v1950_v35 }
  0x47   :  { %1001 = vmatpush.bf16.msrb.mxu0 %v1983_v26 }
  0x49   :  { %1014 = vmatpush.bf16.msrb.mxu1 %v2047_v32 }
  0x4b   :  { %1002 = vmatpush.bf16.msrb.mxu0 %v1975_v50  ;;  %v2015_v50 = vor.u32 %v2412_v46, %v2014_v45 }
  0x4d   :  { %1015 = vmatpush.bf16.msrb.mxu1 %v2039_v54  ;;  %v2150_v54 = vld [vmem:[#allocation6 + $0x1a0] sm:$0xf] }
  0x51   :  { %1016 = vmatpush.bf16.msrb.mxu1 %v2031_v10  ;;  %v2423_v10 = vld [vmem:[#allocation6 + $0xf4] sm:$0xf] }
  0xbb   :  { %v320_v56 = vpop.f32.mrf.mxu0 }
  0xbc   :  { %v333_v60 = vpop.f32.mrf.mxu1 }
  0xbd   :  { %v363_v62 = vpack.c.bf16 %v333_v60, %v320_v56  ;;  %v2436_v56 = vld [vmem:[#allocation6 + $0x154] sm:$0xf0] }
  0xbe   :  { %v2111_v59 = vor.u32 %v2436_v56, %v2110_v55  ;;  %v2452_v60 = vld [vmem:[#allocation6 + $0x1d4] sm:$0xf0]  ;;  %v2446_v55 = vld [vmem:[#allocation6 + $0x1a4] sm:$0xf0]  ;;  %v1942_v56 = vld [vmem:[#allocation6] sm:$0xf] }
  0xbf   :  { %v393_v5 = vunpack.c.l.bf16 %v363_v62  ;;  %v394_v6 = vunpack.c.h.bf16 %v363_v62 }
  0xc0   :  { %1027 = vmatpush.bf16.msrb.mxu2 %v2111_v59  ;;  %v2006_v59 = vld [vmem:[#allocation6 + $0x80] sm:$0xf] }
  0xc1   :  { %v401_v14 = vadd.f32 %v397_v63, %v393_v5  ;;  %v402_v15 = vadd.f32 %v398_v0, %v394_v6  ;;  %v2175_v63 = vor.u32 %v2452_v60, %v2174_v57  ;;  %v1966_v0 = vld [vmem:[#allocation6 + $0x30] sm:$0xf]  ;;  %v2151_v57 = vor.u32 %v2446_v55, %v2150_v54  ;;  %v2410_v60 = vld [vmem:[#allocation6 + $0x84] sm:$0xf0]  ;;  %v2403_v55 = vld [vmem:[#allocation6 + $0x54] sm:$0xf] }
  0xc2   :  { %v1967_v6 = vor.u32 %v2400_v1, %v1966_v0  ;;  %v2007_v1 = vor.u32 %v2410_v60, %v2006_v59 }
  0xc3   :  { %v346_v18 = vpop.f32.mrf.mxu2  ;;  %v2753_v23 = vpack.c.bf16 %v402_v15, %v401_v14  ;;  %v359_v24 = vpop.f32.mrf.mxu3  ;;  %1040 = vmatpush.bf16.msrb.mxu3 %v2175_v63  ;;  %v2103_v15 = vor.u32 %v2434_v12, %v2102_v11  ;;  %v2064_v12 = vld [vmem:[#allocation6 + $0xf8] sm:$0xf0] }
  0xc4   :  { %v322_v25 = vpop.f32.mrf.mxu0  ;;  %v364_v28 = vpack.c.bf16 %v359_v24, %v346_v18  ;;  %v335_v31 = vpop.f32.mrf.mxu1  ;;  %1003 = vmatpush.bf16.msrb.mxu0 %v1967_v6  ;;  %v2398_v18 = vld [vmem:[#allocation6 + $0x24] sm:$0xf0]  ;;  %v2022_v24 = vld [vmem:[#allocation6 + $0xa0] sm:$0xf]  ;;  %v2067_v13 = vor.u32 %v2423_v10, %v2064_v12  ;;  %v2184_v10 = vld [vmem:[#allocation6 + $0x1e8] sm:$0xf0] }
  0xc5   :  { %v407_v36 = vunpack.c.l.bf16 %v2753_v23  ;;  %v408_v37 = vunpack.c.h.bf16 %v2753_v23  ;;  %v1959_v22 = vor.u32 %v2398_v18, %v1958_v17  ;;  %v2414_v25 = vld [vmem:[#allocation6 + $0xa4] sm:$0xf0]  ;;  %1028 = vmatpush.bf16.msrb.mxu2 %v2103_v15  ;;  %v2428_v15 = vld [vmem:[#allocation6 + $0x114] sm:$0xf0]  ;;  %v2449_v23 = vld [vmem:[#allocation6 + $0x1c4] sm:$0xf] }
  0xc6   :  { %v395_v40 = vunpack.c.l.bf16 %v364_v28  ;;  %v396_v41 = vunpack.c.h.bf16 %v364_v28  ;;  %v2023_v28 = vor.u32 %v2414_v25, %v2022_v24  ;;  %v2405_v25 = vld [vmem:[#allocation6 + $0x64] sm:$0xf] }
  0xc7   :  { %v417_v48 = vmul.f32 0.70703125, %v407_v36  ;;  %v418_v49 = vmul.f32 0.70703125, %v408_v37  ;;  %1041 = vmatpush.bf16.msrb.mxu3 %v2167_v21 }
  0xc8   :  { %v403_v52 = vadd.f32 %v399_v29, %v395_v40  ;;  %v404_v53 = vadd.f32 %v400_v30, %v396_v41  ;;  %v2094_v29 = vld [vmem:[#allocation6 + $0x130] sm:$0xf]  ;;  %v2432_v30 = vld [vmem:[#allocation6 + $0x134] sm:$0xf0]  ;;  %1004 = vmatpush.bf16.msrb.mxu0 %v1959_v22  ;;  %1017 = vmatpush.bf16.msrb.mxu1 %v2023_v28  ;;  %v2421_v28 = vld [vmem:[#allocation6 + $0xe4] sm:$0xf] }
  0xc9   :  { %v421_v58 = vpack.c.bf16 %v418_v49, %v417_v48  ;;  %v2095_v32 = vor.u32 %v2432_v30, %v2094_v29  ;;  %v2056_v29 = vld [vmem:[#allocation6 + $0xe8] sm:$0xf0] }
  0xca   :  { %v2761_v61 = vpack.c.bf16 %v404_v53, %v403_v52  ;;  %v2087_v53 = vor.u32 %v2430_v51, %v2086_v47  ;;  %v2455_v51 = vld [vmem:[#allocation6 + $0x1f4] sm:$0xf] }
  0xcb   :  { %v348_v62 = vpop.f32.mrf.mxu2  ;;  %v2763_v3 = vunpack.c.l.bf16 %v421_v58  ;;  %v2765_v4 = vunpack.c.h.bf16 %v421_v58  ;;  %v361_v5 = vpop.f32.mrf.mxu3  ;;  %1029 = vmatpush.bf16.msrb.mxu2 %v2095_v32  ;;  %1042 = vmatpush.bf16.msrb.mxu3 %v2159_v38  ;;  %v2394_v58 = vld [vmem:[#allocation6 + $0x4] sm:$0xf0]  ;;  %v2070_v32 = vld [vmem:[#allocation6 + $0x100] sm:$0xf] }
  0xcc   :  { %v409_v8 = vunpack.c.l.bf16 %v2761_v61  ;;  %v410_v9 = vunpack.c.h.bf16 %v2761_v61  ;;  %1005 = vmatpush.bf16.msrb.mxu0 %v1951_v44  ;;  %1018 = vmatpush.bf16.msrb.mxu1 %v2015_v50  ;;  %v1943_v0 = vor.u32 %v2394_v58, %v1942_v56  ;;  %v2000_v5 = vld [vmem:[#allocation6 + $0x78] sm:$0xf0]  ;;  %v2071_v39 = vor.u32 %v2426_v33, %v2070_v32  ;;  %v2442_v44 = vld [vmem:[#allocation6 + $0x184] sm:$0xf0] }
  0xcd   :  { %v427_v14 = vmul.f32 %v2763_v3, %v2763_v3  ;;  %v467_v27 = vmul.f32 %v2765_v4, %v2765_v4  ;;  %v2003_v7 = vor.u32 %v2407_v2, %v2000_v5  ;;  %v2135_v47 = vor.u32 %v2442_v44, %v2134_v34  ;;  %v2128_v50 = vld [vmem:[#allocation6 + $0x178] sm:$0xf0]  ;;  %v2437_v5 = vld [vmem:[#allocation6 + $0x164] sm:$0xf] }
  0xce   :  { %v419_v19 = vmul.f32 0.70703125, %v409_v8  ;;  %v420_v20 = vmul.f32 0.70703125, %v410_v9  ;;  %v1984_v56 = vld [vmem:[#allocation6 + $0x58] sm:$0xf0] }
  0xcf   :  { %v2775_v26 = vmin.f32 %v427_v14, 16.0  ;;  %v2784_v49 = vmin.f32 %v467_v27, 16.0  ;;  %1030 = vmatpush.bf16.msrb.mxu2 %v2087_v53  ;;  %1043 = vmatpush.bf16.msrb.mxu3 %v2151_v57  ;;  %v2078_v14 = vld [vmem:[#allocation6 + $0x110] sm:$0xf]  ;;  %v1992_v27 = vld [vmem:[#allocation6 + $0x68] sm:$0xf0]  ;;  %v1987_v60 = vor.u32 %v2403_v55, %v1984_v56 }
  0xd0   :  { %v422_v31 = vpack.c.bf16 %v420_v20, %v419_v19  ;;  %1006 = vmatpush.bf16.msrb.mxu0 %v1943_v0  ;;  %1019 = vmatpush.bf16.msrb.mxu1 %v2007_v1  ;;  %v2079_v19 = vor.u32 %v2428_v15, %v2078_v14  ;;  %v2444_v20 = vld [vmem:[#allocation6 + $0x194] sm:$0xf0]  ;;  %v1995_v30 = vor.u32 %v2405_v25, %v1992_v27  ;;  %v2419_v57 = vld [vmem:[#allocation6 + $0xd4] sm:$0xf]  ;;  %v1976_v14 = vld [vmem:[#allocation6 + $0x48] sm:$0xf0] }
  0xd1   :  { %v429_v48 = vmul.f32 2.1237322e-06, %v2775_v26  ;;  %v469_v6 = vmul.f32 2.1237322e-06, %v2784_v49  ;;  %v2143_v24 = vor.u32 %v2444_v20, %v2142_v16  ;;  %v2417_v15 = vld [vmem:[#allocation6 + $0xc4] sm:$0xf] }
  0xd2   :  { %v2779_v40 = vunpack.c.l.bf16 %v422_v31  ;;  %v2781_v41 = vunpack.c.h.bf16 %v422_v31  ;;  %v2059_v31 = vor.u32 %v2421_v28, %v2056_v29  ;;  %v2176_v29 = vld [vmem:[#allocation6 + $0x1d8] sm:$0xf0]  ;;  %v480_v33 = vmul.f32 3.8918573e-05, %v2784_v49 }
  0xd3   :  { %v430_v17 = vadd.f32 0.00028619796, %v429_v48  ;;  %v470_v21 = vadd.f32 0.00028619796, %v469_v6  ;;  %1031 = vmatpush.bf16.msrb.mxu2 %v2079_v19  ;;  %1044 = vmatpush.bf16.msrb.mxu3 %v2143_v24  ;;  %v2439_v48 = vld [vmem:[#allocation6 + $0x174] sm:$0xf] }
  0xd4   :  { %v507_v52 = vmul.f32 %v2779_v40, %v2779_v40  ;;  %v547_v63 = vmul.f32 %v2781_v41, %v2781_v41  ;;  %1051 = vmatpush.bf16.msra.mxu0 %v2003_v7  ;;  %1064 = vmatpush.bf16.msra.mxu1 %v2067_v13  ;;  %v2131_v53 = vor.u32 %v2439_v48, %v2128_v50  ;;  %v2120_v6 = vld [vmem:[#allocation6 + $0x168] sm:$0xf0]  ;;  %v2453_v7 = vld [vmem:[#allocation6 + $0x1e4] sm:$0xf]  ;;  %v2451_v24 = vld [vmem:[#allocation6 + $0x1d4] sm:$0xf] }
  0xd5   :  { %v431_v35 = vmul.f32 %v430_v17, %v2775_v26  ;;  %v471_v45 = vmul.f32 %v470_v21, %v2784_v49  ;;  %v2187_v12 = vor.u32 %v2453_v7, %v2184_v10  ;;  %v2401_v13 = vld [vmem:[#allocation6 + $0x44] sm:$0xf]  ;;  %v2040_v19 = vld [vmem:[#allocation6 + $0xc8] sm:$0xf0]  ;;  %v2435_v21 = vld [vmem:[#allocation6 + $0x154] sm:$0xf]  ;;  %v2179_v32 = vor.u32 %v2451_v24, %v2176_v29 }
  0xd6   :  { %v2788_v62 = vmin.f32 %v507_v52, 16.0  ;;  %v2794_v18 = vmin.f32 %v547_v63, 16.0  ;;  %v2192_v52 = vld [vmem:[#allocation6 + $0x1f8] sm:$0xf0]  ;;  %v1979_v17 = vor.u32 %v2401_v13, %v1976_v14  ;;  %v2043_v20 = vor.u32 %v2417_v15, %v2040_v19 }
  0xd7   :  { %1032 = vmatpush.bf16.msrb.mxu2 %v2071_v39  ;;  %1045 = vmatpush.bf16.msrb.mxu3 %v2135_v47  ;;  %v2195_v54 = vor.u32 %v2455_v51, %v2192_v52  ;;  %v432_v58 = vadd.f32 0.0036580483, %v431_v35  ;;  %v2048_v63 = vld [vmem:[#allocation6 + $0xd8] sm:$0xf0]  ;;  %v472_v0 = vadd.f32 0.0036580483, %v471_v45 }
  0xd8   :  { %v509_v11 = vmul.f32 2.1237322e-06, %v2788_v62  ;;  %v549_v38 = vmul.f32 2.1237322e-06, %v2794_v18  ;;  %1052 = vmatpush.bf16.msra.mxu0 %v1995_v30  ;;  %1065 = vmatpush.bf16.msra.mxu1 %v2059_v31  ;;  %v2051_v2 = vor.u32 %v2419_v57, %v2048_v63  ;;  %v440_v30 = vmul.f32 3.8918573e-05, %v2775_v26 }
  0xd9   :  { %v433_v25 = vmul.f32 %v432_v58, %v2775_v26  ;;  %v473_v27 = vmul.f32 %v472_v0, %v2784_v49  ;;  %v520_v39 = vmul.f32 3.8918573e-05, %v2788_v62  ;;  %v560_v44 = vmul.f32 3.8918573e-05, %v2794_v18 }
  0xda   :  { %v510_v22 = vadd.f32 0.00028619796, %v509_v11  ;;  %v550_v59 = vadd.f32 0.00028619796, %v549_v38  ;;  %v2123_v11 = vor.u32 %v2437_v5, %v2120_v6  ;;  %v441_v35 = vadd.f32 0.001143296, %v440_v30 }
  0xdb   :  { %1077 = vmatpush.bf16.msra.mxu2 %v2131_v53  ;;  %1090 = vmatpush.bf16.msra.mxu3 %v2195_v54  ;;  %v481_v38 = vadd.f32 0.001143296, %v480_v33  ;;  %v434_v45 = vadd.f32 0.05243302, %v433_v25  ;;  %v521_v51 = vadd.f32 0.001143296, %v520_v39 }
  0xdc   :  { %v511_v46 = vmul.f32 %v510_v22, %v2788_v62  ;;  %1053 = vmatpush.bf16.msra.mxu0 %v1987_v60  ;;  %1066 = vmatpush.bf16.msra.mxu1 %v2051_v2  ;;  %v551_v16 = vmul.f32 %v550_v59, %v2794_v18  ;;  %v2112_v22 = vld [vmem:[#allocation6 + $0x158] sm:$0xf0]  ;;  %v442_v47 = vmul.f32 %v441_v35, %v2775_v26  ;;  %v561_v52 = vadd.f32 0.001143296, %v560_v44 }
  0xdd   :  { %v2115_v28 = vor.u32 %v2435_v21, %v2112_v22  ;;  %v482_v50 = vmul.f32 %v481_v38, %v2784_v49  ;;  %v522_v56 = vmul.f32 %v521_v51, %v2788_v62  ;;  %v435_v58 = vmul.f32 %v434_v45, %v2775_v26 }
  0xde   :  { %v512_v1 = vadd.f32 0.0036580483, %v511_v46  ;;  %v552_v34 = vadd.f32 0.0036580483, %v551_v16  ;;  %v474_v46 = vadd.f32 0.05243302, %v473_v27  ;;  %v562_v57 = vmul.f32 %v561_v52, %v2794_v18 }
  0xdf   :  { %1078 = vmatpush.bf16.msra.mxu2 %v2123_v11  ;;  %1091 = vmatpush.bf16.msra.mxu3 %v2187_v12  ;;  %v443_v53 = vadd.f32 0.014752088, %v442_v47  ;;  %v483_v55 = vadd.f32 0.014752088, %v482_v50  ;;  %v436_v12 = vadd.f32 0.18741608, %v435_v58 }
  0xe0   :  { %1054 = vmatpush.bf16.msra.mxu0 %v1979_v17  ;;  %v513_v31 = vmul.f32 %v512_v1, %v2788_v62  ;;  %1067 = vmatpush.bf16.msra.mxu1 %v2043_v20  ;;  %v553_v54 = vmul.f32 %v552_v34, %v2794_v18  ;;  %v475_v59 = vmul.f32 %v474_v46, %v2784_v49  ;;  %v523_v1 = vadd.f32 0.014752088, %v522_v56  ;;  %v1968_v50 = vld [vmem:[#allocation6 + $0x38] sm:$0xf0]  ;;  %v2433_v58 = vld [vmem:[#allocation6 + $0x144] sm:$0xf] }
  0xe1   :  { %v444_v60 = vmul.f32 %v443_v53, %v2775_v26  ;;  %v484_v0 = vmul.f32 %v483_v55, %v2784_v49  ;;  %v563_v2 = vadd.f32 0.014752088, %v562_v57  ;;  %v437_v27 = vmul.f32 %v436_v12, %v2775_v26  ;;  %v2415_v55 = vld [vmem:[#allocation6 + $0xb4] sm:$0xf]  ;;  %v2032_v56 = vld [vmem:[#allocation6 + $0xb8] sm:$0xf0] }
  0xe2   :  { %v514_v48 = vadd.f32 0.05243302, %v513_v31  ;;  %v554_v6 = vadd.f32 0.05243302, %v553_v54  ;;  %v524_v10 = vmul.f32 %v523_v1, %v2788_v62  ;;  %v476_v13 = vadd.f32 0.18741608, %v475_v59 }
  0xe3   :  { %1079 = vmatpush.bf16.msra.mxu2 %v2115_v28  ;;  %1092 = vmatpush.bf16.msra.mxu3 %v2179_v32  ;;  %v445_v5 = vadd.f32 0.112945676, %v444_v60  ;;  %v485_v7 = vadd.f32 0.112945676, %v484_v0  ;;  %v564_v11 = vmul.f32 %v563_v2, %v2794_v18  ;;  %v2832_v39 = vadd.f32 1.1283791, %v437_v27 }
  0xe4   :  { %v515_v63 = vmul.f32 %v514_v48, %v2788_v62  ;;  %v525_v17 = vadd.f32 0.112945676, %v524_v10  ;;  %v555_v21 = vmul.f32 %v554_v6, %v2794_v18  ;;  %v477_v29 = vmul.f32 %v476_v13, %v2784_v49  ;;  %v2399_v48 = vld [vmem:[#allocation6 + $0x34] sm:$0xf]  ;;  %v2104_v59 = vld [vmem:[#allocation6 + $0x148] sm:$0xf0] }
  0xe5   :  { %v446_v14 = vmul.f32 %v445_v5, %v2775_v26  ;;  %v486_v16 = vmul.f32 %v485_v7, %v2784_v49  ;;  %v565_v19 = vadd.f32 0.112945676, %v564_v11  ;;  %v2836_v44 = vmul.f32 0.5, %v407_v36  ;;  %v2168_v60 = vld [vmem:[#allocation6 + $0x1c8] sm:$0xf0] }
  0xe6   :  { %v516_v15 = vadd.f32 0.18741608, %v515_v63  ;;  %v526_v24 = vmul.f32 %v525_v17, %v2788_v62  ;;  %v556_v35 = vadd.f32 0.18741608, %v555_v21  ;;  %v1971_v54 = vor.u32 %v2399_v48, %v1968_v50  ;;  %v2397_v63 = vld [vmem:[#allocation6 + $0x24] sm:$0xf] }
  0xe7   :  { %v447_v20 = vadd.f32 0.4994258, %v446_v14  ;;  %v487_v22 = vadd.f32 0.4994258, %v486_v16  ;;  %v566_v25 = vmul.f32 %v565_v19, %v2794_v18  ;;  %v2035_v57 = vor.u32 %v2415_v55, %v2032_v56  ;;  %v1960_v0 = vld [vmem:[#allocation6 + $0x28] sm:$0xf0] }
  0xe8   :  { %v517_v30 = vmul.f32 %v516_v15, %v2788_v62  ;;  %v527_v33 = vadd.f32 0.4994258, %v526_v24  ;;  %v557_v52 = vmul.f32 %v556_v35, %v2794_v18  ;;  %1055 = vmatpush.bf16.msra.mxu0 %v1971_v54  ;;  %v1963_v2 = vor.u32 %v2397_v63, %v1960_v0  ;;  %v2024_v5 = vld [vmem:[#allocation6 + $0xa8] sm:$0xf0]  ;;  %v2447_v48 = vld [vmem:[#allocation6 + $0x1b4] sm:$0xf] }
  0xe9   :  { %v448_v28 = vmul.f32 %v447_v20, %v2775_v26  ;;  %v488_v31 = vmul.f32 %v487_v22, %v2784_v49  ;;  %v567_v34 = vadd.f32 0.4994258, %v566_v25  ;;  %v2838_v26 = vadd.f32 1.1283791, %v477_v29  ;;  %1068 = vmatpush.bf16.msra.mxu1 %v2035_v57  ;;  %v2160_v50 = vld [vmem:[#allocation6 + $0x1b8] sm:$0xf0] }
  0xea   :  { %v2840_v45 = vadd.f32 1.1283791, %v517_v30  ;;  %v2845_v49 = vmul.f32 0.5, %v408_v37  ;;  %v528_v51 = vmul.f32 %v527_v33, %v2788_v62  ;;  %v2107_v37 = vor.u32 %v2433_v58, %v2104_v59  ;;  %v2431_v33 = vld [vmem:[#allocation6 + $0x134] sm:$0xf] }
  0xeb   :  { %v449_v32 = vadd.f32 1.0, %v448_v28  ;;  %v2830_v38 = vadd.f32 1.0, %v488_v31  ;;  %v568_v36 = vmul.f32 %v567_v34, %v2794_v18  ;;  %v2171_v62 = vor.u32 %v2449_v23, %v2168_v60  ;;  %v2413_v18 = vld [vmem:[#allocation6 + $0xa4] sm:$0xf]  ;;  %v2096_v34 = vld [vmem:[#allocation6 + $0x138] sm:$0xf0] }
  0xec   :  { %v2853_v6 = vadd.f32 1.0, %v528_v51  ;;  %v558_v11 = vadd.f32 1.1283791, %v557_v52  ;;  %1080 = vmatpush.bf16.msra.mxu2 %v2107_v37  ;;  %v2027_v14 = vor.u32 %v2413_v18, %v2024_v5  ;;  %1056 = vmatpush.bf16.msra.mxu0 %v1963_v2  ;;  %v439_v35 = vmul.f32 %v2832_v39, %v2763_v3  ;;  %v2395_v51 = vld [vmem:[#allocation6 + $0x14] sm:$0xf] }
  0xed   :  { %2509 = vrcp.f32 %v449_v32  ;;  %v459_v46 = vand.u32 2147483647, %v449_v32  ;;  %v461_v47 = vand.u32 2147483648, %v449_v32  ;;  %v499_v53 = vand.u32 2147483647, %v2830_v38  ;;  %1093 = vmatpush.bf16.msra.mxu3 %v2171_v62 }
  0xee   :  { %2511 = vrcp.f32 %v2830_v38  ;;  %v2855_v7 = vadd.f32 1.0, %v568_v36  ;;  %v501_v13 = vand.u32 2147483648, %v2830_v38  ;;  %vm455_vm0 = vweird.f32 %v449_v32  ;;  %1069 = vmatpush.bf16.msra.mxu1 %v2027_v14  ;;  %v1952_v55 = vld [vmem:[#allocation6 + $0x18] sm:$0xf0]  ;;  %v2411_v3 = vld [vmem:[#allocation6 + $0x94] sm:$0xf] }
  0xef   :  { %2513 = vrcp.f32 %v2853_v6  ;;  %vm495_vm2 = vweird.f32 %v2830_v38  ;;  %vm2868_vm4 = vcmp.eq.f32.partialorder %v459_v46, 8.507059e+37  ;;  %v462_v19 = vor.u32 1.1754944e-38, %v461_v47  ;;  %v2016_v39 = vld [vmem:[#allocation6 + $0x98] sm:$0xf0]  ;;  %v2088_v59 = vld [vmem:[#allocation6 + $0x128] sm:$0xf0] }
  0xf0   :  { %2515 = vrcp.f32 %v2855_v7  ;;  %vm2872_vm5 = vcmp.eq.f32.partialorder %v499_v53, 8.507059e+37  ;;  %v502_v25 = vor.u32 1.1754944e-38, %v501_v13  ;;  %v539_v27 = vand.u32 2147483647, %v2853_v6  ;;  %v2445_v23 = vld [vmem:[#allocation6 + $0x1a4] sm:$0xf] }
  0xf1   :  { %v579_v28 = vand.u32 2147483647, %v2855_v7  ;;  %v541_v31 = vand.u32 2147483648, %v2853_v6  ;;  %v2099_v47 = vor.u32 %v2431_v33, %v2096_v34  ;;  %v479_v36 = vmul.f32 %v2838_v26, %v2765_v4  ;;  %v2152_v63 = vld [vmem:[#allocation6 + $0x1a8] sm:$0xf0] }
  0xf2   :  { %v2904_v52 = vmul.f32 %v2840_v45, %v2779_v40  ;;  %v2163_v54 = vor.u32 %v2447_v48, %v2160_v50  ;;  %v2910_v57 = vmul.f32 %v558_v11, %v2781_v41  ;;  %vm2917_vm8 = vcmp.eq.f32.partialorder %v539_v27, 8.507059e+37  ;;  %v2429_v45 = vld [vmem:[#allocation6 + $0x124] sm:$0xf]  ;;  %v1944_v5 = vld [vmem:[#allocation6 + $0x8] sm:$0xf0] }
  0xf3   :  { %v2851_v1 = vpop.eup %2509  ;;  %1081 = vmatpush.bf16.msra.mxu2 %v2099_v47  ;;  %v1955_v26 = vor.u32 %v2395_v51, %v1952_v55  ;;  %v2393_v0 = vld [vmem:[#allocation6 + $0x4] sm:$0xf]  ;;  %v2019_v18 = vor.u32 %v2411_v3, %v2016_v39  ;;  %v2155_v14 = vor.u32 %v2445_v23, %v2152_v63  ;;  %v2080_v24 = vld [vmem:[#allocation6 + $0x118] sm:$0xf0]  ;;  %v2443_v21 = vld [vmem:[#allocation6 + $0x194] sm:$0xf]  ;;  %vm535_vm11 = vweird.f32 %v2853_v6 }
  0xf4   :  { %v2857_v10 = vpop.eup %2511  ;;  %v451_v12 = vmul.f32 %v2851_v1, %v449_v32  ;;  %vm456_vm1 = vweird.f32 %v2851_v1  ;;  %v581_v32 = vand.u32 2147483648, %v2855_v7  ;;  %1094 = vmatpush.bf16.msra.mxu3 %v2163_v54  ;;  %v2409_v11 = vld [vmem:[#allocation6 + $0x84] sm:$0xf]  ;;  %v2144_v30 = vld [vmem:[#allocation6 + $0x198] sm:$0xf0]  ;;  %vm575_vm12 = vweird.f32 %v2855_v7 }
  0xf5   :  { %v491_v15 = vmul.f32 %v2857_v10, %v2830_v38  ;;  %vm496_vm3 = vweird.f32 %v2857_v10  ;;  %vm2880_vm6 = vmor %vm455_vm0, %vm456_vm1  ;;  %v2898_v38 = vpop.eup %2513  ;;  %1057 = vmatpush.bf16.msra.mxu0 %v1955_v26  ;;  %1070 = vmatpush.bf16.msra.mxu1 %v2019_v18  ;;  %v2425_v33 = vld [vmem:[#allocation6 + $0x104] sm:$0xf]  ;;  %v2136_v48 = vld [vmem:[#allocation6 + $0x188] sm:$0xf0]  ;;  %v542_v51 = vor.u32 1.1754944e-38, %v541_v31  ;;  %vm580_vm14 = vcmp.eq.f32.partialorder %v579_v28, 8.507059e+37 }
  0xf6   :  { %v452_v16 = vsub.f32 1.0, %v451_v12  ;;  %vm2889_vm7 = vmor %vm495_vm2, %vm496_vm3  ;;  %v2907_v56 = vpop.eup %2515  ;;  %v531_v4 = vmul.f32 %v2898_v38, %v2853_v6  ;;  %vm536_vm9 = vweird.f32 %v2898_v38  ;;  %v2441_v47 = vld [vmem:[#allocation6 + $0x184] sm:$0xf]  ;;  %v582_v54 = vor.u32 1.1754944e-38, %v581_v32 }
  0xf7   :  { %v492_v20 = vsub.f32 1.0, %v491_v15  ;;  %v571_v60 = vmul.f32 %v2907_v56, %v2855_v7  ;;  %v2008_v15 = vld [vmem:[#allocation6 + $0x88] sm:$0xf0]  ;;  %vm576_vm10 = vweird.f32 %v2907_v56  ;;  %vm537_vm13 = vmor %vm535_vm11, %vm536_vm9  ;;  %v2139_v3 = vor.u32 %v2441_v47, %v2136_v48 }
  0xf8   :  { %v453_v22 = vmul.f32 %v2851_v1, %v452_v16  ;;  %v532_v2 = vsub.f32 1.0, %v531_v4  ;;  %v2427_v16 = vld [vmem:[#allocation6 + $0x114] sm:$0xf]  ;;  %1095 = vmatpush.bf16.msra.mxu3 %v2155_v14  ;;  %vm577_vm15 = vmor %vm575_vm12, %vm576_vm10  ;;  %v415_v28 = vpack.c.bf16 %v2845_v49, %v2836_v44 }
  0xf9   :  { %v493_v29 = vmul.f32 %v2857_v10, %v492_v20  ;;  %v572_v13 = vsub.f32 1.0, %v571_v60  ;;  %v1947_v20 = vor.u32 %v2393_v0, %v1944_v5 }
  0xfa   :  { %v454_v46 = vadd.f32 %v2851_v1, %v453_v22  ;;  %v2011_v22 = vor.u32 %v2409_v11, %v2008_v15  ;;  %v599_v40 = vunpack.c.l.bf16 %v415_v28  ;;  %v600_v49 = vunpack.c.h.bf16 %v415_v28 }
  0xfb   :  { %v494_v53 = vadd.f32 %v2857_v10, %v493_v29  ;;  %v573_v27 = vmul.f32 %v2907_v56, %v572_v13  ;;  %v2083_v29 = vor.u32 %v2427_v16, %v2080_v24  ;;  %1058 = vmatpush.bf16.msra.mxu0 %v1947_v20 }
  0xfc   :  { %v458_v58 = vsel %vm2880_vm6, %v2851_v1, %v454_v46  ;;  %v2072_v46 = vld [vmem:[#allocation6 + $0x108] sm:$0xf0]  ;;  %1071 = vmatpush.bf16.msra.mxu1 %v2011_v22 }
  0xfd   :  { %v463_v41 = vsel %vm2868_vm4, %v462_v19, %v458_v58  ;;  %v498_v37 = vsel %vm2889_vm7, %v2857_v10, %v494_v53  ;;  %v2091_v10 = vor.u32 %v2429_v45, %v2088_v59  ;;  %v533_v19 = vmul.f32 %v2898_v38, %v532_v2 }
  0xfe   :  { %v464_v1 = vmul.f32 %v463_v41, %v439_v35  ;;  %v503_v62 = vsel %vm2872_vm5, %v502_v25, %v498_v37  ;;  %v2147_v35 = vor.u32 %v2443_v21, %v2144_v30  ;;  %v2075_v55 = vor.u32 %v2425_v33, %v2072_v46 }
  0xff   :  { %v504_v12 = vmul.f32 %v503_v62, %v479_v36  ;;  %1082 = vmatpush.bf16.msra.mxu2 %v2091_v10  ;;  %v534_v34 = vadd.f32 %v2898_v38, %v533_v19  ;;  %v574_v36 = vadd.f32 %v2907_v56, %v573_v27  ;;  %v414_v41 = vmul.f32 0.5, %v410_v9 }
 0x100   :  { %v1936_v17 = vclamps-f32 %v464_v1, 1.0  ;;  %1096 = vmatpush.bf16.msra.mxu3 %v2147_v35  ;;  %v1104_v30 = vshrl.u32 %v2745_v42, 16  ;;  %v1108_v33 = vshrl.u32 %v2747_v43, 16 }
 0x101   :  { %v1937_v25 = vclamps-f32 %v504_v12, 1.0  ;;  %v538_v53 = vsel %vm537_vm13, %v2898_v38, %v534_v34  ;;  %v578_v31 = vsel %vm577_vm15, %v2907_v56, %v574_v36  ;;  %v413_v56 = vmul.f32 0.5, %v409_v8 }
 0x102   :  { %v543_v6 = vsel %vm2917_vm8, %v542_v51, %v538_v53  ;;  %v583_v4 = vsel %vm580_vm14, %v582_v54, %v578_v31  ;;  %v1105_v47 = vpack.i.b16 %v1104_v30, %v1104_v30  ;;  %v1109_v48 = vpack.i.b16 %v1108_v33, %v1108_v33 }
 0x103   :  { %v587_v50 = vpack.c.bf16 %v1937_v25, %v1936_v17  ;;  %1083 = vmatpush.bf16.msra.mxu2 %v2083_v29  ;;  %v544_v38 = vmul.f32 %v543_v6, %v2904_v52  ;;  %v584_v26 = vmul.f32 %v583_v4, %v2910_v57  ;;  %v416_v1 = vpack.c.bf16 %v414_v41, %v413_v56 }
 0x104   :  { %1097 = vmatpush.bf16.msra.mxu3 %v2139_v3  ;;  %v1111_v3 = vperm.slane %v1109_v48, 0 }
 0x105   :  { %v589_v39 = vunpack.c.l.bf16 %v587_v50  ;;  %v590_v58 = vunpack.c.h.bf16 %v587_v50  ;;  %v1938_v45 = vclamps-f32 %v544_v38, 1.0  ;;  %v1939_v23 = vclamps-f32 %v584_v26, 1.0 }
 0x106   :  { %v601_v8 = vunpack.c.l.bf16 %v416_v1  ;;  %v602_v61 = vunpack.c.h.bf16 %v416_v1  ;;  %v1115_v28 = vunpack.c.l.bf16 %v1111_v3  ;;  %v2465_v3 = vld [vmem:[#allocation7 + $0x40] sm:$0xff] }
 0x107   :  { %v593_v7 = vadd.f32 1.0, %v589_v39  ;;  %v594_v32 = vadd.f32 1.0, %v590_v58  ;;  %1084 = vmatpush.bf16.msra.mxu2 %v2075_v55  ;;  %v588_v37 = vpack.c.bf16 %v1939_v23, %v1938_v45  ;;  %v1107_v55 = vperm.slane %v1105_v47, 0  ;;  %v2464_v23 = vld [vmem:[#allocation7 + $0x38] sm:$0xff]  ;;  %v2466_v47 = vld [vmem:[#allocation7 + $0x48] sm:$0xff] }
 0x109   :  { %v597_v59 = vpack.c.bf16 %v594_v32, %v593_v7  ;;  %v591_v0 = vunpack.c.l.bf16 %v588_v37  ;;  %v592_v57 = vunpack.c.h.bf16 %v588_v37  ;;  %v1114_v31 = vunpack.c.l.bf16 %v1107_v55  ;;  %v2457_v55 = vld [vmem:[#allocation7] sm:$0xff] }
 0x10b   :  { %v603_v44 = vunpack.c.l.bf16 %v597_v59  ;;  %v604_v52 = vunpack.c.h.bf16 %v597_v59  ;;  %v595_v18 = vadd.f32 1.0, %v591_v0  ;;  %v596_v5 = vadd.f32 1.0, %v592_v57  ;;  %v2470_v0 = vld [vmem:[#allocation7 + $0x68] sm:$0xff] }
 0x10d   :  { %v607_v60 = vmul.f32 %v603_v44, %v599_v40  ;;  %v608_v63 = vmul.f32 %v604_v52, %v600_v49  ;;  %v598_v11 = vpack.c.bf16 %v596_v5, %v595_v18  ;;  %v2472_v40 = vld [vmem:[#allocation7 + $0x78] sm:$0xff]  ;;  %v2463_v44 = vld [vmem:[#allocation7 + $0x30] sm:$0xff]  ;;  %v2461_v18 = vld [vmem:[#allocation7 + $0x20] sm:$0xff] }
 0x10e   :  { %v2471_v49 = vld [vmem:[#allocation7 + $0x70] sm:$0xff]  ;;  %v2469_v5 = vld [vmem:[#allocation7 + $0x60] sm:$0xff] }
 0x10f   :  { %v611_v62 = vpack.c.bf16 %v607_v60, %v607_v60  ;;  %v612_v2 = vpack.c.bf16 %v608_v63, %v608_v63  ;;  %v605_v12 = vunpack.c.l.bf16 %v598_v11  ;;  %v606_v9 = vunpack.c.h.bf16 %v598_v11  ;;  %v2462_v63 = vld [vmem:[#allocation7 + $0x28] sm:$0xff] }
 0x111   :  { %1007 = vmatmul.bf16.vlgmr.msrb.gmra.mxu0 %v611_v62  ;;  %1020 = vmatmul.bf16.vlgmr.msrb.gmra.mxu1 %v612_v2  ;;  %v609_v13 = vmul.f32 %v605_v12, %v601_v8  ;;  %v610_v10 = vmul.f32 %v606_v9, %v602_v61  ;;  %v2460_v61 = vld [vmem:[#allocation7 + $0x18] sm:$0xff] }
 0x112   :  { %1351 = vmatpush.bf16.msrb.mxu0 %v2464_v23  ;;  %1364 = vmatpush.bf16.msrb.mxu1 %v2472_v40  ;;  %v2468_v9 = vld [vmem:[#allocation7 + $0x58] sm:$0xff] }
 0x113   :  { %v613_v14 = vpack.c.bf16 %v609_v13, %v609_v13  ;;  %v614_v15 = vpack.c.bf16 %v610_v10, %v610_v10 }
 0x115   :  { %1033 = vmatmul.bf16.vlgmr.msrb.gmra.mxu2 %v613_v14  ;;  %1046 = vmatmul.bf16.vlgmr.msrb.gmra.mxu3 %v614_v15 }
 0x116   :  { %1352 = vmatpush.bf16.msrb.mxu0 %v2463_v44  ;;  %1365 = vmatpush.bf16.msrb.mxu1 %v2471_v49 }
 0x11a   :  { %1353 = vmatpush.bf16.msrb.mxu0 %v2462_v63  ;;  %1366 = vmatpush.bf16.msrb.mxu1 %v2470_v0 }
 0x11e   :  { %1354 = vmatpush.bf16.msrb.mxu0 %v2461_v18  ;;  %1367 = vmatpush.bf16.msrb.mxu1 %v2469_v5 }
 0x121   :  { %1059 = vmatmul.bf16.vlgmr.msra.gmra.mxu0 %v611_v62  ;;  %1072 = vmatmul.bf16.vlgmr.msra.gmra.mxu1 %v612_v2 }
 0x122   :  { %1355 = vmatpush.bf16.msrb.mxu0 %v2460_v61  ;;  %1368 = vmatpush.bf16.msrb.mxu1 %v2468_v9 }
 0x125   :  { %1085 = vmatmul.bf16.vlgmr.msra.gmra.mxu2 %v613_v14  ;;  %1098 = vmatmul.bf16.vlgmr.msra.gmra.mxu3 %v614_v15 }
 0x18e   :  { %v1008_v16 = vpop.f32.mrf.mxu0  ;;  %v1021_v17 = vpop.f32.mrf.mxu1 }
 0x18f   :  { %v1022_v46 = vadd.f32 %v1021_v17, %v1008_v16 }
 0x196   :  { %v1010_v19 = vpop.f32.mrf.mxu0  ;;  %v1023_v20 = vpop.f32.mrf.mxu1 }
 0x198   :  { %v1034_v22 = vpop.f32.mrf.mxu2  ;;  %v1047_v24 = vpop.f32.mrf.mxu3 }
 0x199   :  { %v1035_v50 = vadd.f32 %v1034_v22, %v1022_v46  ;;  %v2458_v46 = vld [vmem:[#allocation7 + $0x8] sm:$0xff] }
 0x19b   :  { %v1048_v39 = vadd.f32 %v1047_v24, %v1035_v50 }
 0x19e   :  { %v1060_v21 = vpop.f32.mrf.mxu0  ;;  %v1073_v25 = vpop.f32.mrf.mxu1 }
 0x19f   :  { %v1074_v51 = vadd.f32 %v1073_v25, %v1060_v21  ;;  %v2459_v21 = vld [vmem:[#allocation7 + $0x10] sm:$0xff] }
 0x1a0   :  { %v1036_v27 = vpop.f32.mrf.mxu2  ;;  %v1049_v29 = vpop.f32.mrf.mxu3  ;;  %v2467_v25 = vld [vmem:[#allocation7 + $0x50] sm:$0xff]  ;;  %1356 = vmatpush.bf16.msrb.mxu0 %v2459_v21 }
 0x1a1   :  { %1369 = vmatpush.bf16.msrb.mxu1 %v2467_v25 }
 0x1a4   :  { %1357 = vmatpush.bf16.msrb.mxu0 %v2458_v46 }
 0x1a5   :  { %1370 = vmatpush.bf16.msrb.mxu1 %v2466_v47 }
 0x1a6   :  { %v1062_v34 = vpop.f32.mrf.mxu0  ;;  %v1075_v35 = vpop.f32.mrf.mxu1 }
 0x1a8   :  { %v1086_v36 = vpop.f32.mrf.mxu2  ;;  %v1099_v53 = vpop.f32.mrf.mxu3  ;;  %1358 = vmatpush.bf16.msrb.mxu0 %v2457_v55 }
 0x1a9   :  { %v1087_v54 = vadd.f32 %v1086_v36, %v1074_v51  ;;  %1371 = vmatpush.bf16.msrb.mxu1 %v2465_v3 }
 0x1ab   :  { %v1100_v58 = vadd.f32 %v1099_v53, %v1087_v54 }
 0x1ad   :  { %v1103_v6 = vpack.c.bf16 %v1100_v58, %v1048_v39 }
 0x1af   :  { %v1112_v42 = vunpack.c.l.bf16 %v1103_v6  ;;  %v1113_v38 = vunpack.c.h.bf16 %v1103_v6 }
 0x1b0   :  { %v1088_v43 = vpop.f32.mrf.mxu2  ;;  %v1101_v4 = vpop.f32.mrf.mxu3 }
 0x1b1   :  { %v1116_v7 = vadd.f32 %v1114_v31, %v1112_v42  ;;  %v1117_v32 = vadd.f32 %v1115_v28, %v1113_v38 }
 0x1b3   :  { %v2962_v26 = vpack.c.bf16 %v1117_v32, %v1116_v7 }
 0x1b5   :  { %v1119_v45 = vunpack.c.l.bf16 %v2962_v26  ;;  %v1120_v59 = vunpack.c.h.bf16 %v2962_v26 }
 0x1b7   :  { %v1124_v56 = vmul.f32 0.70703125, %v1119_v45  ;;  %v1125_v41 = vmul.f32 0.70703125, %v1120_v59  ;;  %v1121_v21 = vmul.f32 0.5, %v1119_v45  ;;  %v3008_v45 = vld [vmem:[#allocation10] sm:$0xff] }
 0x1b8   :  { %v3012_v26 = vpack.c.bf16 %v3008_v45, %v3008_v45 }
 0x1b9   :  { %v1126_v52 = vpack.c.bf16 %v1125_v41, %v1124_v56 }
 0x1bb   :  { %v2970_v37 = vunpack.c.l.bf16 %v1126_v52  ;;  %v2972_v60 = vunpack.c.h.bf16 %v1126_v52 }
 0x1bd   :  { %v1129_v57 = vmul.f32 %v2970_v37, %v2970_v37  ;;  %v1169_v1 = vmul.f32 %v2972_v60, %v2972_v60 }
 0x1bf   :  { %v2978_v62 = vmin.f32 %v1129_v57, 16.0  ;;  %v2980_v2 = vmin.f32 %v1169_v1, 16.0 }
 0x1c1   :  { %v1131_v11 = vmul.f32 2.1237322e-06, %v2978_v62  ;;  %v1171_v8 = vmul.f32 2.1237322e-06, %v2980_v2  ;;  %v1142_v12 = vmul.f32 3.8918573e-05, %v2978_v62 }
 0x1c2   :  { %v1182_v13 = vmul.f32 3.8918573e-05, %v2980_v2 }
 0x1c3   :  { %v1132_v10 = vadd.f32 0.00028619796, %v1131_v11  ;;  %v1172_v14 = vadd.f32 0.00028619796, %v1171_v8  ;;  %v1143_v15 = vadd.f32 0.001143296, %v1142_v12 }
 0x1c4   :  { %v1183_v16 = vadd.f32 0.001143296, %v1182_v13 }
 0x1c5   :  { %v1133_v17 = vmul.f32 %v1132_v10, %v2978_v62  ;;  %v1173_v19 = vmul.f32 %v1172_v14, %v2980_v2  ;;  %v1144_v20 = vmul.f32 %v1143_v15, %v2978_v62 }
 0x1c6   :  { %v1184_v22 = vmul.f32 %v1183_v16, %v2980_v2 }
 0x1c7   :  { %v1134_v24 = vadd.f32 0.0036580483, %v1133_v17  ;;  %v1145_v27 = vadd.f32 0.014752088, %v1144_v20  ;;  %v1174_v30 = vadd.f32 0.0036580483, %v1173_v19 }
 0x1c8   :  { %v1185_v29 = vadd.f32 0.014752088, %v1184_v22 }
 0x1c9   :  { %v1146_v33 = vmul.f32 %v1145_v27, %v2978_v62  ;;  %v1135_v35 = vmul.f32 %v1134_v24, %v2978_v62  ;;  %v1175_v51 = vmul.f32 %v1174_v30, %v2980_v2 }
 0x1ca   :  { %v1186_v34 = vmul.f32 %v1185_v29, %v2980_v2 }
 0x1cb   :  { %v1147_v48 = vadd.f32 0.112945676, %v1146_v33  ;;  %v1136_v54 = vadd.f32 0.05243302, %v1135_v35  ;;  %v1176_v6 = vadd.f32 0.05243302, %v1175_v51 }
 0x1cc   :  { %v1187_v50 = vadd.f32 0.112945676, %v1186_v34 }
 0x1cd   :  { %v1148_v36 = vmul.f32 %v1147_v48, %v2978_v62  ;;  %v1137_v42 = vmul.f32 %v1136_v54, %v2978_v62  ;;  %v1177_v4 = vmul.f32 %v1176_v6, %v2980_v2 }
 0x1ce   :  { %v1188_v53 = vmul.f32 %v1187_v50, %v2980_v2 }
 0x1cf   :  { %v1149_v39 = vadd.f32 0.4994258, %v1148_v36  ;;  %v1138_v7 = vadd.f32 0.18741608, %v1137_v42  ;;  %v1178_v32 = vadd.f32 0.18741608, %v1177_v4 }
 0x1d0   :  { %v1189_v58 = vadd.f32 0.4994258, %v1188_v53 }
 0x1d1   :  { %v1150_v31 = vmul.f32 %v1149_v39, %v2978_v62  ;;  %v1139_v40 = vmul.f32 %v1138_v7, %v2978_v62  ;;  %v1179_v44 = vmul.f32 %v1178_v32, %v2980_v2 }
 0x1d2   :  { %v1190_v28 = vmul.f32 %v1189_v58, %v2980_v2 }
 0x1d3   :  { %v1151_v38 = vadd.f32 1.0, %v1150_v31  ;;  %v1140_v63 = vadd.f32 1.1283791, %v1139_v40  ;;  %v1180_v11 = vadd.f32 1.1283791, %v1179_v44 }
 0x1d4   :  { %v1191_v43 = vadd.f32 1.0, %v1190_v28 }
 0x1d5   :  { %2517 = vrcp.f32 %v1151_v38  ;;  %v1163_v0 = vand.u32 2147483648, %v1151_v38  ;;  %v1161_v18 = vand.u32 2147483647, %v1151_v38  ;;  %vm1157_vm2 = vweird.f32 %v1151_v38 }
 0x1d6   :  { %2519 = vrcp.f32 %v1191_v43  ;;  %v1203_v5 = vand.u32 2147483648, %v1191_v43  ;;  %v1201_v12 = vand.u32 2147483647, %v1191_v43  ;;  %vm1197_vm4 = vweird.f32 %v1191_v43 }
 0x1d7   :  { %v1164_v62 = vor.u32 1.1754944e-38, %v1163_v0  ;;  %v1141_v2 = vmul.f32 %v1140_v63, %v2970_v37  ;;  %vm1162_vm5 = vcmp.eq.f32.partialorder %v1161_v18, 8.507059e+37  ;;  %v1181_v14 = vmul.f32 %v1180_v11, %v2972_v60  ;;  %v2478_v63 = vld [vmem:[#allocation9 + $0x28] sm:$0xff] }
 0x1d8   :  { %v1204_v10 = vor.u32 1.1754944e-38, %v1203_v5  ;;  %vm1202_vm7 = vcmp.eq.f32.partialorder %v1201_v12, 8.507059e+37  ;;  %v1122_v37 = vmul.f32 0.5, %v1120_v59  ;;  %v3016_v59 = vpack.i.b16 %v3012_v26, %v3012_v26  ;;  %v2477_v5 = vld [vmem:[#allocation9 + $0x20] sm:$0xff]  ;;  %v2476_v12 = vld [vmem:[#allocation9 + $0x18] sm:$0xff] }
 0x1da   :  { %v1123_v30 = vpack.c.bf16 %v1122_v37, %v1121_v21  ;;  %v1382_v54 = vperm.slane %v3016_v59, 1 }
 0x1db   :  { %v2518_v23 = vpop.eup %2517 }
 0x1dc   :  { %v2520_v56 = vpop.eup %2519  ;;  %v1153_v41 = vmul.f32 %v2518_v23, %v1151_v38  ;;  %vm1158_vm0 = vweird.f32 %v2518_v23  ;;  %v1215_v35 = vunpack.c.l.bf16 %v1123_v30  ;;  %v1216_v47 = vunpack.c.h.bf16 %v1123_v30 }
 0x1dd   :  { %v1193_v49 = vmul.f32 %v2520_v56, %v1191_v43  ;;  %vm1198_vm1 = vweird.f32 %v2520_v56  ;;  %vm1159_vm3 = vmor %vm1157_vm2, %vm1158_vm0  ;;  %v1384_v6 = vunpack.c.l.bf16 %v1382_v54 }
 0x1de   :  { %v1154_v52 = vsub.f32 1.0, %v1153_v41  ;;  %vm1199_vm6 = vmor %vm1197_vm4, %vm1198_vm1  ;;  %v2479_v41 = vld [vmem:[#allocation9 + $0x30] sm:$0xff]  ;;  %vm1798_vm4 = vcmask 64512  }
 0x1df   :  { %v1194_v57 = vsub.f32 1.0, %v1193_v49 }
 0x1e0   :  { %v1155_v1 = vmul.f32 %v2518_v23, %v1154_v52 }
 0x1e1   :  { %v1195_v8 = vmul.f32 %v2520_v56, %v1194_v57 }
 0x1e2   :  { %v1156_v61 = vadd.f32 %v2518_v23, %v1155_v1 }
 0x1e3   :  { %v1196_v9 = vadd.f32 %v2520_v56, %v1195_v8 }
 0x1e4   :  { %v1160_v13 = vsel %vm1159_vm3, %v2518_v23, %v1156_v61  ;;  %v2480_v23 = vld [vmem:[#allocation9 + $0x38] sm:$0xff] }
 0x1e5   :  { %v1165_v15 = vsel %vm1162_vm5, %v1164_v62, %v1160_v13  ;;  %v1200_v16 = vsel %vm1199_vm6, %v2520_v56, %v1196_v9  ;;  %1505 = vmatpush.bf16.msrb.mxu2 %v2480_v23  ;;  %v2475_v9 = vld [vmem:[#allocation9 + $0x10] sm:$0xff] }
 0x1e6   :  { %v1166_v17 = vmul.f32 %v1165_v15, %v1141_v2  ;;  %v1205_v19 = vsel %vm1202_vm7, %v1204_v10, %v1200_v16 }
 0x1e7   :  { %v1206_v20 = vmul.f32 %v1205_v19, %v1181_v14  ;;  %v2474_v14 = vld [vmem:[#allocation9 + $0x8] sm:$0xff]  ;;  %v2473_v19 = vld [vmem:[#allocation9] sm:$0xff] }
 0x1e8   :  { %v2196_v22 = vclamps-f32 %v1166_v17, 1.0 }
 0x1e9   :  { %v2197_v24 = vclamps-f32 %v1206_v20, 1.0  ;;  %1506 = vmatpush.bf16.msrb.mxu2 %v2479_v41 }
 0x1eb   :  { %v1209_v25 = vpack.c.bf16 %v2197_v24, %v2196_v22 }
 0x1ed   :  { %v1210_v27 = vunpack.c.l.bf16 %v1209_v25  ;;  %v1211_v29 = vunpack.c.h.bf16 %v1209_v25  ;;  %1507 = vmatpush.bf16.msrb.mxu2 %v2478_v63 }
 0x1ef   :  { %v1212_v33 = vadd.f32 1.0, %v1210_v27  ;;  %v1213_v60 = vadd.f32 1.0, %v1211_v29 }
 0x1f1   :  { %v1214_v34 = vpack.c.bf16 %v1213_v60, %v1212_v33  ;;  %1508 = vmatpush.bf16.msrb.mxu2 %v2477_v5  ;;  %v2486_v5 = vld [vmem:[#allocation9 + $0x68] sm:$0xff] }
 0x1f3   :  { %v1217_v46 = vunpack.c.l.bf16 %v1214_v34  ;;  %v1218_v48 = vunpack.c.h.bf16 %v1214_v34 }
 0x1f5   :  { %v1219_v50 = vmul.f32 %v1217_v46, %v1215_v35  ;;  %v1220_v51 = vmul.f32 %v1218_v48, %v1216_v47  ;;  %1509 = vmatpush.bf16.msrb.mxu2 %v2476_v12 }
 0x1f7   :  { %v1221_v36 = vpack.c.bf16 %v1219_v50, %v1219_v50  ;;  %v1222_v53 = vpack.c.bf16 %v1220_v51, %v1220_v51 }
 0x1f9   :  { %1359 = vmatmul.bf16.vlgmr.msrb.gmra.mxu0 %v1221_v36  ;;  %1372 = vmatmul.bf16.vlgmr.msrb.gmra.mxu1 %v1222_v53 }
 0x1fa   :  { %1510 = vmatpush.bf16.msrb.mxu2 %v2475_v9 }
 0x1fe   :  { %1511 = vmatpush.bf16.msrb.mxu2 %v2474_v14 }
 0x202   :  { %1512 = vmatpush.bf16.msrb.mxu2 %v2473_v19 }
 0x276   :  { %v1360_v55 = vpop.f32.mrf.mxu0  ;;  %v1373_v3 = vpop.f32.mrf.mxu1 }
 0x277   :  { %v1374_v39 = vadd.f32 %v1373_v3, %v1360_v55 }
 0x279   :  { %v1377_v58 = vpack.c.bf16 %v1374_v39, %v1374_v39 }
 0x27b   :  { %v1383_v31 = vunpack.c.l.bf16 %v1377_v58 }
 0x27d   :  { %v1385_v28 = vadd.f32 %v1384_v6, %v1383_v31 }
 0x27e   :  { %v1362_v42 = vpop.f32.mrf.mxu0  ;;  %v1375_v38 = vpop.f32.mrf.mxu1 }
 0x27f   :  { %v1386_v43 = vpack.c.bf16 %v1385_v28, %v1385_v28  ;;  %v1519_v28 = vshrl.u32 %v3012_v26, 16 }
 0x281   :  { %v1387_v4 = vunpack.c.l.bf16 %v1386_v43  ;;  %v1520_v42 = vpack.i.b16 %v1519_v28, %v1519_v28 }
 0x283   :  { %v1390_v7 = vmul.f32 0.70703125, %v1387_v4  ;;  %v1388_v51 = vmul.f32 0.5, %v1387_v4  ;;  %v1522_v38 = vperm.slane %v1520_v42, 1 }
 0x285   :  { %v1391_v32 = vpack.c.bf16 %v1390_v7, %v1390_v7  ;;  %v1389_v54 = vpack.c.bf16 %v1388_v51, %v1388_v51 }
 0x287   :  { %v1392_v40 = vunpack.c.l.bf16 %v1391_v32  ;;  %v1437_v39 = vunpack.c.l.bf16 %v1389_v54  ;;  %v1524_v32 = vunpack.c.l.bf16 %v1522_v38 }
 0x289   :  { %v1393_v56 = vmul.f32 %v1392_v40, %v1392_v40 }
 0x28b   :  { %v1394_v44 = vmin.f32 %v1393_v56, 16.0 }
 0x28d   :  { %v1395_v49 = vmul.f32 2.1237322e-06, %v1394_v44  ;;  %v1406_v52 = vmul.f32 3.8918573e-05, %v1394_v44 }
 0x28f   :  { %v1396_v0 = vadd.f32 0.00028619796, %v1395_v49  ;;  %v1407_v57 = vadd.f32 0.001143296, %v1406_v52  ;;  %v2488_v52 = vld [vmem:[#allocation9 + $0x78] sm:$0xff] }
 0x290   :  { %1646 = vmatpush.bf16.msrb.mxu3 %v2488_v52 }
 0x291   :  { %v1397_v1 = vmul.f32 %v1396_v0, %v1394_v44  ;;  %v1408_v18 = vmul.f32 %v1407_v57, %v1394_v44  ;;  %v2487_v57 = vld [vmem:[#allocation9 + $0x70] sm:$0xff] }
 0x293   :  { %v1409_v11 = vadd.f32 0.014752088, %v1408_v18  ;;  %v1398_v8 = vadd.f32 0.0036580483, %v1397_v1 }
 0x294   :  { %1647 = vmatpush.bf16.msrb.mxu3 %v2487_v57  ;;  %v2496_v57 = vld [vmem:[#allocation9 + $0xb8] sm:$0xff] }
 0x295   :  { %v1410_v61 = vmul.f32 %v1409_v11, %v1394_v44  ;;  %v1399_v2 = vmul.f32 %v1398_v8, %v1394_v44  ;;  %1785 = vmatpush.bf16.msra.mxu0 %v2496_v57 }
 0x297   :  { %v1411_v62 = vadd.f32 0.112945676, %v1410_v61  ;;  %v1400_v15 = vadd.f32 0.05243302, %v1399_v2 }
 0x298   :  { %1648 = vmatpush.bf16.msrb.mxu3 %v2486_v5 }
 0x299   :  { %v1412_v13 = vmul.f32 %v1411_v62, %v1394_v44  ;;  %v1401_v20 = vmul.f32 %v1400_v15, %v1394_v44  ;;  %v2485_v62 = vld [vmem:[#allocation9 + $0x60] sm:$0xff]  ;;  %v2483_v15 = vld [vmem:[#allocation9 + $0x50] sm:$0xff] }
 0x29b   :  { %v1413_v10 = vadd.f32 0.4994258, %v1412_v13  ;;  %v1402_v22 = vadd.f32 0.18741608, %v1401_v20  ;;  %v2484_v13 = vld [vmem:[#allocation9 + $0x58] sm:$0xff]  ;;  %v2482_v20 = vld [vmem:[#allocation9 + $0x48] sm:$0xff] }
 0x29c   :  { %1649 = vmatpush.bf16.msrb.mxu3 %v2485_v62 }
 0x29d   :  { %v1414_v16 = vmul.f32 %v1413_v10, %v1394_v44  ;;  %v1403_v21 = vmul.f32 %v1402_v22, %v1394_v44 }
 0x29f   :  { %v1415_v17 = vadd.f32 1.0, %v1414_v16  ;;  %v1404_v29 = vadd.f32 1.1283791, %v1403_v21 }
 0x2a0   :  { %1650 = vmatpush.bf16.msrb.mxu3 %v2484_v13 }
 0x2a1   :  { %2521 = vrcp.f32 %v1415_v17  ;;  %v1427_v27 = vand.u32 2147483648, %v1415_v17  ;;  %v1425_v33 = vand.u32 2147483647, %v1415_v17  ;;  %vm1421_vm9 = vweird.f32 %v1415_v17 }
 0x2a2   :  { %v1405_v35 = vmul.f32 %v1404_v29, %v1392_v40 }
 0x2a3   :  { %v1428_v34 = vor.u32 1.1754944e-38, %v1427_v27  ;;  %vm1426_vm11 = vcmp.eq.f32.partialorder %v1425_v33, 8.507059e+37 }
 0x2a4   :  { %1651 = vmatpush.bf16.msrb.mxu3 %v2483_v15 }
 0x2a7   :  { %v2522_v24 = vpop.eup %2521 }
 0x2a8   :  { %v1417_v37 = vmul.f32 %v2522_v24, %v1415_v17  ;;  %vm1422_vm8 = vweird.f32 %v2522_v24  ;;  %1652 = vmatpush.bf16.msrb.mxu3 %v2482_v20 }
 0x2a9   :  { %vm1423_vm10 = vmor %vm1421_vm9, %vm1422_vm8 }
 0x2aa   :  { %v1418_v25 = vsub.f32 1.0, %v1417_v37  ;;  %v2481_v37 = vld [vmem:[#allocation9 + $0x40] sm:$0xff] }
 0x2ac   :  { %v1419_v30 = vmul.f32 %v2522_v24, %v1418_v25  ;;  %1653 = vmatpush.bf16.msrb.mxu3 %v2481_v37 }
 0x2ae   :  { %v1420_v60 = vadd.f32 %v2522_v24, %v1419_v30 }
 0x2b0   :  { %v1424_v46 = vsel %vm1423_vm10, %v2522_v24, %v1420_v60 }
 0x2b1   :  { %v1429_v47 = vsel %vm1426_vm11, %v1428_v34, %v1424_v46 }
 0x2b2   :  { %v1430_v48 = vmul.f32 %v1429_v47, %v1405_v35 }
 0x2b4   :  { %v2262_v50 = vclamps-f32 %v1430_v48, 1.0 }
 0x2b6   :  { %v1433_v36 = vpack.c.bf16 %v2262_v50, %v2262_v50 }
 0x2b8   :  { %v1434_v53 = vunpack.c.l.bf16 %v1433_v36 }
 0x2ba   :  { %v1435_v55 = vadd.f32 1.0, %v1434_v53 }
 0x2bc   :  { %v1436_v3 = vpack.c.bf16 %v1435_v55, %v1435_v55 }
 0x2be   :  { %v1438_v58 = vunpack.c.l.bf16 %v1436_v3 }
 0x2c0   :  { %v1439_v6 = vmul.f32 %v1438_v58, %v1437_v39 }
 0x2c2   :  { %v1440_v31 = vpack.c.bf16 %v1439_v6, %v1439_v6 }
 0x2c4   :  { %1513 = vmatmul.bf16.vlgmr.msrb.gmra.mxu2 %v1440_v31 }
 0x347   :  { %v1514_v43 = vpop.f32.mrf.mxu2 }
 0x348   :  { %v1518_v7 = vpack.c.bf16 %v1514_v43, %v1514_v43 }
 0x34a   :  { %v1523_v23 = vunpack.c.l.bf16 %v1518_v7 }
 0x34c   :  { %v1525_v40 = vadd.f32 %v1524_v32, %v1523_v23  ;;  %v1660_v32 = vperm.slane %v3016_v59, 2  ;;  %v2494_v59 = vld [vmem:[#allocation9 + $0xa8] sm:$0xff] }
 0x34e   :  { %v1526_v4 = vpack.c.bf16 %v1525_v40, %v1525_v40 }
 0x34f   :  { %v1516_v56 = vpop.f32.mrf.mxu2 }
 0x350   :  { %v1527_v41 = vunpack.c.l.bf16 %v1526_v4  ;;  %v1662_v4 = vunpack.c.l.bf16 %v1660_v32 }
 0x352   :  { %v1530_v44 = vmul.f32 0.70703125, %v1527_v41  ;;  %v1528_v3 = vmul.f32 0.5, %v1527_v41 }
 0x354   :  { %v1531_v49 = vpack.c.bf16 %v1530_v44, %v1530_v44  ;;  %v1529_v6 = vpack.c.bf16 %v1528_v3, %v1528_v3 }
 0x356   :  { %v1532_v63 = vunpack.c.l.bf16 %v1531_v49  ;;  %v1577_v42 = vunpack.c.l.bf16 %v1529_v6 }
 0x358   :  { %v1533_v0 = vmul.f32 %v1532_v63, %v1532_v63 }
 0x35a   :  { %v1534_v1 = vmin.f32 %v1533_v0, 16.0 }
 0x35c   :  { %v1535_v26 = vmul.f32 2.1237322e-06, %v1534_v1  ;;  %v1546_v18 = vmul.f32 3.8918573e-05, %v1534_v1 }
 0x35e   :  { %v1536_v11 = vadd.f32 0.00028619796, %v1535_v26  ;;  %v1547_v8 = vadd.f32 0.001143296, %v1546_v18  ;;  %v2495_v18 = vld [vmem:[#allocation9 + $0xb0] sm:$0xff] }
 0x35f   :  { %1786 = vmatpush.bf16.msra.mxu0 %v2495_v18 }
 0x360   :  { %v1537_v12 = vmul.f32 %v1536_v11, %v1534_v1  ;;  %v1548_v61 = vmul.f32 %v1547_v8, %v1534_v1 }
 0x362   :  { %v1549_v9 = vadd.f32 0.014752088, %v1548_v61  ;;  %v1538_v2 = vadd.f32 0.0036580483, %v1537_v12 }
 0x363   :  { %1787 = vmatpush.bf16.msra.mxu0 %v2494_v59 }
 0x364   :  { %v1550_v10 = vmul.f32 %v1549_v9, %v1534_v1  ;;  %v1539_v16 = vmul.f32 %v1538_v2, %v1534_v1  ;;  %v2493_v2 = vld [vmem:[#allocation9 + $0xa0] sm:$0xff] }
 0x366   :  { %v1551_v14 = vadd.f32 0.112945676, %v1550_v10  ;;  %v1540_v22 = vadd.f32 0.05243302, %v1539_v16 }
 0x367   :  { %1788 = vmatpush.bf16.msra.mxu0 %v2493_v2 }
 0x368   :  { %v1552_v17 = vmul.f32 %v1551_v14, %v1534_v1  ;;  %v1541_v25 = vmul.f32 %v1540_v22, %v1534_v1  ;;  %v2492_v14 = vld [vmem:[#allocation9 + $0x98] sm:$0xff] }
 0x36a   :  { %v1553_v19 = vadd.f32 0.4994258, %v1552_v17  ;;  %v1542_v27 = vadd.f32 0.18741608, %v1541_v25  ;;  %v2491_v17 = vld [vmem:[#allocation9 + $0x90] sm:$0xff] }
 0x36b   :  { %1789 = vmatpush.bf16.msra.mxu0 %v2492_v14 }
 0x36c   :  { %v1554_v24 = vmul.f32 %v1553_v19, %v1534_v1  ;;  %v1543_v30 = vmul.f32 %v1542_v27, %v1534_v1  ;;  %v2489_v27 = vld [vmem:[#allocation9 + $0x80] sm:$0xff] }
 0x36e   :  { %v1555_v21 = vadd.f32 1.0, %v1554_v24  ;;  %v1544_v35 = vadd.f32 1.1283791, %v1543_v30  ;;  %v2490_v24 = vld [vmem:[#allocation9 + $0x88] sm:$0xff] }
 0x36f   :  { %1790 = vmatpush.bf16.msra.mxu0 %v2491_v17 }
 0x370   :  { %2523 = vrcp.f32 %v1555_v21  ;;  %v1567_v34 = vand.u32 2147483648, %v1555_v21  ;;  %v1565_v47 = vand.u32 2147483647, %v1555_v21  ;;  %vm1561_vm13 = vweird.f32 %v1555_v21 }
 0x371   :  { %v1545_v51 = vmul.f32 %v1544_v35, %v1532_v63 }
 0x372   :  { %v1568_v50 = vor.u32 1.1754944e-38, %v1567_v34  ;;  %vm1566_vm15 = vcmp.eq.f32.partialorder %v1565_v47, 8.507059e+37 }
 0x373   :  { %1791 = vmatpush.bf16.msra.mxu0 %v2490_v24 }
 0x376   :  { %v2524_v29 = vpop.eup %2523 }
 0x377   :  { %v1557_v33 = vmul.f32 %v2524_v29, %v1555_v21  ;;  %vm1562_vm12 = vweird.f32 %v2524_v29  ;;  %1792 = vmatpush.bf16.msra.mxu0 %v2489_v27 }
 0x378   :  { %vm1563_vm14 = vmor %vm1561_vm13, %vm1562_vm12 }
 0x379   :  { %v1558_v60 = vsub.f32 1.0, %v1557_v33 }
 0x37b   :  { %v1559_v46 = vmul.f32 %v2524_v29, %v1558_v60 }
 0x37d   :  { %v1560_v48 = vadd.f32 %v2524_v29, %v1559_v46 }
 0x37f   :  { %v1564_v36 = vsel %vm1563_vm14, %v2524_v29, %v1560_v48 }
 0x380   :  { %v1569_v53 = vsel %vm1566_vm15, %v1568_v50, %v1564_v36 }
 0x381   :  { %v1570_v54 = vmul.f32 %v1569_v53, %v1545_v51 }
 0x383   :  { %v2295_v55 = vclamps-f32 %v1570_v54, 1.0 }
 0x385   :  { %v1573_v39 = vpack.c.bf16 %v2295_v55, %v2295_v55 }
 0x387   :  { %v1574_v58 = vunpack.c.l.bf16 %v1573_v39 }
 0x389   :  { %v1575_v31 = vadd.f32 1.0, %v1574_v58 }
 0x38b   :  { %v1576_v28 = vpack.c.bf16 %v1575_v31, %v1575_v31 }
 0x38d   :  { %v1578_v38 = vunpack.c.l.bf16 %v1576_v28 }
 0x38f   :  { %v1579_v43 = vmul.f32 %v1578_v38, %v1577_v42 }
 0x391   :  { %v1580_v7 = vpack.c.bf16 %v1579_v43, %v1579_v43 }
 0x393   :  { %1654 = vmatmul.bf16.vlgmr.msrb.gmra.mxu3 %v1580_v7 }
 0x416   :  { %v1655_v23 = vpop.f32.mrf.mxu3 }
 0x417   :  { %v1659_v40 = vpack.c.bf16 %v1655_v23, %v1655_v23 }
 0x419   :  { %v1661_v56 = vunpack.c.l.bf16 %v1659_v40  ;;  %v1736_v40 = vperm.slane %v3008_v45, 5 }
 0x41b   :  { %v1663_v44 = vadd.f32 %v1662_v4, %v1661_v56 }
 0x41d   :  { %v1664_v49 = vpack.c.bf16 %v1663_v44, %v1663_v44 }
 0x41e   :  { %v1657_v52 = vpop.f32.mrf.mxu3 }
 0x41f   :  { %v1665_v41 = vunpack.c.l.bf16 %v1664_v49 }
 0x421   :  { %v1668_v63 = vmul.f32 0.70703125, %v1665_v41  ;;  %v1666_v58 = vmul.f32 0.5, %v1665_v41 }
 0x423   :  { %v1669_v0 = vpack.c.bf16 %v1668_v63, %v1668_v63  ;;  %v1667_v28 = vpack.c.bf16 %v1666_v58, %v1666_v58 }
 0x425   :  { %v1670_v1 = vunpack.c.l.bf16 %v1669_v0  ;;  %v1715_v43 = vunpack.c.l.bf16 %v1667_v28 }
 0x427   :  { %v1671_v26 = vmul.f32 %v1670_v1, %v1670_v1 }
 0x429   :  { %v1672_v5 = vmin.f32 %v1671_v26, 16.0 }
 0x42b   :  { %v1673_v11 = vmul.f32 2.1237322e-06, %v1672_v5  ;;  %v1684_v8 = vmul.f32 3.8918573e-05, %v1672_v5 }
 0x42d   :  { %v1674_v12 = vadd.f32 0.00028619796, %v1673_v11  ;;  %v1685_v61 = vadd.f32 0.001143296, %v1684_v8 }
 0x42f   :  { %v1675_v62 = vmul.f32 %v1674_v12, %v1672_v5  ;;  %v1686_v9 = vmul.f32 %v1685_v61, %v1672_v5 }
 0x431   :  { %v1687_v13 = vadd.f32 0.014752088, %v1686_v9  ;;  %v1676_v10 = vadd.f32 0.0036580483, %v1675_v62 }
 0x433   :  { %v1688_v15 = vmul.f32 %v1687_v13, %v1672_v5  ;;  %v1677_v19 = vmul.f32 %v1676_v10, %v1672_v5 }
 0x435   :  { %v1689_v16 = vadd.f32 0.112945676, %v1688_v15  ;;  %v1678_v21 = vadd.f32 0.05243302, %v1677_v19 }
 0x437   :  { %v1690_v20 = vmul.f32 %v1689_v16, %v1672_v5  ;;  %v1679_v29 = vmul.f32 %v1678_v21, %v1672_v5 }
 0x439   :  { %v1691_v22 = vadd.f32 0.4994258, %v1690_v20  ;;  %v1680_v30 = vadd.f32 0.18741608, %v1679_v29 }
 0x43b   :  { %v1692_v37 = vmul.f32 %v1691_v22, %v1672_v5  ;;  %v1681_v60 = vmul.f32 %v1680_v30, %v1672_v5 }
 0x43d   :  { %v1693_v25 = vadd.f32 1.0, %v1692_v37  ;;  %v1682_v47 = vadd.f32 1.1283791, %v1681_v60 }
 0x43f   :  { %2525 = vrcp.f32 %v1693_v25  ;;  %v1705_v46 = vand.u32 2147483648, %v1693_v25  ;;  %v1703_v50 = vand.u32 2147483647, %v1693_v25  ;;  %vm1699_vm1 = vweird.f32 %v1693_v25 }
 0x440   :  { %v1683_v53 = vmul.f32 %v1682_v47, %v1670_v1 }
 0x441   :  { %v1706_v36 = vor.u32 1.1754944e-38, %v1705_v46  ;;  %vm1704_vm3 = vcmp.eq.f32.partialorder %v1703_v50, 8.507059e+37 }
 0x445   :  { %v2526_v33 = vpop.eup %2525 }
 0x446   :  { %v1695_v34 = vmul.f32 %v2526_v33, %v1693_v25  ;;  %vm1700_vm0 = vweird.f32 %v2526_v33 }
 0x447   :  { %vm1701_vm2 = vmor %vm1699_vm1, %vm1700_vm0 }
 0x448   :  { %v1696_v35 = vsub.f32 1.0, %v1695_v34 }
 0x44a   :  { %v1697_v48 = vmul.f32 %v2526_v33, %v1696_v35 }
 0x44c   :  { %v1698_v51 = vadd.f32 %v2526_v33, %v1697_v48 }
 0x44e   :  { %v1702_v54 = vsel %vm1701_vm2, %v2526_v33, %v1698_v51 }
 0x44f   :  { %v1707_v55 = vsel %vm1704_vm3, %v1706_v36, %v1702_v54 }
 0x450   :  { %v1708_v3 = vmul.f32 %v1707_v55, %v1683_v53 }
 0x452   :  { %v2328_v39 = vclamps-f32 %v1708_v3, 1.0 }
 0x454   :  { %v1711_v6 = vpack.c.bf16 %v2328_v39, %v2328_v39 }
 0x456   :  { %v1712_v31 = vunpack.c.l.bf16 %v1711_v6 }
 0x458   :  { %v1713_v42 = vadd.f32 1.0, %v1712_v31 }
 0x45a   :  { %v1714_v38 = vpack.c.bf16 %v1713_v42, %v1713_v42 }
 0x45c   :  { %v1716_v7 = vunpack.c.l.bf16 %v1714_v38 }
 0x45e   :  { %v1717_v32 = vmul.f32 %v1716_v7, %v1715_v43 }
 0x460   :  { %v1718_v23 = vpack.c.bf16 %v1717_v32, %v1717_v32 }
 0x462   :  { %1793 = vmatmul.bf16.vlgmr.msra.gmra.mxu0 %v1718_v23 }
 0x4df   :  { %v1794_v4 = vpop.f32.mrf.mxu0 }
 0x4e0   :  { %v1795_v56 = vadd.f32 %v1794_v4, %v1736_v40 }
 0x4e2   :  { %1799 = vst.msk [vmem:[%s3031_s6] sm:$0xff] %vm1798_vm4, %v1795_v56 }
 0x4e7   :  { %v1796_v44 = vpop.f32.mrf.mxu0 }
 0x4e8   :  { %1804 = vsyncpa [#allocation3], 1 }
 0x4e9   :  { %1805 = vsyncpa [#allocation5], 1 }
 0x4ea   :  { %1806 = vsyncpa [#allocation8], 1 }
 0x4eb   :  { %1807 = vsyncpa [#allocation11], 1 }

// kernel: ae_encoder_forward.1
= control target key start
LH: loop header
LB: loop body
LE: loop exit
PB: predicated region body
PF: predicated region fallthrough
CT: control target
= control target key end

     0   :  { %11 = vsyncpa [#allocation3], 0  ;;  %s2863_s0 = inlined_call_operand.hbm [shape: f32[8,128], index: 0, kind: input, shape index: {}]   ;;  %s2864_s1 = inlined_call_operand.hbm [shape: bf16[128,512], index: 1, kind: input, shape index: {}]   ;;  %s2865_s2 = inlined_call_operand.hbm [shape: bf16[512,256], index: 2, kind: input, shape index: {}]   ;;  %s2866_s3 = inlined_call_operand.hbm [shape: bf16[256,128], index: 3, kind: input, shape index: {}]   ;;  %s2867_s4 = inlined_call_operand.hbm [shape: bf16[3,128,128], index: 4, kind: input, shape index: {}]   ;;  %s2868_s5 = inlined_call_operand.hbm [shape: f32[8,512], index: 5, kind: input, shape index: {}]   ;;  %s2869_s6 = inlined_call_operand.vmem [shape: f32[8,8], index: 6, kind: output, shape index: {}]  }
   0x1   :  { %12 = vsyncpa [#allocation5], 0 }
   0x2   :  { %13 = vsyncpa [#allocation8], 0  ;;  %s30_s23 = sshll.u32 %s2864_s1, 4  ;;  %s31_s23 = int_to_ptr.hbm [resolvable:$true] %s30_s23 }
   0x3   :  { %14 = vsyncpa [#allocation11], 0  ;;  %s2535_s24 = smov [#allocation4]   ;;  %s56_s28 = sshll.u32 %s2866_s3, 4  ;;  %s57_s28 = int_to_ptr.hbm [resolvable:$true] %s56_s28 }
   0x4   :  { %s32_s25 = sshll.u32 %s2535_s24, 4  ;;  %s2536_s29 = smov 256   ;;  %s33_s25 = int_to_ptr.vmem [resolvable:$true] %s32_s25 }
   0x5   :  { %s2537_s30 = smov 16   ;;  %s2538_s7 = smov [#allocation7]  }
   0x6   :  { %38 = dma.hbm_to_vmem [thread:$0]  %s31_s23, 4096, %s33_s25, [#allocation5], %s2536_s29, %s2536_s29, %s2537_s30  }
   0x7   :  { %s58_s8 = sshll.u32 %s2538_s7, 4  ;;  %s2539_s9 = smov 64   ;;  %s59_s8 = int_to_ptr.vmem [resolvable:$true] %s58_s8 }
   0x8   :  { %s2540_s10 = smov 4   ;;  %s20_s12 = sshll.u32 %s2863_s0, 4  ;;  %s21_s12 = int_to_ptr.hbm [resolvable:$true] %s20_s12 }
   0x9   :  { %64 = dma.hbm_to_vmem [thread:$0]  %s57_s28, 2048, %s59_s8, [#allocation8], %s2539_s9, %s2539_s9, %s2540_s10  }
   0xa   :  { %s2541_s13 = smov [#allocation2]   ;;  %s43_s16 = sshll.u32 %s2865_s2, 4  ;;  %s44_s16 = int_to_ptr.hbm [resolvable:$true] %s43_s16 }
   0xb   :  { %s22_s14 = sshll.u32 %s2541_s13, 4  ;;  %s2542_s17 = smov [#allocation6]   ;;  %s23_s14 = int_to_ptr.vmem [resolvable:$true] %s22_s14 }
   0xc   :  { %25 = dma.hbm_to_vmem [thread:$0]  %s21_s12, 128, %s23_s14, [#allocation3]  }
   0xd   :  { %s45_s18 = sshll.u32 %s2542_s17, 4  ;;  %s2543_s19 = smov 128   ;;  %s46_s18 = int_to_ptr.vmem [resolvable:$true] %s45_s18 }
   0xe   :  { %s2544_s20 = smov 8   ;;  %s69_s0 = sshll.u32 %s2867_s4, 4  ;;  %s70_s0 = int_to_ptr.hbm [resolvable:$true] %s69_s0 }
   0xf   :  { %51 = dma.hbm_to_vmem [thread:$0]  %s44_s16, 8192, %s46_s18, [#allocation5], %s2543_s19, %s2543_s19, %s2544_s20  }
  0x10   :  { %s2545_s23 = smov [#allocation9]   ;;  %s83_s2 = sshll.u32 %s2868_s5, 4  ;;  %s84_s2 = int_to_ptr.hbm [resolvable:$true] %s83_s2 }
  0x11   :  { %s71_s24 = sshll.u32 %s2545_s23, 4  ;;  %s2546_s27 = smov [#allocation10]   ;;  %s72_s24 = int_to_ptr.vmem [resolvable:$true] %s71_s24 }
  0x12   :  { %77 = dma.hbm_to_vmem [thread:$0]  %s70_s0, 3072, %s72_s24, [#allocation8], %s2539_s9, %s2539_s9, %s2540_s10  }
  0x13   :  { %s85_s28 = sshll.u32 %s2546_s27, 4  ;;  %s86_s28 = int_to_ptr.vmem [resolvable:$true] %s85_s28 }
  0x14   :  { %88 = dma.hbm_to_vmem [thread:$0]  %s84_s2, 512, %s86_s28, [#allocation11]  }
  0x15   :  { %2527 = dma.done.wait [#allocation3], 128  }
  0x16   :  { %2528 = vsyncadd [#allocation3], 4294967168 }
  0x17   :  { %2529 = dma.done.wait [#allocation5], 12288  }
  0x18   :  { %2530 = vsyncadd [#allocation5], 4294955008 }
  0x19   :  { %2531 = dma.done.wait [#allocation8], 5120  }
  0x1a   :  { %2532 = vsyncadd [#allocation8], 4294962176 }
  0x1b   :  { %2533 = dma.done.wait [#allocation11], 512  }
  0x1c   :  { %2534 = vsyncadd [#allocation11], 4294966784  ;;  %v1777_v0 = vld [vmem:[#allocation4 + $0xe0] sm:$0xf]  ;;  %v2246_v1 = vld [vmem:[#allocation4 + $0xec] sm:$0xf0] }
  0x1d   :  { %v2244_v2 = vld [vmem:[#allocation4 + $0xe4] sm:$0xf]  ;;  %v1778_v3 = vor.u32 %v2246_v1, %v1777_v0  ;;  %v1779_v4 = vld [vmem:[#allocation4 + $0xf0] sm:$0xf0]  ;;  %v1785_v5 = vld [vmem:[#allocation4 + $0xe8] sm:$0xf] }
  0x1e   :  { %v2247_v6 = vld [vmem:[#allocation4 + $0xf4] sm:$0xf0]  ;;  %v1782_v7 = vor.u32 %v2244_v2, %v1779_v4  ;;  %v2245_v9 = vld [vmem:[#allocation4 + $0xec] sm:$0xf]  ;;  %v1787_v10 = vld [vmem:[#allocation4 + $0xf8] sm:$0xf0] }
  0x1f   :  { %v1786_v8 = vor.u32 %v2247_v6, %v1785_v5  ;;  %v1761_v11 = vld [vmem:[#allocation4 + $0xc0] sm:$0xf]  ;;  %315 = vmatpush.bf16.msra.mxu0 %v1778_v3  ;;  %v1790_v12 = vor.u32 %v2245_v9, %v1787_v10  ;;  %v2242_v13 = vld [vmem:[#allocation4 + $0xcc] sm:$0xf0]  ;;  %v2240_v14 = vld [vmem:[#allocation4 + $0xc4] sm:$0xf] }
  0x20   :  { %v1763_v15 = vld [vmem:[#allocation4 + $0xd0] sm:$0xf0]  ;;  %328 = vmatpush.bf16.msra.mxu1 %v1782_v7  ;;  %v1762_v16 = vor.u32 %v2242_v13, %v1761_v11  ;;  %v1769_v18 = vld [vmem:[#allocation4 + $0xc8] sm:$0xf]  ;;  %v2243_v19 = vld [vmem:[#allocation4 + $0xd4] sm:$0xf0] }
  0x21   :  { %341 = vmatpush.bf16.msra.mxu2 %v1786_v8  ;;  %v1766_v17 = vor.u32 %v2240_v14, %v1763_v15  ;;  %v2241_v20 = vld [vmem:[#allocation4 + $0xcc] sm:$0xf]  ;;  %354 = vmatpush.bf16.msra.mxu3 %v1790_v12  ;;  %v1770_v21 = vor.u32 %v2243_v19, %v1769_v18  ;;  %v1771_v22 = vld [vmem:[#allocation4 + $0xd8] sm:$0xf0]  ;;  %v1745_v23 = vld [vmem:[#allocation4 + $0xa0] sm:$0xf] }
  0x22   :  { %v2238_v24 = vld [vmem:[#allocation4 + $0xac] sm:$0xf0]  ;;  %v1774_v25 = vor.u32 %v2241_v20, %v1771_v22  ;;  %v2236_v26 = vld [vmem:[#allocation4 + $0xa4] sm:$0xf]  ;;  %v1747_v27 = vld [vmem:[#allocation4 + $0xb0] sm:$0xf0] }
  0x23   :  { %v1753_v28 = vld [vmem:[#allocation4 + $0xa8] sm:$0xf]  ;;  %316 = vmatpush.bf16.msra.mxu0 %v1762_v16  ;;  %v1746_v29 = vor.u32 %v2238_v24, %v1745_v23  ;;  %v2239_v30 = vld [vmem:[#allocation4 + $0xb4] sm:$0xf0]  ;;  %v2237_v31 = vld [vmem:[#allocation4 + $0xac] sm:$0xf]  ;;  %v1750_v33 = vor.u32 %v2236_v26, %v1747_v27 }
  0x24   :  { %v1755_v32 = vld [vmem:[#allocation4 + $0xb8] sm:$0xf0]  ;;  %329 = vmatpush.bf16.msra.mxu1 %v1766_v17  ;;  %v1754_v34 = vor.u32 %v2239_v30, %v1753_v28  ;;  %v1729_v35 = vld [vmem:[#allocation4 + $0x80] sm:$0xf]  ;;  %v2234_v36 = vld [vmem:[#allocation4 + $0x8c] sm:$0xf0] }
  0x25   :  { %342 = vmatpush.bf16.msra.mxu2 %v1770_v21  ;;  %v2232_v37 = vld [vmem:[#allocation4 + $0x84] sm:$0xf]  ;;  %355 = vmatpush.bf16.msra.mxu3 %v1774_v25  ;;  %v1758_v38 = vor.u32 %v2237_v31, %v1755_v32  ;;  %v1731_v39 = vld [vmem:[#allocation4 + $0x90] sm:$0xf0]  ;;  %v1737_v40 = vld [vmem:[#allocation4 + $0x88] sm:$0xf]  ;;  %v1730_v44 = vor.u32 %v2234_v36, %v1729_v35 }
  0x26   :  { %v2235_v41 = vld [vmem:[#allocation4 + $0x94] sm:$0xf0]  ;;  %v2233_v42 = vld [vmem:[#allocation4 + $0x8c] sm:$0xf]  ;;  %v1739_v43 = vld [vmem:[#allocation4 + $0x98] sm:$0xf0]  ;;  %v1734_v45 = vor.u32 %v2232_v37, %v1731_v39 }
  0x27   :  { %317 = vmatpush.bf16.msra.mxu0 %v1746_v29  ;;  %v1738_v46 = vor.u32 %v2235_v41, %v1737_v40  ;;  %v1713_v47 = vld [vmem:[#allocation4 + $0x60] sm:$0xf]  ;;  %v2230_v48 = vld [vmem:[#allocation4 + $0x6c] sm:$0xf0]  ;;  %v2228_v49 = vld [vmem:[#allocation4 + $0x64] sm:$0xf]  ;;  %v1742_v50 = vor.u32 %v2233_v42, %v1739_v43 }
  0x28   :  { %330 = vmatpush.bf16.msra.mxu1 %v1750_v33  ;;  %v1715_v51 = vld [vmem:[#allocation4 + $0x70] sm:$0xf0]  ;;  %v1721_v52 = vld [vmem:[#allocation4 + $0x68] sm:$0xf]  ;;  %v2231_v53 = vld [vmem:[#allocation4 + $0x74] sm:$0xf0]  ;;  %v1714_v56 = vor.u32 %v2230_v48, %v1713_v47 }
  0x29   :  { %343 = vmatpush.bf16.msra.mxu2 %v1754_v34  ;;  %356 = vmatpush.bf16.msra.mxu3 %v1758_v38  ;;  %v2229_v54 = vld [vmem:[#allocation4 + $0x6c] sm:$0xf]  ;;  %v1723_v55 = vld [vmem:[#allocation4 + $0x78] sm:$0xf0]  ;;  %v1718_v57 = vor.u32 %v2228_v49, %v1715_v51  ;;  %v1722_v58 = vor.u32 %v2231_v53, %v1721_v52  ;;  %v1697_v59 = vld [vmem:[#allocation4 + $0x40] sm:$0xf] }
  0x2a   :  { %v2226_v60 = vld [vmem:[#allocation4 + $0x4c] sm:$0xf0]  ;;  %v2224_v61 = vld [vmem:[#allocation4 + $0x44] sm:$0xf]  ;;  %v1726_v62 = vor.u32 %v2229_v54, %v1723_v55  ;;  %v1699_v63 = vld [vmem:[#allocation4 + $0x50] sm:$0xf0] }
  0x2b   :  { %318 = vmatpush.bf16.msra.mxu0 %v1730_v44  ;;  %v1705_v0 = vld [vmem:[#allocation4 + $0x48] sm:$0xf]  ;;  %v2227_v1 = vld [vmem:[#allocation4 + $0x54] sm:$0xf0]  ;;  %v2225_v2 = vld [vmem:[#allocation4 + $0x4c] sm:$0xf]  ;;  %v1698_v4 = vor.u32 %v2226_v60, %v1697_v59  ;;  %v1702_v5 = vor.u32 %v2224_v61, %v1699_v63 }
  0x2c   :  { %331 = vmatpush.bf16.msra.mxu1 %v1734_v45  ;;  %v1707_v3 = vld [vmem:[#allocation4 + $0x58] sm:$0xf0]  ;;  %v1706_v6 = vor.u32 %v2227_v1, %v1705_v0  ;;  %v1681_v7 = vld [vmem:[#allocation4 + $0x20] sm:$0xf]  ;;  %v2222_v8 = vld [vmem:[#allocation4 + $0x2c] sm:$0xf0] }
  0x2d   :  { %344 = vmatpush.bf16.msra.mxu2 %v1738_v46  ;;  %357 = vmatpush.bf16.msra.mxu3 %v1742_v50  ;;  %v2220_v9 = vld [vmem:[#allocation4 + $0x24] sm:$0xf]  ;;  %v1710_v10 = vor.u32 %v2225_v2, %v1707_v3  ;;  %v1683_v11 = vld [vmem:[#allocation4 + $0x30] sm:$0xf0]  ;;  %v1689_v12 = vld [vmem:[#allocation4 + $0x28] sm:$0xf]  ;;  %v1682_v16 = vor.u32 %v2222_v8, %v1681_v7 }
  0x2e   :  { %v2223_v13 = vld [vmem:[#allocation4 + $0x34] sm:$0xf0]  ;;  %v2221_v14 = vld [vmem:[#allocation4 + $0x2c] sm:$0xf]  ;;  %v1691_v15 = vld [vmem:[#allocation4 + $0x38] sm:$0xf0]  ;;  %v1686_v17 = vor.u32 %v2220_v9, %v1683_v11 }
  0x2f   :  { %319 = vmatpush.bf16.msra.mxu0 %v1714_v56  ;;  %v1690_v18 = vor.u32 %v2223_v13, %v1689_v12  ;;  %v1665_v19 = vld [vmem:[#allocation4] sm:$0xf]  ;;  %v2218_v20 = vld [vmem:[#allocation4 + $0xc] sm:$0xf0]  ;;  %v2216_v21 = vld [vmem:[#allocation4 + $0x4] sm:$0xf]  ;;  %v1694_v22 = vor.u32 %v2221_v14, %v1691_v15 }
  0x30   :  { %332 = vmatpush.bf16.msra.mxu1 %v1718_v57  ;;  %v1667_v23 = vld [vmem:[#allocation4 + $0x10] sm:$0xf0]  ;;  %v1673_v24 = vld [vmem:[#allocation4 + $0x8] sm:$0xf]  ;;  %v2219_v25 = vld [vmem:[#allocation4 + $0x14] sm:$0xf0]  ;;  %v1666_v28 = vor.u32 %v2218_v20, %v1665_v19 }
  0x31   :  { %345 = vmatpush.bf16.msra.mxu2 %v1722_v58  ;;  %358 = vmatpush.bf16.msra.mxu3 %v1726_v62  ;;  %v2217_v26 = vld [vmem:[#allocation4 + $0xc] sm:$0xf]  ;;  %v1675_v27 = vld [vmem:[#allocation4 + $0x18] sm:$0xf0]  ;;  %v1670_v30 = vor.u32 %v2216_v21, %v1667_v23  ;;  %v1674_v31 = vor.u32 %v2219_v25, %v1673_v24  ;;  %v1853_v34 = vld [vmem:[#allocation6 + $0x70] sm:$0xf] }
  0x32   :  { %v117_v29 = vld [vmem:[#allocation2] sm:$0xff]  ;;  %v1678_v32 = vor.u32 %v2217_v26, %v1675_v27  ;;  %v1917_v36 = vld [vmem:[#allocation6 + $0xf0] sm:$0xf]  ;;  %v2600_v40 = vld [vmem:[#allocation10] sm:$0xff] }
  0x33   :  { %320 = vmatpush.bf16.msra.mxu0 %v1698_v4  ;;  %v150_v33 = vpack.c.bf16 %v117_v29, %v117_v29  ;;  %v2263_v35 = vld [vmem:[#allocation6 + $0x74] sm:$0xf0]  ;;  %v2602_v41 = vld [vmem:[#allocation10 + $0x8] sm:$0xff]  ;;  %v1845_v42 = vld [vmem:[#allocation6 + $0x60] sm:$0xf]  ;;  %v151_v51 = vperm.slane %v2600_v40, 0 }
  0x34   :  { %333 = vmatpush.bf16.msra.mxu1 %v1702_v5  ;;  %v1854_v37 = vor.u32 %v2263_v35, %v1853_v34  ;;  %v2279_v38 = vld [vmem:[#allocation6 + $0xf4] sm:$0xf0]  ;;  %v2261_v43 = vld [vmem:[#allocation6 + $0x64] sm:$0xf0]  ;;  %v1909_v44 = vld [vmem:[#allocation6 + $0xe0] sm:$0xf] }
  0x35   :  { %346 = vmatpush.bf16.msra.mxu2 %v1706_v6  ;;  %359 = vmatpush.bf16.msra.mxu3 %v1710_v10  ;;  %v1918_v39 = vor.u32 %v2279_v38, %v1917_v36  ;;  %v1846_v45 = vor.u32 %v2261_v43, %v1845_v42  ;;  %v2277_v46 = vld [vmem:[#allocation6 + $0xe4] sm:$0xf0]  ;;  %v1981_v48 = vld [vmem:[#allocation6 + $0x170] sm:$0xf]  ;;  %v2295_v49 = vld [vmem:[#allocation6 + $0x174] sm:$0xf0] }
  0x36   :  { %v1910_v47 = vor.u32 %v2277_v46, %v1909_v44  ;;  %v2045_v50 = vld [vmem:[#allocation6 + $0x1f0] sm:$0xf]  ;;  %v152_v52 = vperm.slane %v2602_v41, 0  ;;  %v1982_v53 = vor.u32 %v2295_v49, %v1981_v48  ;;  %v2311_v54 = vld [vmem:[#allocation6 + $0x1f4] sm:$0xf0] }
  0x37   :  { %321 = vmatpush.bf16.msra.mxu0 %v1682_v16  ;;  %v2046_v55 = vor.u32 %v2311_v54, %v2045_v50  ;;  %v1837_v56 = vld [vmem:[#allocation6 + $0x50] sm:$0xf]  ;;  %v2259_v57 = vld [vmem:[#allocation6 + $0x54] sm:$0xf0]  ;;  %v1973_v63 = vld [vmem:[#allocation6 + $0x160] sm:$0xf] }
  0x38   :  { %334 = vmatpush.bf16.msra.mxu1 %v1686_v17  ;;  %v1901_v58 = vld [vmem:[#allocation6 + $0xd0] sm:$0xf]  ;;  %v1838_v59 = vor.u32 %v2259_v57, %v1837_v56  ;;  %v2275_v60 = vld [vmem:[#allocation6 + $0xd4] sm:$0xf0]  ;;  %v2293_v0 = vld [vmem:[#allocation6 + $0x164] sm:$0xf0] }
  0x39   :  { %347 = vmatpush.bf16.msra.mxu2 %v1690_v18  ;;  %360 = vmatpush.bf16.msra.mxu3 %v1694_v22  ;;  %v1902_v62 = vor.u32 %v2275_v60, %v1901_v58  ;;  %v2037_v1 = vld [vmem:[#allocation6 + $0x1e0] sm:$0xf]  ;;  %v115_v4 = vld [vmem:[#allocation10 + $0x10] sm:$0xff]  ;;  %v116_v5 = vld [vmem:[#allocation10 + $0x18] sm:$0xff]  ;;  %v1974_v6 = vor.u32 %v2293_v0, %v1973_v63 }
  0x3a   :  { %v2309_v7 = vld [vmem:[#allocation6 + $0x1e4] sm:$0xf0]  ;;  %v1829_v10 = vld [vmem:[#allocation6 + $0x40] sm:$0xf]  ;;  %v153_v17 = vperm.slane %v115_v4, 0  ;;  %v154_v18 = vperm.slane %v116_v5, 0 }
  0x3b   :  { %322 = vmatpush.bf16.msra.mxu0 %v1666_v28  ;;  %v2038_v9 = vor.u32 %v2309_v7, %v2037_v1  ;;  %v2257_v11 = vld [vmem:[#allocation6 + $0x44] sm:$0xf0]  ;;  %v1893_v12 = vld [vmem:[#allocation6 + $0xc0] sm:$0xf]  ;;  %v1965_v20 = vld [vmem:[#allocation6 + $0x150] sm:$0xf] }
  0x3c   :  { %335 = vmatpush.bf16.msra.mxu1 %v1670_v30  ;;  %v1830_v14 = vor.u32 %v2257_v11, %v1829_v10  ;;  %v2273_v15 = vld [vmem:[#allocation6 + $0xc4] sm:$0xf0]  ;;  %v2291_v22 = vld [vmem:[#allocation6 + $0x154] sm:$0xf0]  ;;  %v2029_v23 = vld [vmem:[#allocation6 + $0x1d0] sm:$0xf] }
  0x3d   :  { %348 = vmatpush.bf16.msra.mxu2 %v1674_v31  ;;  %361 = vmatpush.bf16.msra.mxu3 %v1678_v32  ;;  %v1894_v19 = vor.u32 %v2273_v15, %v1893_v12  ;;  %v2307_v24 = vld [vmem:[#allocation6 + $0x1d4] sm:$0xf0]  ;;  %v1966_v26 = vor.u32 %v2291_v22, %v1965_v20  ;;  %v1821_v28 = vld [vmem:[#allocation6 + $0x30] sm:$0xf]  ;;  %v1957_v42 = vld [vmem:[#allocation6 + $0x140] sm:$0xf] }
  0x3e   :  { %323 = vmatmul.bf16.vlgmr.msra.gmra.mxu0 %v150_v33  ;;  %v2030_v27 = vor.u32 %v2307_v24, %v2029_v23  ;;  %v2255_v29 = vld [vmem:[#allocation6 + $0x34] sm:$0xf0]  ;;  %v1885_v30 = vld [vmem:[#allocation6 + $0xb0] sm:$0xf]  ;;  %v2289_v43 = vld [vmem:[#allocation6 + $0x144] sm:$0xf0] }
  0x3f   :  { %336 = vmatmul.bf16.vlgmr.msra.gmra.mxu1 %v150_v33  ;;  %933 = vmatpush.bf16.msrb.mxu0 %v1854_v37  ;;  %v2271_v34 = vld [vmem:[#allocation6 + $0xb4] sm:$0xf0]  ;;  %v1958_v48 = vor.u32 %v2289_v43, %v1957_v42  ;;  %v1877_v4 = vld [vmem:[#allocation6 + $0xa0] sm:$0xf]  ;;  %v2269_v5 = vld [vmem:[#allocation6 + $0xa4] sm:$0xf0] }
  0x40   :  { %349 = vmatmul.bf16.vlgmr.msra.gmra.mxu2 %v150_v33  ;;  %362 = vmatmul.bf16.vlgmr.msra.gmra.mxu3 %v150_v33  ;;  %v1822_v33 = vor.u32 %v2255_v29, %v1821_v28  ;;  %v2287_v24 = vld [vmem:[#allocation6 + $0x134] sm:$0xf0]  ;;  %v2013_v29 = vld [vmem:[#allocation6 + $0x1b0] sm:$0xf] }
  0x41   :  { %946 = vmatpush.bf16.msrb.mxu1 %v1918_v39  ;;  %959 = vmatpush.bf16.msrb.mxu2 %v1982_v53  ;;  %v1886_v39 = vor.u32 %v2271_v34, %v1885_v30  ;;  %v2303_v30 = vld [vmem:[#allocation6 + $0x1b4] sm:$0xf0] }
  0x42   :  { %972 = vmatpush.bf16.msrb.mxu3 %v2046_v55 }
  0x43   :  { %934 = vmatpush.bf16.msrb.mxu0 %v1846_v45 }
  0x45   :  { %947 = vmatpush.bf16.msrb.mxu1 %v1910_v47  ;;  %960 = vmatpush.bf16.msrb.mxu2 %v1974_v6 }
  0x46   :  { %973 = vmatpush.bf16.msrb.mxu3 %v2038_v9 }
  0x47   :  { %935 = vmatpush.bf16.msrb.mxu0 %v1838_v59 }
  0x49   :  { %948 = vmatpush.bf16.msrb.mxu1 %v1902_v62  ;;  %961 = vmatpush.bf16.msrb.mxu2 %v1966_v26  ;;  %v1813_v62 = vld [vmem:[#allocation6 + $0x20] sm:$0xf] }
  0x4a   :  { %974 = vmatpush.bf16.msrb.mxu3 %v2030_v27 }
  0x4b   :  { %936 = vmatpush.bf16.msrb.mxu0 %v1830_v14 }
  0x4d   :  { %949 = vmatpush.bf16.msrb.mxu1 %v1894_v19  ;;  %962 = vmatpush.bf16.msrb.mxu2 %v1958_v48  ;;  %v1949_v19 = vld [vmem:[#allocation6 + $0x130] sm:$0xf] }
  0x4e   :  { %v1950_v28 = vor.u32 %v2287_v24, %v1949_v19  ;;  %v1805_v48 = vld [vmem:[#allocation6 + $0x10] sm:$0xf] }
  0x4f   :  { %937 = vmatpush.bf16.msrb.mxu0 %v1822_v33 }
  0x51   :  { %950 = vmatpush.bf16.msrb.mxu1 %v1886_v39  ;;  %963 = vmatpush.bf16.msrb.mxu2 %v1950_v28 }
  0xbb   :  { %v324_v61 = vpop.f32.mrf.mxu0 }
  0xbc   :  { %v2606_v2 = vadd.f32 %v324_v61, %v151_v51  ;;  %v337_v3 = vpop.f32.mrf.mxu1  ;;  %v2021_v51 = vld [vmem:[#allocation6 + $0x1c0] sm:$0xf]  ;;  %v2305_v61 = vld [vmem:[#allocation6 + $0x1c4] sm:$0xf0] }
  0xbd   :  { %v2608_v8 = vadd.f32 %v337_v3, %v152_v52  ;;  %v2022_v1 = vor.u32 %v2305_v61, %v2021_v51  ;;  %v2253_v3 = vld [vmem:[#allocation6 + $0x24] sm:$0xf0] }
  0xbe   :  { %v2611_v13 = vmul.f32 0.70710677, %v2606_v2 }
  0xbf   :  { %v2614_v16 = vmul.f32 0.70710677, %v2608_v8  ;;  %975 = vmatpush.bf16.msrb.mxu3 %v2022_v1 }
  0xc0   :  { %v375_v21 = vmul.f32 %v2611_v13, %v2611_v13 }
  0xc1   :  { %v415_v25 = vmul.f32 %v2614_v16, %v2614_v16 }
  0xc2   :  { %v2620_v31 = vmin.f32 %v375_v21, 16.0 }
  0xc3   :  { %v350_v32 = vpop.f32.mrf.mxu2  ;;  %v2622_v35 = vmin.f32 %v415_v25, 16.0  ;;  %v363_v37 = vpop.f32.mrf.mxu3 }
  0xc4   :  { %v2624_v36 = vadd.f32 %v350_v32, %v153_v17  ;;  %v326_v38 = vpop.f32.mrf.mxu0  ;;  %v377_v44 = vmul.f32 2.1237322e-06, %v2620_v31  ;;  %v388_v45 = vmul.f32 3.8918573e-05, %v2620_v31  ;;  %v2628_v46 = vadd.f32 %v363_v37, %v154_v18  ;;  %v339_v47 = vpop.f32.mrf.mxu1 }
  0xc5   :  { %v417_v49 = vmul.f32 2.1237322e-06, %v2622_v35  ;;  %v428_v50 = vmul.f32 3.8918573e-05, %v2622_v35  ;;  %v1814_v17 = vor.u32 %v2253_v3, %v1813_v62  ;;  %v1878_v18 = vor.u32 %v2269_v5, %v1877_v4 }
  0xc6   :  { %v378_v52 = vadd.f32 0.00028619796, %v377_v44  ;;  %v389_v53 = vadd.f32 0.001143296, %v388_v45  ;;  %v2633_v54 = vmul.f32 0.70710677, %v2624_v36  ;;  %v2014_v37 = vor.u32 %v2303_v30, %v2013_v29 }
  0xc7   :  { %v418_v55 = vadd.f32 0.00028619796, %v417_v49  ;;  %v429_v56 = vadd.f32 0.001143296, %v428_v50  ;;  %v2640_v60 = vmul.f32 0.70710677, %v2628_v46  ;;  %938 = vmatpush.bf16.msrb.mxu0 %v1814_v17  ;;  %951 = vmatpush.bf16.msrb.mxu1 %v1878_v18 }
  0xc8   :  { %v379_v57 = vmul.f32 %v378_v52, %v2620_v31  ;;  %v390_v58 = vmul.f32 %v389_v53, %v2620_v31  ;;  %v455_v59 = vmul.f32 %v2633_v54, %v2633_v54  ;;  %976 = vmatpush.bf16.msrb.mxu3 %v2014_v37  ;;  %v2251_v49 = vld [vmem:[#allocation6 + $0x14] sm:$0xf0]  ;;  %v2676_v17 = vmul.f32 0.5, %v2608_v8  ;;  %v2301_v8 = vld [vmem:[#allocation6 + $0x1a4] sm:$0xf0] }
  0xc9   :  { %v419_v63 = vmul.f32 %v418_v55, %v2622_v35  ;;  %v430_v0 = vmul.f32 %v429_v56, %v2622_v35  ;;  %v495_v10 = vmul.f32 %v2640_v60, %v2640_v60  ;;  %v1869_v55 = vld [vmem:[#allocation6 + $0x90] sm:$0xf]  ;;  %v2267_v56 = vld [vmem:[#allocation6 + $0x94] sm:$0xf0]  ;;  %v1806_v61 = vor.u32 %v2251_v49, %v1805_v48  ;;  %v1797_v29 = vld [vmem:[#allocation6] sm:$0xf] }
  0xca   :  { %v380_v6 = vadd.f32 0.0036580483, %v379_v57  ;;  %v391_v7 = vadd.f32 0.014752088, %v390_v58  ;;  %v2644_v9 = vmin.f32 %v455_v59, 16.0  ;;  %v1870_v1 = vor.u32 %v2267_v56, %v1869_v55 }
  0xcb   :  { %v352_v11 = vpop.f32.mrf.mxu2  ;;  %v420_v12 = vadd.f32 0.0036580483, %v419_v63  ;;  %v431_v14 = vadd.f32 0.014752088, %v430_v0  ;;  %v365_v15 = vpop.f32.mrf.mxu3  ;;  %v2654_v27 = vmin.f32 %v495_v10, 16.0  ;;  %939 = vmatpush.bf16.msrb.mxu0 %v1806_v61  ;;  %v2689_v28 = vmul.f32 0.5, %v2624_v36 }
  0xcc   :  { %v381_v20 = vmul.f32 %v380_v6, %v2620_v31  ;;  %v392_v21 = vmul.f32 %v391_v7, %v2620_v31  ;;  %v457_v22 = vmul.f32 2.1237322e-06, %v2644_v9  ;;  %v468_v23 = vmul.f32 3.8918573e-05, %v2644_v9  ;;  %952 = vmatpush.bf16.msrb.mxu1 %v1870_v1  ;;  %v2249_v30 = vld [vmem:[#allocation6 + $0x4] sm:$0xf0] }
  0xcd   :  { %v421_v25 = vmul.f32 %v420_v12, %v2622_v35  ;;  %v432_v26 = vmul.f32 %v431_v14, %v2622_v35  ;;  %v497_v47 = vmul.f32 2.1237322e-06, %v2654_v27  ;;  %v508_v53 = vmul.f32 3.8918573e-05, %v2654_v27  ;;  %v2265_v37 = vld [vmem:[#allocation6 + $0x84] sm:$0xf0] }
  0xce   :  { %v382_v32 = vadd.f32 0.05243302, %v381_v20  ;;  %v393_v33 = vadd.f32 0.112945676, %v392_v21  ;;  %v458_v34 = vadd.f32 0.00028619796, %v457_v22  ;;  %v1798_v56 = vor.u32 %v2249_v30, %v1797_v29 }
  0xcf   :  { %v422_v38 = vadd.f32 0.05243302, %v421_v25  ;;  %v433_v39 = vadd.f32 0.112945676, %v432_v26  ;;  %v469_v42 = vadd.f32 0.001143296, %v468_v23 }
  0xd0   :  { %v383_v43 = vmul.f32 %v382_v32, %v2620_v31  ;;  %v394_v44 = vmul.f32 %v393_v33, %v2620_v31  ;;  %v459_v45 = vmul.f32 %v458_v34, %v2644_v9  ;;  %v498_v6 = vadd.f32 0.00028619796, %v497_v47  ;;  %v1941_v21 = vld [vmem:[#allocation6 + $0x120] sm:$0xf]  ;;  %v2285_v22 = vld [vmem:[#allocation6 + $0x124] sm:$0xf0]  ;;  %940 = vmatpush.bf16.msrb.mxu0 %v1798_v56 }
  0xd1   :  { %v423_v50 = vmul.f32 %v422_v38, %v2622_v35  ;;  %v434_v51 = vmul.f32 %v433_v39, %v2622_v35  ;;  %v470_v52 = vmul.f32 %v469_v42, %v2644_v9  ;;  %v509_v12 = vadd.f32 0.001143296, %v508_v53  ;;  %v2005_v25 = vld [vmem:[#allocation6 + $0x1a0] sm:$0xf]  ;;  %v1855_v48 = vld [vmem:[#allocation6 + $0x78] sm:$0xf0] }
  0xd2   :  { %v384_v57 = vadd.f32 0.18741608, %v383_v43  ;;  %v395_v58 = vadd.f32 0.4994258, %v394_v44  ;;  %v460_v59 = vadd.f32 0.0036580483, %v459_v45  ;;  %v499_v20 = vmul.f32 %v498_v6, %v2654_v27 }
  0xd3   :  { %v424_v62 = vadd.f32 0.18741608, %v423_v50  ;;  %v435_v63 = vadd.f32 0.4994258, %v434_v51  ;;  %v471_v0 = vadd.f32 0.014752088, %v470_v52  ;;  %v1942_v47 = vor.u32 %v2285_v22, %v1941_v21 }
  0xd4   :  { %v385_v3 = vmul.f32 %v384_v57, %v2620_v31  ;;  %v396_v4 = vmul.f32 %v395_v58, %v2620_v31  ;;  %v461_v5 = vmul.f32 %v460_v59, %v2644_v9  ;;  %v2671_v14 = vmul.f32 0.5, %v2606_v2  ;;  %v1861_v34 = vld [vmem:[#allocation6 + $0x80] sm:$0xf]  ;;  %v2262_v43 = vld [vmem:[#allocation6 + $0x74] sm:$0xf] }
  0xd5   :  { %v425_v7 = vmul.f32 %v424_v62, %v2622_v35  ;;  %v436_v10 = vmul.f32 %v435_v63, %v2622_v35  ;;  %v472_v11 = vmul.f32 %v471_v0, %v2644_v9  ;;  %v510_v35 = vmul.f32 %v509_v12, %v2654_v27  ;;  %964 = vmatpush.bf16.msrb.mxu2 %v1942_v47  ;;  %v2278_v58 = vld [vmem:[#allocation6 + $0xf4] sm:$0xf]  ;;  %v1919_v59 = vld [vmem:[#allocation6 + $0xf8] sm:$0xf0]  ;;  %v2276_v29 = vld [vmem:[#allocation6 + $0xe4] sm:$0xf] }
  0xd6   :  { %v2673_v15 = vadd.f32 1.0, %v396_v4  ;;  %v462_v31 = vadd.f32 0.05243302, %v461_v5  ;;  %v386_v23 = vadd.f32 1.1283791, %v385_v3  ;;  %v2006_v52 = vor.u32 %v2301_v8, %v2005_v25 }
  0xd7   :  { %v2678_v18 = vadd.f32 1.0, %v436_v10  ;;  %v473_v19 = vadd.f32 0.112945676, %v472_v11  ;;  %v2684_v24 = vadd.f32 1.1283791, %v425_v7  ;;  %v1862_v57 = vor.u32 %v2265_v37, %v1861_v34 }
  0xd8   :  { %2364 = vrcp.f32 %v2673_v15  ;;  %v407_v2 = vand.u32 2147483647, %v2673_v15  ;;  %v409_v26 = vand.u32 2147483648, %v2673_v15  ;;  %v463_v33 = vmul.f32 %v462_v31, %v2644_v9  ;;  %977 = vmatpush.bf16.msrb.mxu3 %v2006_v52  ;;  %v1933_v4 = vld [vmem:[#allocation6 + $0x110] sm:$0xf] }
  0xd9   :  { %2366 = vrcp.f32 %v2678_v18  ;;  %v447_v32 = vand.u32 2147483647, %v2678_v18  ;;  %v474_v38 = vmul.f32 %v473_v19, %v2644_v9  ;;  %v500_v39 = vadd.f32 0.0036580483, %v499_v20  ;;  %v2283_v5 = vld [vmem:[#allocation6 + $0x114] sm:$0xf0]  ;;  %953 = vmatpush.bf16.msrb.mxu1 %v1862_v57 }
  0xda   :  { %v511_v42 = vadd.f32 0.014752088, %v510_v35  ;;  %v2695_v44 = vmul.f32 %v386_v23, %v2611_v13  ;;  %v449_v45 = vand.u32 2147483648, %v2678_v18  ;;  %v464_v36 = vadd.f32 0.18741608, %v463_v33 }
  0xdb   :  { %v475_v49 = vadd.f32 0.4994258, %v474_v38  ;;  %v501_v50 = vmul.f32 %v500_v39, %v2654_v27  ;;  %v2702_v55 = vor.u32 1.1754944e-38, %v409_v26  ;;  %v1858_v13 = vor.u32 %v2262_v43, %v1855_v48  ;;  %v1997_v20 = vld [vmem:[#allocation6 + $0x190] sm:$0xf] }
  0xdc   :  { %v512_v51 = vmul.f32 %v511_v42, %v2654_v27  ;;  %vm2708_vm0 = vcmp.eq.f32.partialorder %v407_v2, 8.507059e+37  ;;  %v465_v0 = vmul.f32 %v464_v36, %v2644_v9  ;;  %vm2716_vm1 = vcmp.eq.f32.partialorder %v447_v32, 8.507059e+37  ;;  %v2299_v35 = vld [vmem:[#allocation6 + $0x194] sm:$0xf0]  ;;  %v2260_v2 = vld [vmem:[#allocation6 + $0x64] sm:$0xf] }
  0xdd   :  { %v476_v1 = vmul.f32 %v475_v49, %v2644_v9  ;;  %v502_v3 = vadd.f32 0.05243302, %v501_v50  ;;  %v450_v10 = vor.u32 1.1754944e-38, %v449_v45  ;;  %985 = vmatpush.bf16.msra.mxu0 %v1858_v13  ;;  %v1922_v19 = vor.u32 %v2278_v58, %v1919_v59  ;;  %v1847_v25 = vld [vmem:[#allocation6 + $0x68] sm:$0xf0] }
  0xde   :  { %v2700_v53 = vpop.eup %2364  ;;  %v513_v11 = vadd.f32 0.112945676, %v512_v51  ;;  %v1934_v23 = vor.u32 %v2283_v5, %v1933_v4  ;;  %v2727_v26 = vadd.f32 1.1283791, %v465_v0  ;;  %v1911_v30 = vld [vmem:[#allocation6 + $0xe8] sm:$0xf0]  ;;  %vm403_vm4 = vweird.f32 %v2673_v15 }
  0xdf   :  { %v2704_v61 = vpop.eup %2366  ;;  %v399_v62 = vmul.f32 %v2700_v53, %v2673_v15  ;;  %v2720_v31 = vadd.f32 1.0, %v476_v1  ;;  %v503_v9 = vmul.f32 %v502_v3, %v2654_v27  ;;  %vm404_vm2 = vweird.f32 %v2700_v53  ;;  %998 = vmatpush.bf16.msra.mxu1 %v1922_v19  ;;  %v1925_v34 = vld [vmem:[#allocation6 + $0x100] sm:$0xf]  ;;  %v2281_v37 = vld [vmem:[#allocation6 + $0x104] sm:$0xf0] }
  0xe0   :  { %v439_v6 = vmul.f32 %v2704_v61, %v2678_v18  ;;  %v514_v22 = vmul.f32 %v513_v11, %v2654_v27  ;;  %vm444_vm3 = vweird.f32 %v2704_v61  ;;  %vm443_vm5 = vweird.f32 %v2678_v18  ;;  %965 = vmatpush.bf16.msrb.mxu2 %v1934_v23  ;;  %vm2736_vm6 = vmor %vm403_vm4, %vm404_vm2  ;;  %v1989_v49 = vld [vmem:[#allocation6 + $0x180] sm:$0xf]  ;;  %v2297_v50 = vld [vmem:[#allocation6 + $0x184] sm:$0xf0] }
  0xe1   :  { %v400_v12 = vsub.f32 1.0, %v399_v62  ;;  %2368 = vrcp.f32 %v2720_v31  ;;  %v504_v42 = vadd.f32 0.18741608, %v503_v9  ;;  %v1998_v43 = vor.u32 %v2299_v35, %v1997_v20  ;;  %vm2745_vm7 = vmor %vm443_vm5, %vm444_vm3  ;;  %v2294_v52 = vld [vmem:[#allocation6 + $0x174] sm:$0xf] }
  0xe2   :  { %v440_v21 = vsub.f32 1.0, %v439_v6  ;;  %v515_v33 = vadd.f32 0.4994258, %v514_v22  ;;  %v1850_v45 = vor.u32 %v2260_v2, %v1847_v25  ;;  %v427_v15 = vmul.f32 %v2684_v24, %v2614_v16  ;;  %v1983_v56 = vld [vmem:[#allocation6 + $0x178] sm:$0xf0] }
  0xe3   :  { %v401_v8 = vmul.f32 %v2700_v53, %v400_v12  ;;  %v487_v47 = vand.u32 2147483647, %v2720_v31  ;;  %978 = vmatpush.bf16.msrb.mxu3 %v1998_v43  ;;  %v1914_v16 = vor.u32 %v2276_v29, %v1911_v30  ;;  %v1926_v24 = vor.u32 %v2281_v37, %v1925_v34  ;;  %v2310_v57 = vld [vmem:[#allocation6 + $0x1f4] sm:$0xf]  ;;  %v1839_v63 = vld [vmem:[#allocation6 + $0x58] sm:$0xf0] }
  0xe4   :  { %v441_v32 = vmul.f32 %v2704_v61, %v440_v21  ;;  %v516_v48 = vmul.f32 %v515_v33, %v2654_v27  ;;  %986 = vmatpush.bf16.msra.mxu0 %v1850_v45  ;;  %v489_v59 = vand.u32 2147483648, %v2720_v31  ;;  %v2258_v0 = vld [vmem:[#allocation6 + $0x54] sm:$0xf]  ;;  %v505_v4 = vmul.f32 %v504_v42, %v2654_v27  ;;  %v1903_v6 = vld [vmem:[#allocation6 + $0xd8] sm:$0xf0] }
  0xe5   :  { %v402_v38 = vadd.f32 %v2700_v53, %v401_v8  ;;  %999 = vmatpush.bf16.msra.mxu1 %v1914_v16  ;;  %966 = vmatpush.bf16.msrb.mxu2 %v1926_v24  ;;  %v2274_v5 = vld [vmem:[#allocation6 + $0xd4] sm:$0xf]  ;;  %v2292_v12 = vld [vmem:[#allocation6 + $0x164] sm:$0xf]  ;;  %v1975_v9 = vld [vmem:[#allocation6 + $0x168] sm:$0xf0]  ;;  %v1986_v21 = vor.u32 %v2294_v52, %v1983_v56  ;;  %v1842_v23 = vor.u32 %v2258_v0, %v1839_v63  ;;  %vm483_vm9 = vweird.f32 %v2720_v31 }
  0xe6   :  { %v442_v18 = vadd.f32 %v2704_v61, %v441_v32  ;;  %v2761_v62 = vadd.f32 1.0, %v516_v48  ;;  %v2308_v19 = vld [vmem:[#allocation6 + $0x1e4] sm:$0xf]  ;;  %v2039_v7 = vld [vmem:[#allocation6 + $0x1e8] sm:$0xf0]  ;;  %v1906_v29 = vor.u32 %v2274_v5, %v1903_v6  ;;  %v1978_v34 = vor.u32 %v2292_v12, %v1975_v9 }
  0xe7   :  { %v406_v51 = vsel %vm2736_vm6, %v2700_v53, %v402_v38  ;;  %v2047_v53 = vld [vmem:[#allocation6 + $0x1f8] sm:$0xf0]  ;;  %v2763_v1 = vpop.eup %2368  ;;  %v2256_v27 = vld [vmem:[#allocation6 + $0x44] sm:$0xf]  ;;  %v1895_v25 = vld [vmem:[#allocation6 + $0xc8] sm:$0xf0]  ;;  %v2042_v37 = vor.u32 %v2308_v19, %v2039_v7 }
  0xe8   :  { %v411_v13 = vsel %vm2708_vm0, %v2702_v55, %v406_v51  ;;  %v446_v58 = vsel %vm2745_vm7, %v2704_v61, %v442_v18  ;;  %v1990_v55 = vor.u32 %v2297_v50, %v1989_v49  ;;  %v479_v11 = vmul.f32 %v2763_v1, %v2720_v31  ;;  %v2272_v2 = vld [vmem:[#allocation6 + $0xc4] sm:$0xf]  ;;  %v2290_v30 = vld [vmem:[#allocation6 + $0x154] sm:$0xf]  ;;  %v1967_v32 = vld [vmem:[#allocation6 + $0x158] sm:$0xf0]  ;;  %987 = vmatpush.bf16.msra.mxu0 %v1842_v23 }
  0xe9   :  { %v451_v3 = vsel %vm2716_vm1, %v450_v10, %v446_v58  ;;  %v412_v61 = vmul.f32 %v411_v13, %v2695_v44  ;;  %2370 = vrcp.f32 %v2761_v62  ;;  %v1831_v10 = vld [vmem:[#allocation6 + $0x48] sm:$0xf0]  ;;  %v2050_v22 = vor.u32 %v2310_v57, %v2047_v53  ;;  %1011 = vmatpush.bf16.msra.mxu2 %v1986_v21  ;;  %v2306_v38 = vld [vmem:[#allocation6 + $0x1d4] sm:$0xf]  ;;  %v2031_v39 = vld [vmem:[#allocation6 + $0x1d8] sm:$0xf0]  ;;  %1000 = vmatpush.bf16.msra.mxu1 %v1906_v29 }
  0xea   :  { %v452_v20 = vmul.f32 %v451_v3, %v427_v15  ;;  %979 = vmatpush.bf16.msrb.mxu3 %v1990_v55  ;;  %v480_v35 = vsub.f32 1.0, %v479_v11  ;;  %v467_v44 = vmul.f32 %v2727_v26, %v2633_v54  ;;  %vm484_vm8 = vweird.f32 %v2763_v1  ;;  %v2254_v48 = vld [vmem:[#allocation6 + $0x34] sm:$0xf]  ;;  %v1823_v49 = vld [vmem:[#allocation6 + $0x38] sm:$0xf0] }
  0xeb   :  { %v2775_v8 = vadd.f32 1.1283791, %v505_v4  ;;  %v1791_v42 = vclamps-f32 %v412_v61, 1.0  ;;  %v527_v43 = vand.u32 2147483647, %v2761_v62  ;;  %v1834_v54 = vor.u32 %v2256_v27, %v1831_v10  ;;  %vm485_vm11 = vmor %vm483_vm9, %vm484_vm8 }
  0xec   :  { %v481_v33 = vmul.f32 %v2763_v1, %v480_v35  ;;  %v1898_v26 = vor.u32 %v2272_v2, %v1895_v25  ;;  %v1792_v45 = vclamps-f32 %v452_v20, 1.0  ;;  %vm2783_vm10 = vcmp.eq.f32.partialorder %v487_v47, 8.507059e+37  ;;  %v2270_v56 = vld [vmem:[#allocation6 + $0xb4] sm:$0xf]  ;;  %v1887_v57 = vld [vmem:[#allocation6 + $0xb8] sm:$0xf0] }
  0xed   :  { %v535_v36 = vadd.f32 1.0, %v1791_v42  ;;  %v490_v51 = vor.u32 1.1754944e-38, %v489_v59  ;;  %v1970_v16 = vor.u32 %v2290_v30, %v1967_v32  ;;  %v2034_v24 = vor.u32 %v2306_v38, %v2031_v39  ;;  %1012 = vmatpush.bf16.msra.mxu2 %v1978_v34  ;;  %v2288_v53 = vld [vmem:[#allocation6 + $0x144] sm:$0xf]  ;;  %988 = vmatpush.bf16.msra.mxu0 %v1834_v54  ;;  %v1959_v4 = vld [vmem:[#allocation6 + $0x148] sm:$0xf0] }
  0xee   :  { %1024 = vmatpush.bf16.msra.mxu3 %v2050_v22  ;;  %v482_v15 = vadd.f32 %v2763_v1, %v481_v33  ;;  %v536_v52 = vadd.f32 1.0, %v1792_v45  ;;  %v529_v13 = vand.u32 2147483648, %v2761_v62  ;;  %1001 = vmatpush.bf16.msra.mxu1 %v1898_v26  ;;  %v1826_v3 = vor.u32 %v2254_v48, %v1823_v49  ;;  %v2023_v55 = vld [vmem:[#allocation6 + $0x1c8] sm:$0xf0]  ;;  %v2252_v11 = vld [vmem:[#allocation6 + $0x24] sm:$0xf] }
  0xef   :  { %v2787_v50 = vpop.eup %2370  ;;  %v539_v58 = vmul.f32 %v535_v36, %v2671_v14  ;;  %v1890_v61 = vor.u32 %v2270_v56, %v1887_v57  ;;  %v1815_v12 = vld [vmem:[#allocation6 + $0x28] sm:$0xf0]  ;;  %v2268_v9 = vld [vmem:[#allocation6 + $0xa4] sm:$0xf]  ;;  %v2286_v10 = vld [vmem:[#allocation6 + $0x134] sm:$0xf]  ;;  %vm523_vm13 = vweird.f32 %v2761_v62  ;;  %v507_v32 = vmul.f32 %v2775_v8, %v2640_v60 }
  0xf0   :  { %v486_v31 = vsel %vm485_vm11, %v2763_v1, %v482_v15  ;;  %v519_v47 = vmul.f32 %v2787_v50, %v2761_v62  ;;  %v540_v0 = vmul.f32 %v536_v52, %v2676_v17  ;;  %v2304_v1 = vld [vmem:[#allocation6 + $0x1c4] sm:$0xf]  ;;  %vm524_vm12 = vweird.f32 %v2787_v50  ;;  %v1879_v19 = vld [vmem:[#allocation6 + $0xa8] sm:$0xf0]  ;;  %v1951_v35 = vld [vmem:[#allocation6 + $0x138] sm:$0xf0] }
  0xf1   :  { %v491_v59 = vsel %vm2783_vm10, %v490_v51, %v486_v31  ;;  %v2799_v6 = vpack.c.bf16 %v539_v58, %v539_v58  ;;  %1013 = vmatpush.bf16.msra.mxu2 %v1970_v16  ;;  %v1962_v17 = vor.u32 %v2288_v53, %v1959_v4  ;;  %v2026_v7 = vor.u32 %v2304_v1, %v2023_v55  ;;  %v2302_v21 = vld [vmem:[#allocation6 + $0x1b4] sm:$0xf]  ;;  %v2015_v22 = vld [vmem:[#allocation6 + $0x1b8] sm:$0xf0]  ;;  %vm525_vm14 = vmor %vm523_vm13, %vm524_vm12 }
  0xf2   :  { %1025 = vmatpush.bf16.msra.mxu3 %v2042_v37  ;;  %v492_v63 = vmul.f32 %v491_v59, %v467_v44  ;;  %v520_v5 = vsub.f32 1.0, %v519_v47  ;;  %v2802_v14 = vpack.c.bf16 %v540_v0, %v540_v0  ;;  %989 = vmatpush.bf16.msra.mxu0 %v1826_v3  ;;  %v1818_v2 = vor.u32 %v2252_v11, %v1815_v12  ;;  %v2250_v29 = vld [vmem:[#allocation6 + $0x14] sm:$0xf]  ;;  %v1807_v30 = vld [vmem:[#allocation6 + $0x18] sm:$0xf0] }
  0xf3   :  { %941 = vmatmul.bf16.vlgmr.msrb.gmra.mxu0 %v2799_v6  ;;  %1002 = vmatpush.bf16.msra.mxu1 %v1890_v61  ;;  %v1882_v25 = vor.u32 %v2268_v9, %v1879_v19  ;;  %v530_v33 = vor.u32 1.1754944e-38, %v529_v13  ;;  %v2266_v34 = vld [vmem:[#allocation6 + $0x94] sm:$0xf]  ;;  %v1871_v37 = vld [vmem:[#allocation6 + $0x98] sm:$0xf0]  ;;  %vm528_vm15 = vcmp.eq.f32.partialorder %v527_v43, 8.507059e+37  ;;  %v2018_v42 = vor.u32 %v2302_v21, %v2015_v22 }
  0xf4   :  { %v521_v20 = vmul.f32 %v2787_v50, %v520_v5  ;;  %v1793_v27 = vclamps-f32 %v492_v63, 1.0  ;;  %954 = vmatmul.bf16.vlgmr.msrb.gmra.mxu1 %v2802_v14  ;;  %v1954_v60 = vor.u32 %v2286_v10, %v1951_v35  ;;  %v1810_v8 = vor.u32 %v2250_v29, %v1807_v30  ;;  %v2300_v26 = vld [vmem:[#allocation6 + $0x1a4] sm:$0xf]  ;;  %v2007_v45 = vld [vmem:[#allocation6 + $0x1a8] sm:$0xf0]  ;;  %v2318_v22 = vld [vmem:[#allocation7 + $0x30] sm:$0xff] }
  0xf5   :  { %1014 = vmatpush.bf16.msra.mxu2 %v1962_v17  ;;  %v1874_v36 = vor.u32 %v2266_v34, %v1871_v37  ;;  %v2284_v48 = vld [vmem:[#allocation6 + $0x124] sm:$0xf]  ;;  %v1943_v49 = vld [vmem:[#allocation6 + $0x128] sm:$0xf0]  ;;  %v2282_v52 = vld [vmem:[#allocation6 + $0x114] sm:$0xf] }
  0xf6   :  { %1026 = vmatpush.bf16.msra.mxu3 %v2034_v24  ;;  %v522_v23 = vadd.f32 %v2787_v50, %v521_v20  ;;  %v537_v44 = vadd.f32 1.0, %v1793_v27  ;;  %990 = vmatpush.bf16.msra.mxu0 %v1818_v2  ;;  %v1799_v62 = vld [vmem:[#allocation6 + $0x8] sm:$0xf0]  ;;  %v2264_v43 = vld [vmem:[#allocation6 + $0x84] sm:$0xf]  ;;  %v1946_v24 = vor.u32 %v2284_v48, %v1943_v49  ;;  %v370_v57 = vmul.f32 0.5, %v2628_v46 }
  0xf7   :  { %1003 = vmatpush.bf16.msra.mxu1 %v1882_v25  ;;  %v1863_v51 = vld [vmem:[#allocation6 + $0x88] sm:$0xf0]  ;;  %v1935_v56 = vld [vmem:[#allocation6 + $0x118] sm:$0xf0]  ;;  %v2298_v58 = vld [vmem:[#allocation6 + $0x194] sm:$0xf] }
  0xf8   :  { %v526_v38 = vsel %vm525_vm14, %v2787_v50, %v522_v23  ;;  %v541_v39 = vmul.f32 %v537_v44, %v2689_v28  ;;  %v2248_v50 = vld [vmem:[#allocation6 + $0x4] sm:$0xf]  ;;  %v2010_v28 = vor.u32 %v2300_v26, %v2007_v45  ;;  %v1866_v13 = vor.u32 %v2264_v43, %v1863_v51  ;;  %v1999_v53 = vld [vmem:[#allocation6 + $0x198] sm:$0xf0]  ;;  %v1927_v55 = vld [vmem:[#allocation6 + $0x108] sm:$0xf0] }
  0xf9   :  { %v531_v54 = vsel %vm528_vm15, %v530_v33, %v526_v38  ;;  %1015 = vmatpush.bf16.msra.mxu2 %v1954_v60  ;;  %v1802_v47 = vor.u32 %v2248_v50, %v1799_v62  ;;  %v1938_v0 = vor.u32 %v2282_v52, %v1935_v56  ;;  %v2002_v3 = vor.u32 %v2298_v58, %v1999_v53  ;;  %v2280_v4 = vld [vmem:[#allocation6 + $0x104] sm:$0xf]  ;;  %v1991_v5 = vld [vmem:[#allocation6 + $0x188] sm:$0xf0]  ;;  %v2319_v27 = vld [vmem:[#allocation7 + $0x38] sm:$0xff] }
  0xfa   :  { %1027 = vmatpush.bf16.msra.mxu3 %v2026_v7  ;;  %v532_v15 = vmul.f32 %v531_v54, %v507_v32  ;;  %v609_v18 = vpack.c.bf16 %v541_v39, %v541_v39  ;;  %991 = vmatpush.bf16.msra.mxu0 %v1810_v8  ;;  %v2296_v63 = vld [vmem:[#allocation6 + $0x184] sm:$0xf]  ;;  %v1930_v46 = vor.u32 %v2280_v4, %v1927_v55  ;;  %v611_v9 = vperm.slane %v2600_v40, 1  ;;  %v2317_v25 = vld [vmem:[#allocation7 + $0x28] sm:$0xff]  ;;  %v2315_v60 = vld [vmem:[#allocation7 + $0x18] sm:$0xff] }
  0xfb   :  { %1004 = vmatpush.bf16.msra.mxu1 %v1874_v36  ;;  %v1994_v61 = vor.u32 %v2296_v63, %v1991_v5  ;;  %v612_v40 = vperm.slane %v2602_v41, 1  ;;  %v2316_v33 = vld [vmem:[#allocation7 + $0x20] sm:$0xff]  ;;  %v2327_v8 = vld [vmem:[#allocation7 + $0x78] sm:$0xff]  ;;  %v2314_v48 = vld [vmem:[#allocation7 + $0x10] sm:$0xff] }
  0xfc   :  { %967 = vmatmul.bf16.vlgmr.msrb.gmra.mxu2 %v609_v18  ;;  %v1794_v16 = vclamps-f32 %v532_v15, 1.0  ;;  %v2326_v49 = vld [vmem:[#allocation7 + $0x70] sm:$0xff]  ;;  %v2325_v52 = vld [vmem:[#allocation7 + $0x68] sm:$0xff]  ;;  %v2324_v58 = vld [vmem:[#allocation7 + $0x60] sm:$0xff] }
  0xfd   :  { %1016 = vmatpush.bf16.msra.mxu2 %v1946_v24  ;;  %v2313_v24 = vld [vmem:[#allocation7 + $0x8] sm:$0xff]  ;;  %v2323_v55 = vld [vmem:[#allocation7 + $0x58] sm:$0xff] }
  0xfe   :  { %1028 = vmatpush.bf16.msra.mxu3 %v2018_v42  ;;  %v538_v31 = vadd.f32 1.0, %v1794_v16  ;;  %992 = vmatpush.bf16.msra.mxu0 %v1802_v47 }
  0xff   :  { %1005 = vmatpush.bf16.msra.mxu1 %v1866_v13  ;;  %v2312_v13 = vld [vmem:[#allocation7] sm:$0xff] }
 0x100   :  { %v542_v59 = vmul.f32 %v538_v31, %v370_v57 }
 0x101   :  { %1017 = vmatpush.bf16.msra.mxu2 %v1938_v0 }
 0x102   :  { %1029 = vmatpush.bf16.msra.mxu3 %v2010_v28  ;;  %v610_v1 = vpack.c.bf16 %v542_v59, %v542_v59  ;;  %1256 = vmatpush.bf16.msrb.mxu0 %v2319_v27 }
 0x103   :  { %993 = vmatmul.bf16.vlgmr.msra.gmra.mxu0 %v2799_v6  ;;  %1269 = vmatpush.bf16.msrb.mxu1 %v2327_v8 }
 0x104   :  { %980 = vmatmul.bf16.vlgmr.msrb.gmra.mxu3 %v610_v1  ;;  %1006 = vmatmul.bf16.vlgmr.msra.gmra.mxu1 %v2802_v14 }
 0x105   :  { %1018 = vmatpush.bf16.msra.mxu2 %v1930_v46 }
 0x106   :  { %1030 = vmatpush.bf16.msra.mxu3 %v2002_v3  ;;  %1257 = vmatpush.bf16.msrb.mxu0 %v2318_v22 }
 0x107   :  { %1270 = vmatpush.bf16.msrb.mxu1 %v2326_v49 }
 0x10a   :  { %1031 = vmatpush.bf16.msra.mxu3 %v1994_v61  ;;  %1258 = vmatpush.bf16.msrb.mxu0 %v2317_v25  ;;  %v2320_v25 = vld [vmem:[#allocation7 + $0x40] sm:$0xff] }
 0x10b   :  { %1271 = vmatpush.bf16.msrb.mxu1 %v2325_v52 }
 0x10c   :  { %1019 = vmatmul.bf16.vlgmr.msra.gmra.mxu2 %v609_v18 }
 0x10e   :  { %1259 = vmatpush.bf16.msrb.mxu0 %v2316_v33 }
 0x10f   :  { %1272 = vmatpush.bf16.msrb.mxu1 %v2324_v58 }
 0x112   :  { %1260 = vmatpush.bf16.msrb.mxu0 %v2315_v60 }
 0x113   :  { %1273 = vmatpush.bf16.msrb.mxu1 %v2323_v55 }
 0x114   :  { %1032 = vmatmul.bf16.vlgmr.msra.gmra.mxu3 %v610_v1 }
 0x116   :  { %1261 = vmatpush.bf16.msrb.mxu0 %v2314_v48 }
 0x11a   :  { %1262 = vmatpush.bf16.msrb.mxu0 %v2313_v24 }
 0x11e   :  { %1263 = vmatpush.bf16.msrb.mxu0 %v2312_v13 }
 0x170   :  { %v942_v11 = vpop.f32.mrf.mxu0 }
 0x171   :  { %v955_v12 = vpop.f32.mrf.mxu1  ;;  %v943_v17 = vadd.f32 %v942_v11, %v611_v9  ;;  %v2322_v9 = vld [vmem:[#allocation7 + $0x50] sm:$0xff] }
 0x172   :  { %1274 = vmatpush.bf16.msrb.mxu1 %v2322_v9 }
 0x173   :  { %v956_v10 = vadd.f32 %v955_v12, %v943_v17 }
 0x178   :  { %v944_v19 = vpop.f32.mrf.mxu0 }
 0x179   :  { %v957_v20 = vpop.f32.mrf.mxu1 }
 0x17f   :  { %v968_v7 = vpop.f32.mrf.mxu2 }
 0x180   :  { %v994_v35 = vpop.f32.mrf.mxu0  ;;  %v969_v6 = vadd.f32 %v968_v7, %v956_v10  ;;  %v2321_v10 = vld [vmem:[#allocation7 + $0x48] sm:$0xff] }
 0x181   :  { %v1007_v21 = vpop.f32.mrf.mxu1  ;;  %v995_v37 = vadd.f32 %v994_v35, %v612_v40  ;;  %1275 = vmatpush.bf16.msrb.mxu1 %v2321_v10 }
 0x183   :  { %v1008_v45 = vadd.f32 %v1007_v21, %v995_v37 }
 0x185   :  { %1276 = vmatpush.bf16.msrb.mxu1 %v2320_v25 }
 0x187   :  { %v981_v14 = vpop.f32.mrf.mxu3  ;;  %v970_v23 = vpop.f32.mrf.mxu2 }
 0x188   :  { %v2823_v2 = vadd.f32 %v981_v14, %v969_v6  ;;  %v996_v29 = vpop.f32.mrf.mxu0 }
 0x189   :  { %v1009_v30 = vpop.f32.mrf.mxu1 }
 0x18a   :  { %v2826_v44 = vmul.f32 0.70710677, %v2823_v2  ;;  %v1037_v48 = vmul.f32 0.5, %v2823_v2 }
 0x18c   :  { %v1041_v32 = vmul.f32 %v2826_v44, %v2826_v44 }
 0x18e   :  { %v2831_v34 = vmin.f32 %v1041_v32, 16.0 }
 0x18f   :  { %v983_v38 = vpop.f32.mrf.mxu3  ;;  %v1020_v39 = vpop.f32.mrf.mxu2 }
 0x190   :  { %v1043_v42 = vmul.f32 2.1237322e-06, %v2831_v34  ;;  %v1054_v54 = vmul.f32 3.8918573e-05, %v2831_v34  ;;  %v1021_v36 = vadd.f32 %v1020_v39, %v1008_v45 }
 0x192   :  { %v1044_v41 = vadd.f32 0.00028619796, %v1043_v42  ;;  %v1055_v26 = vadd.f32 0.001143296, %v1054_v54 }
 0x194   :  { %v1045_v15 = vmul.f32 %v1044_v41, %v2831_v34  ;;  %v1056_v18 = vmul.f32 %v1055_v26, %v2831_v34 }
 0x196   :  { %v1046_v50 = vadd.f32 0.0036580483, %v1045_v15  ;;  %v1057_v62 = vadd.f32 0.014752088, %v1056_v18 }
 0x197   :  { %v1033_v43 = vpop.f32.mrf.mxu3  ;;  %v1022_v51 = vpop.f32.mrf.mxu2 }
 0x198   :  { %v1058_v16 = vmul.f32 %v1057_v62, %v2831_v34  ;;  %v2838_v28 = vadd.f32 %v1033_v43, %v1021_v36  ;;  %v1047_v56 = vmul.f32 %v1046_v50, %v2831_v34 }
 0x19a   :  { %v1059_v57 = vadd.f32 0.112945676, %v1058_v16  ;;  %v2842_v31 = vmul.f32 0.70710677, %v2838_v28  ;;  %v1048_v59 = vadd.f32 0.05243302, %v1047_v56 }
 0x19c   :  { %v1060_v47 = vmul.f32 %v1059_v57, %v2831_v34  ;;  %v1081_v53 = vmul.f32 %v2842_v31, %v2842_v31  ;;  %v1049_v46 = vmul.f32 %v1048_v59, %v2831_v34 }
 0x19e   :  { %v1061_v0 = vadd.f32 0.4994258, %v1060_v47  ;;  %v1082_v3 = vmin.f32 %v1081_v53, 16.0  ;;  %v1050_v17 = vadd.f32 0.18741608, %v1049_v46  ;;  %v2335_v46 = vld [vmem:[#allocation9 + $0x38] sm:$0xff] }
 0x19f   :  { %v1035_v4 = vpop.f32.mrf.mxu3  ;;  %1392 = vmatpush.bf16.msrb.mxu2 %v2335_v46 }
 0x1a0   :  { %v1062_v1 = vmul.f32 %v1061_v0, %v2831_v34  ;;  %v1083_v63 = vmul.f32 2.1237322e-06, %v1082_v3  ;;  %v1094_v5 = vmul.f32 3.8918573e-05, %v1082_v3  ;;  %v1051_v6 = vmul.f32 %v1050_v17, %v2831_v34  ;;  %v2332_v17 = vld [vmem:[#allocation9 + $0x20] sm:$0xff] }
 0x1a2   :  { %v1063_v61 = vadd.f32 1.0, %v1062_v1  ;;  %v1084_v11 = vadd.f32 0.00028619796, %v1083_v63  ;;  %v1095_v12 = vadd.f32 0.001143296, %v1094_v5 }
 0x1a3   :  { %v1052_v30 = vadd.f32 1.1283791, %v1051_v6 }
 0x1a4   :  { %2372 = vrcp.f32 %v1063_v61  ;;  %v1085_v19 = vmul.f32 %v1084_v11, %v1082_v3  ;;  %v1096_v20 = vmul.f32 %v1095_v12, %v1082_v3  ;;  %v1075_v32 = vand.u32 2147483648, %v1063_v61 }
 0x1a5   :  { %v1073_v37 = vand.u32 2147483647, %v1063_v61  ;;  %vm1069_vm1 = vweird.f32 %v1063_v61  ;;  %v1053_v60 = vmul.f32 %v1052_v30, %v2826_v44 }
 0x1a6   :  { %v1097_v7 = vadd.f32 0.014752088, %v1096_v20  ;;  %v1086_v27 = vadd.f32 0.0036580483, %v1085_v19  ;;  %v1076_v34 = vor.u32 1.1754944e-38, %v1075_v32  ;;  %v2333_v19 = vld [vmem:[#allocation9 + $0x28] sm:$0xff] }
 0x1a7   :  { %vm1074_vm3 = vcmp.eq.f32.partialorder %v1073_v37, 8.507059e+37  ;;  %v2329_v32 = vld [vmem:[#allocation9 + $0x8] sm:$0xff] }
 0x1a8   :  { %v1098_v35 = vmul.f32 %v1097_v7, %v1082_v3  ;;  %v1087_v23 = vmul.f32 %v1086_v27, %v1082_v3 }
 0x1aa   :  { %v2373_v21 = vpop.eup %2372  ;;  %v1099_v14 = vadd.f32 0.112945676, %v1098_v35  ;;  %v1088_v39 = vadd.f32 0.05243302, %v1087_v23  ;;  %v2331_v35 = vld [vmem:[#allocation9 + $0x18] sm:$0xff]  ;;  %v2330_v23 = vld [vmem:[#allocation9 + $0x10] sm:$0xff] }
 0x1ab   :  { %v1065_v22 = vmul.f32 %v2373_v21, %v1063_v61  ;;  %vm1070_vm0 = vweird.f32 %v2373_v21  ;;  %v2854_v61 = vld [vmem:[#allocation10] sm:$0xff] }
 0x1ac   :  { %v1100_v29 = vmul.f32 %v1099_v14, %v1082_v3  ;;  %vm1071_vm2 = vmor %vm1069_vm1, %vm1070_vm0  ;;  %v1089_v45 = vmul.f32 %v1088_v39, %v1082_v3  ;;  %v1159_v11 = vperm.slane %v2854_v61, 2  ;;  %v2328_v39 = vld [vmem:[#allocation9] sm:$0xff] }
 0x1ad   :  { %v1066_v40 = vsub.f32 1.0, %v1065_v22 }
 0x1ae   :  { %v1101_v38 = vadd.f32 0.4994258, %v1100_v29  ;;  %v1090_v36 = vadd.f32 0.18741608, %v1089_v45 }
 0x1af   :  { %v1067_v33 = vmul.f32 %v2373_v21, %v1066_v40 }
 0x1b0   :  { %v1102_v54 = vmul.f32 %v1101_v38, %v1082_v3  ;;  %v1091_v43 = vmul.f32 %v1090_v36, %v1082_v3  ;;  %v1038_v3 = vmul.f32 0.5, %v2838_v28 }
 0x1b1   :  { %v1068_v42 = vadd.f32 %v2373_v21, %v1067_v33 }
 0x1b2   :  { %v1103_v41 = vadd.f32 1.0, %v1102_v54  ;;  %v1092_v44 = vadd.f32 1.1283791, %v1091_v43 }
 0x1b3   :  { %v1072_v8 = vsel %vm1071_vm2, %v2373_v21, %v1068_v42 }
 0x1b4   :  { %v1077_v26 = vsel %vm1074_vm3, %v1076_v34, %v1072_v8  ;;  %2374 = vrcp.f32 %v1103_v41  ;;  %v1115_v52 = vand.u32 2147483648, %v1103_v41  ;;  %v1113_v57 = vand.u32 2147483647, %v1103_v41 }
 0x1b5   :  { %v1078_v15 = vmul.f32 %v1077_v26, %v1053_v60  ;;  %vm1109_vm5 = vweird.f32 %v1103_v41  ;;  %v1093_v58 = vmul.f32 %v1092_v44, %v2842_v31  ;;  %v2334_v31 = vld [vmem:[#allocation9 + $0x30] sm:$0xff] }
 0x1b6   :  { %v1116_v13 = vor.u32 1.1754944e-38, %v1115_v52  ;;  %vm1114_vm7 = vcmp.eq.f32.partialorder %v1113_v57, 8.507059e+37  ;;  %1393 = vmatpush.bf16.msrb.mxu2 %v2334_v31 }
 0x1b7   :  { %v2051_v18 = vclamps-f32 %v1078_v15, 1.0 }
 0x1b9   :  { %v1121_v49 = vadd.f32 1.0, %v2051_v18 }
 0x1ba   :  { %v2375_v50 = vpop.eup %2374  ;;  %1394 = vmatpush.bf16.msrb.mxu2 %v2333_v19 }
 0x1bb   :  { %v1123_v62 = vmul.f32 %v1121_v49, %v1037_v48  ;;  %v1105_v51 = vmul.f32 %v2375_v50, %v1103_v41  ;;  %vm1110_vm4 = vweird.f32 %v2375_v50 }
 0x1bc   :  { %vm1111_vm6 = vmor %vm1109_vm5, %vm1110_vm4  ;;  %vm1653_vm4 = vcmask 64512  }
 0x1bd   :  { %v1157_v16 = vpack.c.bf16 %v1123_v62, %v1123_v62  ;;  %v1106_v24 = vsub.f32 1.0, %v1105_v51 }
 0x1be   :  { %1395 = vmatpush.bf16.msrb.mxu2 %v2332_v17 }
 0x1bf   :  { %1264 = vmatmul.bf16.vlgmr.msrb.gmra.mxu0 %v1157_v16  ;;  %v1107_v56 = vmul.f32 %v2375_v50, %v1106_v24 }
 0x1c1   :  { %v1108_v47 = vadd.f32 %v2375_v50, %v1107_v56 }
 0x1c2   :  { %1396 = vmatpush.bf16.msrb.mxu2 %v2331_v35 }
 0x1c3   :  { %v1112_v2 = vsel %vm1111_vm6, %v2375_v50, %v1108_v47 }
 0x1c4   :  { %v1117_v53 = vsel %vm1114_vm7, %v1116_v13, %v1112_v2  ;;  %v2343_v2 = vld [vmem:[#allocation9 + $0x78] sm:$0xff] }
 0x1c5   :  { %v1118_v59 = vmul.f32 %v1117_v53, %v1093_v58  ;;  %1516 = vmatpush.bf16.msrb.mxu3 %v2343_v2  ;;  %v2342_v53 = vld [vmem:[#allocation9 + $0x70] sm:$0xff]  ;;  %v2347_v2 = vld [vmem:[#allocation9 + $0x98] sm:$0xff] }
 0x1c6   :  { %1397 = vmatpush.bf16.msrb.mxu2 %v2330_v23 }
 0x1c7   :  { %v2052_v0 = vclamps-f32 %v1118_v59, 1.0  ;;  %v1343_v59 = vperm.slane %v2854_v61, 3 }
 0x1c9   :  { %v1122_v4 = vadd.f32 1.0, %v2052_v0  ;;  %1517 = vmatpush.bf16.msrb.mxu3 %v2342_v53 }
 0x1ca   :  { %1398 = vmatpush.bf16.msrb.mxu2 %v2329_v32 }
 0x1cb   :  { %v1124_v1 = vmul.f32 %v1122_v4, %v1038_v3  ;;  %v2341_v3 = vld [vmem:[#allocation9 + $0x68] sm:$0xff] }
 0x1cd   :  { %v1158_v55 = vpack.c.bf16 %v1124_v1, %v1124_v1  ;;  %1518 = vmatpush.bf16.msrb.mxu3 %v2341_v3 }
 0x1ce   :  { %1399 = vmatpush.bf16.msrb.mxu2 %v2328_v39 }
 0x1cf   :  { %1277 = vmatmul.bf16.vlgmr.msrb.gmra.mxu1 %v1158_v55  ;;  %v2340_v55 = vld [vmem:[#allocation9 + $0x60] sm:$0xff] }
 0x1d1   :  { %1519 = vmatpush.bf16.msrb.mxu3 %v2340_v55 }
 0x23c   :  { %v1265_v63 = vpop.f32.mrf.mxu0 }
 0x23d   :  { %v1266_v12 = vadd.f32 %v1265_v63, %v1159_v11  ;;  %v2339_v11 = vld [vmem:[#allocation9 + $0x58] sm:$0xff] }
 0x23e   :  { %1520 = vmatpush.bf16.msrb.mxu3 %v2339_v11 }
 0x244   :  { %v1267_v5 = vpop.f32.mrf.mxu0 }
 0x24c   :  { %v1278_v9 = vpop.f32.mrf.mxu1 }
 0x24d   :  { %v1279_v20 = vadd.f32 %v1278_v9, %v1266_v12 }
 0x24f   :  { %v1283_v28 = vmul.f32 0.70710677, %v1279_v20  ;;  %v1282_v57 = vmul.f32 0.5, %v1279_v20  ;;  %v2338_v20 = vld [vmem:[#allocation9 + $0x50] sm:$0xff] }
 0x250   :  { %1521 = vmatpush.bf16.msrb.mxu3 %v2338_v20 }
 0x251   :  { %v1284_v7 = vmul.f32 %v1283_v28, %v1283_v28 }
 0x253   :  { %v1285_v27 = vmin.f32 %v1284_v7, 16.0 }
 0x254   :  { %v1280_v10 = vpop.f32.mrf.mxu1 }
 0x255   :  { %v1286_v21 = vmul.f32 2.1237322e-06, %v1285_v27  ;;  %v1297_v6 = vmul.f32 3.8918573e-05, %v1285_v27  ;;  %v2337_v10 = vld [vmem:[#allocation9 + $0x48] sm:$0xff] }
 0x256   :  { %1522 = vmatpush.bf16.msrb.mxu3 %v2337_v10 }
 0x257   :  { %v1287_v22 = vadd.f32 0.00028619796, %v1286_v21  ;;  %v1298_v14 = vadd.f32 0.001143296, %v1297_v6 }
 0x259   :  { %v1288_v25 = vmul.f32 %v1287_v22, %v1285_v27  ;;  %v1299_v40 = vmul.f32 %v1298_v14, %v1285_v27  ;;  %v2336_v22 = vld [vmem:[#allocation9 + $0x40] sm:$0xff] }
 0x25a   :  { %1523 = vmatpush.bf16.msrb.mxu3 %v2336_v22 }
 0x25b   :  { %v1300_v29 = vadd.f32 0.014752088, %v1299_v40  ;;  %v1289_v30 = vadd.f32 0.0036580483, %v1288_v25 }
 0x25d   :  { %v1301_v33 = vmul.f32 %v1300_v29, %v1285_v27  ;;  %v1290_v38 = vmul.f32 %v1289_v30, %v1285_v27 }
 0x25f   :  { %v1302_v37 = vadd.f32 0.112945676, %v1301_v33  ;;  %v1291_v34 = vadd.f32 0.05243302, %v1290_v38 }
 0x261   :  { %v1303_v42 = vmul.f32 %v1302_v37, %v1285_v27  ;;  %v1292_v41 = vmul.f32 %v1291_v34, %v1285_v27 }
 0x263   :  { %v1304_v54 = vadd.f32 0.4994258, %v1303_v42  ;;  %v1293_v26 = vadd.f32 0.18741608, %v1292_v41 }
 0x265   :  { %v1305_v60 = vmul.f32 %v1304_v54, %v1285_v27  ;;  %v1294_v15 = vmul.f32 %v1293_v26, %v1285_v27 }
 0x267   :  { %v1306_v8 = vadd.f32 1.0, %v1305_v60  ;;  %v1295_v49 = vadd.f32 1.1283791, %v1294_v15 }
 0x269   :  { %2376 = vrcp.f32 %v1306_v8  ;;  %v1318_v48 = vand.u32 2147483648, %v1306_v8  ;;  %v1316_v62 = vand.u32 2147483647, %v1306_v8  ;;  %vm1312_vm9 = vweird.f32 %v1306_v8 }
 0x26a   :  { %v1296_v16 = vmul.f32 %v1295_v49, %v1283_v28 }
 0x26b   :  { %v1319_v51 = vor.u32 1.1754944e-38, %v1318_v48  ;;  %vm1317_vm11 = vcmp.eq.f32.partialorder %v1316_v62, 8.507059e+37 }
 0x26f   :  { %v2377_v45 = vpop.eup %2376 }
 0x270   :  { %v1308_v18 = vmul.f32 %v2377_v45, %v1306_v8  ;;  %vm1313_vm8 = vweird.f32 %v2377_v45 }
 0x271   :  { %vm1314_vm10 = vmor %vm1312_vm9, %vm1313_vm8 }
 0x272   :  { %v1309_v36 = vsub.f32 1.0, %v1308_v18 }
 0x274   :  { %v1310_v50 = vmul.f32 %v2377_v45, %v1309_v36 }
 0x276   :  { %v1311_v43 = vadd.f32 %v2377_v45, %v1310_v50 }
 0x278   :  { %v1315_v24 = vsel %vm1314_vm10, %v2377_v45, %v1311_v43  ;;  %v2351_v43 = vld [vmem:[#allocation9 + $0xb8] sm:$0xff] }
 0x279   :  { %v1320_v52 = vsel %vm1317_vm11, %v1319_v51, %v1315_v24  ;;  %1640 = vmatpush.bf16.msra.mxu0 %v2351_v43  ;;  %v2350_v51 = vld [vmem:[#allocation9 + $0xb0] sm:$0xff] }
 0x27a   :  { %v1321_v44 = vmul.f32 %v1320_v52, %v1296_v16  ;;  %v1467_v16 = vperm.slane %v2854_v61, 4  ;;  %v2349_v52 = vld [vmem:[#allocation9 + $0xa8] sm:$0xff] }
 0x27c   :  { %v2117_v56 = vclamps-f32 %v1321_v44, 1.0 }
 0x27d   :  { %1641 = vmatpush.bf16.msra.mxu0 %v2350_v51 }
 0x27e   :  { %v1324_v47 = vadd.f32 1.0, %v2117_v56 }
 0x280   :  { %v1325_v13 = vmul.f32 %v1324_v47, %v1282_v57  ;;  %v2348_v57 = vld [vmem:[#allocation9 + $0xa0] sm:$0xff] }
 0x281   :  { %1642 = vmatpush.bf16.msra.mxu0 %v2349_v52 }
 0x282   :  { %v1342_v58 = vpack.c.bf16 %v1325_v13, %v1325_v13 }
 0x284   :  { %1400 = vmatmul.bf16.vlgmr.msrb.gmra.mxu2 %v1342_v58 }
 0x285   :  { %1643 = vmatpush.bf16.msra.mxu0 %v2348_v57 }
 0x289   :  { %1644 = vmatpush.bf16.msra.mxu0 %v2347_v2 }
 0x307   :  { %v1401_v0 = vpop.f32.mrf.mxu2 }
 0x308   :  { %v1402_v4 = vadd.f32 %v1401_v0, %v1343_v59 }
 0x30a   :  { %v1406_v1 = vmul.f32 0.70710677, %v1402_v4  ;;  %v1405_v48 = vmul.f32 0.5, %v1402_v4  ;;  %v2346_v4 = vld [vmem:[#allocation9 + $0x90] sm:$0xff] }
 0x30b   :  { %1645 = vmatpush.bf16.msra.mxu0 %v2346_v4 }
 0x30c   :  { %v1407_v63 = vmul.f32 %v1406_v1, %v1406_v1 }
 0x30e   :  { %v1408_v5 = vmin.f32 %v1407_v63, 16.0 }
 0x30f   :  { %v1403_v46 = vpop.f32.mrf.mxu2 }
 0x310   :  { %v1409_v31 = vmul.f32 2.1237322e-06, %v1408_v5  ;;  %v1420_v12 = vmul.f32 3.8918573e-05, %v1408_v5  ;;  %v2345_v46 = vld [vmem:[#allocation9 + $0x88] sm:$0xff] }
 0x311   :  { %1646 = vmatpush.bf16.msra.mxu0 %v2345_v46 }
 0x312   :  { %v1410_v9 = vadd.f32 0.00028619796, %v1409_v31  ;;  %v1421_v19 = vadd.f32 0.001143296, %v1420_v12 }
 0x314   :  { %v1411_v28 = vmul.f32 %v1410_v9, %v1408_v5  ;;  %v1422_v17 = vmul.f32 %v1421_v19, %v1408_v5  ;;  %v2344_v9 = vld [vmem:[#allocation9 + $0x80] sm:$0xff] }
 0x315   :  { %1647 = vmatpush.bf16.msra.mxu0 %v2344_v9 }
 0x316   :  { %v1423_v7 = vadd.f32 0.014752088, %v1422_v17  ;;  %v1412_v27 = vadd.f32 0.0036580483, %v1411_v28 }
 0x318   :  { %v1424_v35 = vmul.f32 %v1423_v7, %v1408_v5  ;;  %v1413_v6 = vmul.f32 %v1412_v27, %v1408_v5 }
 0x31a   :  { %v1425_v21 = vadd.f32 0.112945676, %v1424_v35  ;;  %v1414_v25 = vadd.f32 0.05243302, %v1413_v6 }
 0x31c   :  { %v1426_v14 = vmul.f32 %v1425_v21, %v1408_v5  ;;  %v1415_v30 = vmul.f32 %v1414_v25, %v1408_v5 }
 0x31e   :  { %v1427_v23 = vadd.f32 0.4994258, %v1426_v14  ;;  %v1416_v32 = vadd.f32 0.18741608, %v1415_v30 }
 0x320   :  { %v1428_v40 = vmul.f32 %v1427_v23, %v1408_v5  ;;  %v1417_v37 = vmul.f32 %v1416_v32, %v1408_v5 }
 0x322   :  { %v1429_v29 = vadd.f32 1.0, %v1428_v40  ;;  %v1418_v54 = vadd.f32 1.1283791, %v1417_v37 }
 0x324   :  { %2378 = vrcp.f32 %v1429_v29  ;;  %v1441_v42 = vand.u32 2147483648, %v1429_v29  ;;  %v1439_v60 = vand.u32 2147483647, %v1429_v29  ;;  %vm1435_vm13 = vweird.f32 %v1429_v29 }
 0x325   :  { %v1419_v26 = vmul.f32 %v1418_v54, %v1406_v1 }
 0x326   :  { %v1442_v41 = vor.u32 1.1754944e-38, %v1441_v42  ;;  %vm1440_vm15 = vcmp.eq.f32.partialorder %v1439_v60, 8.507059e+37 }
 0x32a   :  { %v2379_v33 = vpop.eup %2378 }
 0x32b   :  { %v1431_v38 = vmul.f32 %v2379_v33, %v1429_v29  ;;  %vm1436_vm12 = vweird.f32 %v2379_v33 }
 0x32c   :  { %vm1437_vm14 = vmor %vm1435_vm13, %vm1436_vm12 }
 0x32d   :  { %v1432_v39 = vsub.f32 1.0, %v1431_v38 }
 0x32f   :  { %v1433_v34 = vmul.f32 %v2379_v33, %v1432_v39 }
 0x331   :  { %v1434_v8 = vadd.f32 %v2379_v33, %v1433_v34 }
 0x333   :  { %v1438_v45 = vsel %vm1437_vm14, %v2379_v33, %v1434_v8  ;;  %v1591_v8 = vperm.slane %v2854_v61, 5 }
 0x334   :  { %v1443_v15 = vsel %vm1440_vm15, %v1442_v41, %v1438_v45 }
 0x335   :  { %v1444_v18 = vmul.f32 %v1443_v15, %v1419_v26 }
 0x337   :  { %v2150_v36 = vclamps-f32 %v1444_v18, 1.0 }
 0x339   :  { %v1447_v49 = vadd.f32 1.0, %v2150_v36 }
 0x33b   :  { %v1448_v50 = vmul.f32 %v1447_v49, %v1405_v48 }
 0x33d   :  { %v1466_v62 = vpack.c.bf16 %v1448_v50, %v1448_v50 }
 0x33f   :  { %1524 = vmatmul.bf16.vlgmr.msrb.gmra.mxu3 %v1466_v62 }
 0x3c2   :  { %v1525_v24 = vpop.f32.mrf.mxu3 }
 0x3c3   :  { %v1526_v44 = vadd.f32 %v1525_v24, %v1467_v16 }
 0x3c5   :  { %v1530_v56 = vmul.f32 0.70710677, %v1526_v44  ;;  %v1529_v42 = vmul.f32 0.5, %v1526_v44 }
 0x3c7   :  { %v1531_v47 = vmul.f32 %v1530_v56, %v1530_v56 }
 0x3c9   :  { %v1532_v13 = vmin.f32 %v1531_v47, 16.0 }
 0x3ca   :  { %v1527_v58 = vpop.f32.mrf.mxu3 }
 0x3cb   :  { %v1533_v53 = vmul.f32 2.1237322e-06, %v1532_v13  ;;  %v1544_v59 = vmul.f32 3.8918573e-05, %v1532_v13 }
 0x3cd   :  { %v1534_v0 = vadd.f32 0.00028619796, %v1533_v53  ;;  %v1545_v3 = vadd.f32 0.001143296, %v1544_v59 }
 0x3cf   :  { %v1535_v1 = vmul.f32 %v1534_v0, %v1532_v13  ;;  %v1546_v55 = vmul.f32 %v1545_v3, %v1532_v13 }
 0x3d1   :  { %v1547_v63 = vadd.f32 0.014752088, %v1546_v55  ;;  %v1536_v5 = vadd.f32 0.0036580483, %v1535_v1 }
 0x3d3   :  { %v1548_v11 = vmul.f32 %v1547_v63, %v1532_v13  ;;  %v1537_v12 = vmul.f32 %v1536_v5, %v1532_v13 }
 0x3d5   :  { %v1549_v31 = vadd.f32 0.112945676, %v1548_v11  ;;  %v1538_v28 = vadd.f32 0.05243302, %v1537_v12 }
 0x3d7   :  { %v1550_v19 = vmul.f32 %v1549_v31, %v1532_v13  ;;  %v1539_v27 = vmul.f32 %v1538_v28, %v1532_v13 }
 0x3d9   :  { %v1551_v20 = vadd.f32 0.4994258, %v1550_v19  ;;  %v1540_v10 = vadd.f32 0.18741608, %v1539_v27 }
 0x3db   :  { %v1552_v17 = vmul.f32 %v1551_v20, %v1532_v13  ;;  %v1541_v21 = vmul.f32 %v1540_v10, %v1532_v13 }
 0x3dd   :  { %v1553_v7 = vadd.f32 1.0, %v1552_v17  ;;  %v1542_v23 = vadd.f32 1.1283791, %v1541_v21 }
 0x3df   :  { %2380 = vrcp.f32 %v1553_v7  ;;  %v1565_v14 = vand.u32 2147483648, %v1553_v7  ;;  %v1563_v40 = vand.u32 2147483647, %v1553_v7  ;;  %vm1559_vm1 = vweird.f32 %v1553_v7 }
 0x3e0   :  { %v1543_v32 = vmul.f32 %v1542_v23, %v1530_v56 }
 0x3e1   :  { %v1566_v30 = vor.u32 1.1754944e-38, %v1565_v14  ;;  %vm1564_vm3 = vcmp.eq.f32.partialorder %v1563_v40, 8.507059e+37 }
 0x3e5   :  { %v2381_v35 = vpop.eup %2380 }
 0x3e6   :  { %v1555_v6 = vmul.f32 %v2381_v35, %v1553_v7  ;;  %vm1560_vm0 = vweird.f32 %v2381_v35 }
 0x3e7   :  { %vm1561_vm2 = vmor %vm1559_vm1, %vm1560_vm0 }
 0x3e8   :  { %v1556_v22 = vsub.f32 1.0, %v1555_v6 }
 0x3ea   :  { %v1557_v25 = vmul.f32 %v2381_v35, %v1556_v22 }
 0x3ec   :  { %v1558_v29 = vadd.f32 %v2381_v35, %v1557_v25 }
 0x3ee   :  { %v1562_v33 = vsel %vm1561_vm2, %v2381_v35, %v1558_v29 }
 0x3ef   :  { %v1567_v37 = vsel %vm1564_vm3, %v1566_v30, %v1562_v33 }
 0x3f0   :  { %v1568_v38 = vmul.f32 %v1567_v37, %v1543_v32 }
 0x3f2   :  { %v2183_v39 = vclamps-f32 %v1568_v38, 1.0 }
 0x3f4   :  { %v1571_v54 = vadd.f32 1.0, %v2183_v39 }
 0x3f6   :  { %v1572_v34 = vmul.f32 %v1571_v54, %v1529_v42 }
 0x3f8   :  { %v1590_v60 = vpack.c.bf16 %v1572_v34, %v1572_v34 }
 0x3fa   :  { %1648 = vmatmul.bf16.vlgmr.msra.gmra.mxu0 %v1590_v60 }
 0x477   :  { %v1649_v41 = vpop.f32.mrf.mxu0 }
 0x478   :  { %v1650_v26 = vadd.f32 %v1649_v41, %v1591_v8 }
 0x47a   :  { %1654 = vst.msk [vmem:[%s2869_s6] sm:$0xff] %vm1653_vm4, %v1650_v26 }
 0x47f   :  { %v1651_v45 = vpop.f32.mrf.mxu0 }
 0x480   :  { %1659 = vsyncpa [#allocation3], 1 }
 0x481   :  { %1660 = vsyncpa [#allocation5], 1 }
 0x482   :  { %1661 = vsyncpa [#allocation8], 1 }
 0x483   :  { %1662 = vsyncpa [#allocation11], 1 }

</bundles_post_ra>
